<compile_context>
chip_gen: v7x
topology: tpu7x:2x2x1
jax: 0.10.0
libtpu: 0.0.40
codegen_flags: <defaults>
</compile_context>

<pallas_src>
import functools

import jax
import jax.numpy as jnp
from jax import lax
from jax.experimental import pallas as pl
from jax.experimental.pallas import tpu as pltpu


def _drb_kernel(x_ref, mask_ref, w1_ref, w2_ref, w3_ref, w4_ref, w5_ref,
                b_ref, o_ref, f_ref, p_ref, *, filters, H, W, neg_slope):
    """Fused DenseResidualBlock for one batch element.

    x_ref    : (filters, (H+2)*(W+2))        padded+flattened input channels
    mask_ref : (1, H*(W+2))                  1 on valid pixels, 0 on halo cols
    w*_ref   : (filters, 9*(i+1)*filters)    bf16, tap-major im2col weights
    b_ref    : (5*filters, 1)                f32 biases (conv5 pre-scaled)
    o_ref    : (filters, H*(W+2))            output strip (2 halo cols/row)
    f_ref    : VMEM (5*filters, (H+2)*(W+2)+2) f32 dense feature map (+halo)
    p_ref    : VMEM (9*5*filters, H*(W+2))   bf16 im2col operand
    """
    Wp = W + 2
    NP = (H + 2) * Wp          # padded-image flat length
    L = H * Wp                 # compute-strip length (covers every output px)
    w_refs = (w1_ref, w2_ref, w3_ref, w4_ref, w5_ref)

    # Dense feature-map scratch: zero (this IS the conv halo), then drop in the
    # input channels (already padded + flattened by the wrapper).
    f_ref[...] = jnp.zeros_like(f_ref)
    f_ref[0:filters, 0:NP] = x_ref[...].astype(f_ref.dtype)

    mask = mask_ref[...]       # (1, L) f32

    for i in range(5):
        cin = (i + 1) * filters
        # ---- im2col: stack the 9 lane-shifted views (tap-major) as bf16 ----
        for ky in range(3):
            for kx in range(3):
                t = ky * 3 + kx
                d = ky * Wp + kx
                p_ref[t * cin:(t + 1) * cin, :] = (
                    f_ref[0:cin, d:d + L].astype(p_ref.dtype))
        # ---- one MXU matmul per stage: (cout, 9*cin) @ (9*cin, L), f32 acc --
        acc = jnp.dot(w_refs[i][...], p_ref[0:9 * cin, :],
                      preferred_element_type=jnp.float32)
        acc = acc + b_ref[i * filters:(i + 1) * filters, :]      # bias (cout,1)
        if i < 4:
            acc = jnp.where(acc >= 0, acc, acc * neg_slope)      # LeakyReLU(0.01)
            # Dense concat: write the new channels into the feature map's
            # interior; the mask re-zeroes the halo columns of the strip.
            f_ref[cin:cin + filters, Wp + 1:Wp + 1 + L] = acc * mask
        else:
            # b5: no activation; res_scale already folded into w5/b5.
            # Fuse the residual "+ x" (original input at the same pixels).
            y = acc + f_ref[0:filters, Wp + 1:Wp + 1 + L]
            o_ref[...] = y.astype(o_ref.dtype)


def dense_residual_block(x_nchw, params, res_scale=0.2):
    """Forward pass matching PyTorch DenseResidualBlock (NCHW in / NCHW out)."""
    N, C, H, W = x_nchw.shape
    filters = C
    Wp = W + 2
    NP = (H + 2) * Wp
    L = H * Wp

    # Pad the *input only* once (the per-stage halos live in VMEM).
    xp = jnp.pad(x_nchw, ((0, 0), (0, 0), (1, 1), (1, 1))).reshape(N, C, NP)

    # Pre-reshape weights HWIO (3,3,cin,cout) -> (cout, 9*cin) tap-major rows,
    # cast to bf16; fold res_scale into conv5 (scales the conv output only).
    ws, bs = [], []
    for i, (w, b) in enumerate(params):
        cin = (i + 1) * filters
        wr = jnp.transpose(w, (3, 0, 1, 2)).reshape(filters, 9 * cin)
        bb = b.astype(jnp.float32)
        if i == 4:
            wr = wr * res_scale
            bb = bb * res_scale
        ws.append(wr.astype(jnp.bfloat16))
        bs.append(bb)
    biases = jnp.concatenate(bs, axis=0).reshape(5 * filters, 1)

    # 0/1 mask over the flat compute strip: zero on the 2 halo columns per row.
    col = jnp.arange(L, dtype=jnp.int32) % Wp
    mask = (col < W).astype(jnp.float32).reshape(1, L)

    kernel = functools.partial(_drb_kernel, filters=filters, H=H, W=W,
                               neg_slope=0.01)  # nn.LeakyReLU() default slope

    # TODO(synk): for large images (e.g. H=W>=256, filters=64) tile H into row
    # bands (with 2 halo rows) as an extra parallel grid axis so the dense VMEM
    # scratch fits v7x's 64 MiB VMEM; at these sizes the whole image fits.
    out_flat = pl.pallas_call(
        kernel,
        out_shape=jax.ShapeDtypeStruct((N, filters, L), x_nchw.dtype),
        grid=(N,),
        in_specs=(
            [pl.BlockSpec((None, filters, NP), lambda n: (n, 0, 0)),
             pl.BlockSpec((1, L), lambda n: (0, 0))]
            + [pl.BlockSpec(tuple(w.shape), lambda n: (0, 0)) for w in ws]
            + [pl.BlockSpec((5 * filters, 1), lambda n: (0, 0))]
        ),
        out_specs=pl.BlockSpec((None, filters, L), lambda n: (n, 0, 0)),
        scratch_shapes=[
            pltpu.VMEM((5 * filters, NP + 2), jnp.float32),   # dense map + halo
            pltpu.VMEM((9 * 5 * filters, L), jnp.bfloat16),   # im2col operand
        ],
        compiler_params=pltpu.CompilerParams(
            dimension_semantics=("parallel",)),
    )(xp, mask, *ws, biases)

    # Strip the 2 halo columns per row -> NCHW.
    return out_flat.reshape(N, filters, H, Wp)[:, :, :, :W]


def init_dense_residual_block_params(key, filters):
    """Deterministic synthetic weights.  Conv i: Cin=(i+1)*filters, Cout=filters."""
    params = []
    for i in range(5):
        cin = (i + 1) * filters
        kw, kb, key = jax.random.split(key, 3)
        w = jax.random.normal(kw, (3, 3, cin, filters), jnp.float32) * 0.05
        b = jax.random.normal(kb, (filters,), jnp.float32) * 0.01
        params.append((w, b))
    return params


# ---------------------------------------------------------------------------
# Pure-JAX reference (sanity check only; hot path lives in the fused kernel).
# ---------------------------------------------------------------------------
def _conv3x3_ref(x_nhwc, w_hwio, b, apply_lrelu):
    y = lax.conv_general_dilated(
        x_nhwc, w_hwio, window_strides=(1, 1), padding="SAME",
        dimension_numbers=("NHWC", "HWIO", "NHWC"))
    y = y + b[None, None, None, :]
    if apply_lrelu:
        y = jnp.where(y >= 0, y, 0.01 * y)
    return y


def dense_residual_block_ref(x_nchw, params, res_scale=0.2):
    x = jnp.transpose(x_nchw, (0, 2, 3, 1))
    inputs = x
    out = None
    for i, (w, b) in enumerate(params):
        out = _conv3x3_ref(inputs, w, b, apply_lrelu=(i < 4))
        inputs = jnp.concatenate([inputs, out], axis=-1)
    y = out * res_scale + x
    return jnp.transpose(y, (0, 3, 1, 2))


if __name__ == "__main__":
    key = jax.random.PRNGKey(0)
    kx, kp = jax.random.split(key)

    batch, filters, H, W = 2, 4, 16, 16
    x = jax.random.normal(kx, (batch, filters, H, W), jnp.float32)  # NCHW
    params = init_dense_residual_block_params(kp, filters)

    fwd = jax.jit(lambda xx: dense_residual_block(xx, params))
    out = fwd(x)
    jax.block_until_ready(out)

    ref = dense_residual_block_ref(x, params)
    jax.block_until_ready(ref)

    assert out.shape == x.shape and out.dtype == x.dtype
    if not jnp.allclose(out, ref, atol=2e-2, rtol=2e-2):
        err = float(jnp.max(jnp.abs(out - ref)))
        raise AssertionError(
            f"Pallas DenseResidualBlock mismatch vs JAX reference (max abs err {err})")

    print("KERNEL_OK")
</pallas_src>

<mosaic_0001>
module attributes {stable_mosaic.version = 11 : i64} {
  func.func @_drb_kernel(%arg0: i32, %arg1: memref<1x4x324xf32, #tpu.memory_space<vmem>>, %arg2: memref<1x288xf32, #tpu.memory_space<vmem>>, %arg3: memref<4x36xbf16, #tpu.memory_space<vmem>>, %arg4: memref<4x72xbf16, #tpu.memory_space<vmem>>, %arg5: memref<4x108xbf16, #tpu.memory_space<vmem>>, %arg6: memref<4x144xbf16, #tpu.memory_space<vmem>>, %arg7: memref<4x180xbf16, #tpu.memory_space<vmem>>, %arg8: memref<20x1xf32, #tpu.memory_space<vmem>>, %arg9: memref<1x4x288xf32, #tpu.memory_space<vmem>>, %arg10: memref<20x326xf32, #tpu.memory_space<vmem>>, %arg11: memref<180x288xbf16, #tpu.memory_space<vmem>>) attributes {dimension_semantics = [#tpu.dimension_semantics<parallel>], iteration_bounds = array<i64: 2>, scalar_prefetch = 0 : i64, scratch_operands = 2 : i64, tpu.core_type = #tpu.core_type<tc>, window_params = [{transform_indices = @transform_0, window_bounds = array<i64: 1, 4, 324>}, {pipeline_mode = #tpu.pipeline_mode<synchronous>, transform_indices = @transform_1, window_bounds = array<i64: 1, 288>}, {pipeline_mode = #tpu.pipeline_mode<synchronous>, transform_indices = @transform_2, window_bounds = array<i64: 4, 36>}, {pipeline_mode = #tpu.pipeline_mode<synchronous>, transform_indices = @transform_3, window_bounds = array<i64: 4, 72>}, {pipeline_mode = #tpu.pipeline_mode<synchronous>, transform_indices = @transform_4, window_bounds = array<i64: 4, 108>}, {pipeline_mode = #tpu.pipeline_mode<synchronous>, transform_indices = @transform_5, window_bounds = array<i64: 4, 144>}, {pipeline_mode = #tpu.pipeline_mode<synchronous>, transform_indices = @transform_6, window_bounds = array<i64: 4, 180>}, {pipeline_mode = #tpu.pipeline_mode<synchronous>, transform_indices = @transform_7, window_bounds = array<i64: 20, 1>}, {transform_indices = @transform_8, window_bounds = array<i64: 1, 4, 288>}]} {
    %cst = arith.constant 0.000000e+00 : f32
    %0 = vector.broadcast %cst : f32 to vector<20x326xf32>
    %c0 = arith.constant 0 : index
    %c0_0 = arith.constant 0 : index
    %1 = vector.load %arg10[%c0, %c0_0] : memref<20x326xf32, #tpu.memory_space<vmem>>, vector<20x326xf32>
    tpu.vector_store %arg10[%c0, %c0_0], %0 {strides = array<i32>} : memref<20x326xf32, #tpu.memory_space<vmem>>, vector<20x326xf32>,
    %c0_1 = arith.constant 0 : index
    %c0_2 = arith.constant 0 : index
    %c0_3 = arith.constant 0 : index
    %2 = vector.load %arg1[%c0_1, %c0_2, %c0_3] : memref<1x4x324xf32, #tpu.memory_space<vmem>>, vector<1x4x324xf32>
    %3 = vector.shape_cast %2 : vector<1x4x324xf32> to vector<4x324xf32>
    %c0_4 = arith.constant 0 : index
    %c0_5 = arith.constant 0 : index
    %4 = vector.load %arg10[%c0_4, %c0_5] : memref<20x326xf32, #tpu.memory_space<vmem>>, vector<4x324xf32>
    tpu.vector_store %arg10[%c0_4, %c0_5], %3 {strides = array<i32>} : memref<20x326xf32, #tpu.memory_space<vmem>>, vector<4x324xf32>,
    %c0_6 = arith.constant 0 : index
    %c0_7 = arith.constant 0 : index
    %5 = vector.load %arg2[%c0_6, %c0_7] : memref<1x288xf32, #tpu.memory_space<vmem>>, vector<1x288xf32>
    %c0_8 = arith.constant 0 : index
    %c0_9 = arith.constant 0 : index
    %6 = vector.load %arg10[%c0_8, %c0_9] : memref<20x326xf32, #tpu.memory_space<vmem>>, vector<4x288xf32>
    %7 = arith.truncf %6 : vector<4x288xf32> to vector<4x288xbf16>
    %c0_10 = arith.constant 0 : index
    %c0_11 = arith.constant 0 : index
    %8 = vector.load %arg11[%c0_10, %c0_11] : memref<180x288xbf16, #tpu.memory_space<vmem>>, vector<4x288xbf16>
    tpu.vector_store %arg11[%c0_10, %c0_11], %7 {strides = array<i32>} : memref<180x288xbf16, #tpu.memory_space<vmem>>, vector<4x288xbf16>,
    %c0_12 = arith.constant 0 : index
    %c1 = arith.constant 1 : index
    %9 = vector.load %arg10[%c0_12, %c1] : memref<20x326xf32, #tpu.memory_space<vmem>>, vector<4x288xf32>
    %10 = arith.truncf %9 : vector<4x288xf32> to vector<4x288xbf16>
    %c4 = arith.constant 4 : index
    %c0_13 = arith.constant 0 : index
    %11 = vector.load %arg11[%c4, %c0_13] : memref<180x288xbf16, #tpu.memory_space<vmem>>, vector<4x288xbf16>
    tpu.vector_store %arg11[%c4, %c0_13], %10 {strides = array<i32>} : memref<180x288xbf16, #tpu.memory_space<vmem>>, vector<4x288xbf16>,
    %c0_14 = arith.constant 0 : index
    %c2 = arith.constant 2 : index
    %12 = vector.load %arg10[%c0_14, %c2] : memref<20x326xf32, #tpu.memory_space<vmem>>, vector<4x288xf32>
    %13 = arith.truncf %12 : vector<4x288xf32> to vector<4x288xbf16>
    %c8 = arith.constant 8 : index
    %c0_15 = arith.constant 0 : index
    %14 = vector.load %arg11[%c8, %c0_15] : memref<180x288xbf16, #tpu.memory_space<vmem>>, vector<4x288xbf16>
    tpu.vector_store %arg11[%c8, %c0_15], %13 {strides = array<i32>} : memref<180x288xbf16, #tpu.memory_space<vmem>>, vector<4x288xbf16>,
    %c0_16 = arith.constant 0 : index
    %c18 = arith.constant 18 : index
    %15 = vector.load %arg10[%c0_16, %c18] : memref<20x326xf32, #tpu.memory_space<vmem>>, vector<4x288xf32>
    %16 = arith.truncf %15 : vector<4x288xf32> to vector<4x288xbf16>
    %c12 = arith.constant 12 : index
    %c0_17 = arith.constant 0 : index
    %17 = vector.load %arg11[%c12, %c0_17] : memref<180x288xbf16, #tpu.memory_space<vmem>>, vector<4x288xbf16>
    tpu.vector_store %arg11[%c12, %c0_17], %16 {strides = array<i32>} : memref<180x288xbf16, #tpu.memory_space<vmem>>, vector<4x288xbf16>,
    %c0_18 = arith.constant 0 : index
    %c19 = arith.constant 19 : index
    %18 = vector.load %arg10[%c0_18, %c19] : memref<20x326xf32, #tpu.memory_space<vmem>>, vector<4x288xf32>
    %19 = arith.truncf %18 : vector<4x288xf32> to vector<4x288xbf16>
    %c16 = arith.constant 16 : index
    %c0_19 = arith.constant 0 : index
    %20 = vector.load %arg11[%c16, %c0_19] : memref<180x288xbf16, #tpu.memory_space<vmem>>, vector<4x288xbf16>
    tpu.vector_store %arg11[%c16, %c0_19], %19 {strides = array<i32>} : memref<180x288xbf16, #tpu.memory_space<vmem>>, vector<4x288xbf16>,
    %c0_20 = arith.constant 0 : index
    %c20 = arith.constant 20 : index
    %21 = vector.load %arg10[%c0_20, %c20] : memref<20x326xf32, #tpu.memory_space<vmem>>, vector<4x288xf32>
    %22 = arith.truncf %21 : vector<4x288xf32> to vector<4x288xbf16>
    %c20_21 = arith.constant 20 : index
    %c0_22 = arith.constant 0 : index
    %23 = vector.load %arg11[%c20_21, %c0_22] : memref<180x288xbf16, #tpu.memory_space<vmem>>, vector<4x288xbf16>
    tpu.vector_store %arg11[%c20_21, %c0_22], %22 {strides = array<i32>} : memref<180x288xbf16, #tpu.memory_space<vmem>>, vector<4x288xbf16>,
    %c0_23 = arith.constant 0 : index
    %c36 = arith.constant 36 : index
    %24 = vector.load %arg10[%c0_23, %c36] : memref<20x326xf32, #tpu.memory_space<vmem>>, vector<4x288xf32>
    %25 = arith.truncf %24 : vector<4x288xf32> to vector<4x288xbf16>
    %c24 = arith.constant 24 : index
    %c0_24 = arith.constant 0 : index
    %26 = vector.load %arg11[%c24, %c0_24] : memref<180x288xbf16, #tpu.memory_space<vmem>>, vector<4x288xbf16>
    tpu.vector_store %arg11[%c24, %c0_24], %25 {strides = array<i32>} : memref<180x288xbf16, #tpu.memory_space<vmem>>, vector<4x288xbf16>,
    %c0_25 = arith.constant 0 : index
    %c37 = arith.constant 37 : index
    %27 = vector.load %arg10[%c0_25, %c37] : memref<20x326xf32, #tpu.memory_space<vmem>>, vector<4x288xf32>
    %28 = arith.truncf %27 : vector<4x288xf32> to vector<4x288xbf16>
    %c28 = arith.constant 28 : index
    %c0_26 = arith.constant 0 : index
    %29 = vector.load %arg11[%c28, %c0_26] : memref<180x288xbf16, #tpu.memory_space<vmem>>, vector<4x288xbf16>
    tpu.vector_store %arg11[%c28, %c0_26], %28 {strides = array<i32>} : memref<180x288xbf16, #tpu.memory_space<vmem>>, vector<4x288xbf16>,
    %c0_27 = arith.constant 0 : index
    %c38 = arith.constant 38 : index
    %30 = vector.load %arg10[%c0_27, %c38] : memref<20x326xf32, #tpu.memory_space<vmem>>, vector<4x288xf32>
    %31 = arith.truncf %30 : vector<4x288xf32> to vector<4x288xbf16>
    %c32 = arith.constant 32 : index
    %c0_28 = arith.constant 0 : index
    %32 = vector.load %arg11[%c32, %c0_28] : memref<180x288xbf16, #tpu.memory_space<vmem>>, vector<4x288xbf16>
    tpu.vector_store %arg11[%c32, %c0_28], %31 {strides = array<i32>} : memref<180x288xbf16, #tpu.memory_space<vmem>>, vector<4x288xbf16>,
    %c0_29 = arith.constant 0 : index
    %c0_30 = arith.constant 0 : index
    %33 = vector.load %arg3[%c0_29, %c0_30] : memref<4x36xbf16, #tpu.memory_space<vmem>>, vector<4x36xbf16>
    %c0_31 = arith.constant 0 : index
    %c0_32 = arith.constant 0 : index
    %34 = vector.load %arg11[%c0_31, %c0_32] : memref<180x288xbf16, #tpu.memory_space<vmem>>, vector<36x288xbf16>
    %cst_33 = arith.constant dense<0.000000e+00> : vector<4x288xf32>
    %35 = tpu.matmul %33, %34, %cst_33 {dimension_numbers = #tpu.dot_dimension_numbers<[1], [0], [0], [1], [0, 0, 1, 1], [], []>} : vector<4x36xbf16>, vector<36x288xbf16>, vector<4x288xf32> -> vector<4x288xf32>
    %c0_34 = arith.constant 0 : index
    %c0_35 = arith.constant 0 : index
    %36 = vector.load %arg8[%c0_34, %c0_35] : memref<20x1xf32, #tpu.memory_space<vmem>>, vector<4x1xf32>
    %37 = vector.broadcast %36 : vector<4x1xf32> to vector<4x288xf32>
    %38 = arith.addf %35, %37 : vector<4x288xf32>
    %cst_36 = arith.constant 0.000000e+00 : f32
    %39 = vector.broadcast %cst_36 : f32 to vector<4x288xf32>
    %40 = arith.cmpf oge, %38, %39 : vector<4x288xf32>
    %cst_37 = arith.constant 0.00999999977 : f32
    %41 = vector.broadcast %cst_37 : f32 to vector<4x288xf32>
    %42 = arith.mulf %38, %41 : vector<4x288xf32>
    %43 = arith.select %40, %38, %42 : vector<4x288xi1>, vector<4x288xf32>
    %44 = vector.broadcast %5 : vector<1x288xf32> to vector<4x288xf32>
    %45 = arith.mulf %43, %44 : vector<4x288xf32>
    %c4_38 = arith.constant 4 : index
    %c19_39 = arith.constant 19 : index
    %46 = vector.load %arg10[%c4_38, %c19_39] : memref<20x326xf32, #tpu.memory_space<vmem>>, vector<4x288xf32>
    tpu.vector_store %arg10[%c4_38, %c19_39], %45 {strides = array<i32>} : memref<20x326xf32, #tpu.memory_space<vmem>>, vector<4x288xf32>,
    %c0_40 = arith.constant 0 : index
    %c0_41 = arith.constant 0 : index
    %47 = vector.load %arg10[%c0_40, %c0_41] : memref<20x326xf32, #tpu.memory_space<vmem>>, vector<8x288xf32>
    %48 = arith.truncf %47 : vector<8x288xf32> to vector<8x288xbf16>
    %c0_42 = arith.constant 0 : index
    %c0_43 = arith.constant 0 : index
    %49 = vector.load %arg11[%c0_42, %c0_43] : memref<180x288xbf16, #tpu.memory_space<vmem>>, vector<8x288xbf16>
    tpu.vector_store %arg11[%c0_42, %c0_43], %48 {strides = array<i32>} : memref<180x288xbf16, #tpu.memory_space<vmem>>, vector<8x288xbf16>,
    %c0_44 = arith.constant 0 : index
    %c1_45 = arith.constant 1 : index
    %50 = vector.load %arg10[%c0_44, %c1_45] : memref<20x326xf32, #tpu.memory_space<vmem>>, vector<8x288xf32>
    %51 = arith.truncf %50 : vector<8x288xf32> to vector<8x288xbf16>
    %c8_46 = arith.constant 8 : index
    %c0_47 = arith.constant 0 : index
    %52 = vector.load %arg11[%c8_46, %c0_47] : memref<180x288xbf16, #tpu.memory_space<vmem>>, vector<8x288xbf16>
    tpu.vector_store %arg11[%c8_46, %c0_47], %51 {strides = array<i32>} : memref<180x288xbf16, #tpu.memory_space<vmem>>, vector<8x288xbf16>,
    %c0_48 = arith.constant 0 : index
    %c2_49 = arith.constant 2 : index
    %53 = vector.load %arg10[%c0_48, %c2_49] : memref<20x326xf32, #tpu.memory_space<vmem>>, vector<8x288xf32>
    %54 = arith.truncf %53 : vector<8x288xf32> to vector<8x288xbf16>
    %c16_50 = arith.constant 16 : index
    %c0_51 = arith.constant 0 : index
    %55 = vector.load %arg11[%c16_50, %c0_51] : memref<180x288xbf16, #tpu.memory_space<vmem>>, vector<8x288xbf16>
    tpu.vector_store %arg11[%c16_50, %c0_51], %54 {strides = array<i32>} : memref<180x288xbf16, #tpu.memory_space<vmem>>, vector<8x288xbf16>,
    %c0_52 = arith.constant 0 : index
    %c18_53 = arith.constant 18 : index
    %56 = vector.load %arg10[%c0_52, %c18_53] : memref<20x326xf32, #tpu.memory_space<vmem>>, vector<8x288xf32>
    %57 = arith.truncf %56 : vector<8x288xf32> to vector<8x288xbf16>
    %c24_54 = arith.constant 24 : index
    %c0_55 = arith.constant 0 : index
    %58 = vector.load %arg11[%c24_54, %c0_55] : memref<180x288xbf16, #tpu.memory_space<vmem>>, vector<8x288xbf16>
    tpu.vector_store %arg11[%c24_54, %c0_55], %57 {strides = array<i32>} : memref<180x288xbf16, #tpu.memory_space<vmem>>, vector<8x288xbf16>,
    %c0_56 = arith.constant 0 : index
    %c19_57 = arith.constant 19 : index
    %59 = vector.load %arg10[%c0_56, %c19_57] : memref<20x326xf32, #tpu.memory_space<vmem>>, vector<8x288xf32>
    %60 = arith.truncf %59 : vector<8x288xf32> to vector<8x288xbf16>
    %c32_58 = arith.constant 32 : index
    %c0_59 = arith.constant 0 : index
    %61 = vector.load %arg11[%c32_58, %c0_59] : memref<180x288xbf16, #tpu.memory_space<vmem>>, vector<8x288xbf16>
    tpu.vector_store %arg11[%c32_58, %c0_59], %60 {strides = array<i32>} : memref<180x288xbf16, #tpu.memory_space<vmem>>, vector<8x288xbf16>,
    %c0_60 = arith.constant 0 : index
    %c20_61 = arith.constant 20 : index
    %62 = vector.load %arg10[%c0_60, %c20_61] : memref<20x326xf32, #tpu.memory_space<vmem>>, vector<8x288xf32>
    %63 = arith.truncf %62 : vector<8x288xf32> to vector<8x288xbf16>
    %c40 = arith.constant 40 : index
    %c0_62 = arith.constant 0 : index
    %64 = vector.load %arg11[%c40, %c0_62] : memref<180x288xbf16, #tpu.memory_space<vmem>>, vector<8x288xbf16>
    tpu.vector_store %arg11[%c40, %c0_62], %63 {strides = array<i32>} : memref<180x288xbf16, #tpu.memory_space<vmem>>, vector<8x288xbf16>,
    %c0_63 = arith.constant 0 : index
    %c36_64 = arith.constant 36 : index
    %65 = vector.load %arg10[%c0_63, %c36_64] : memref<20x326xf32, #tpu.memory_space<vmem>>, vector<8x288xf32>
    %66 = arith.truncf %65 : vector<8x288xf32> to vector<8x288xbf16>
    %c48 = arith.constant 48 : index
    %c0_65 = arith.constant 0 : index
    %67 = vector.load %arg11[%c48, %c0_65] : memref<180x288xbf16, #tpu.memory_space<vmem>>, vector<8x288xbf16>
    tpu.vector_store %arg11[%c48, %c0_65], %66 {strides = array<i32>} : memref<180x288xbf16, #tpu.memory_space<vmem>>, vector<8x288xbf16>,
    %c0_66 = arith.constant 0 : index
    %c37_67 = arith.constant 37 : index
    %68 = vector.load %arg10[%c0_66, %c37_67] : memref<20x326xf32, #tpu.memory_space<vmem>>, vector<8x288xf32>
    %69 = arith.truncf %68 : vector<8x288xf32> to vector<8x288xbf16>
    %c56 = arith.constant 56 : index
    %c0_68 = arith.constant 0 : index
    %70 = vector.load %arg11[%c56, %c0_68] : memref<180x288xbf16, #tpu.memory_space<vmem>>, vector<8x288xbf16>
    tpu.vector_store %arg11[%c56, %c0_68], %69 {strides = array<i32>} : memref<180x288xbf16, #tpu.memory_space<vmem>>, vector<8x288xbf16>,
    %c0_69 = arith.constant 0 : index
    %c38_70 = arith.constant 38 : index
    %71 = vector.load %arg10[%c0_69, %c38_70] : memref<20x326xf32, #tpu.memory_space<vmem>>, vector<8x288xf32>
    %72 = arith.truncf %71 : vector<8x288xf32> to vector<8x288xbf16>
    %c64 = arith.constant 64 : index
    %c0_71 = arith.constant 0 : index
    %73 = vector.load %arg11[%c64, %c0_71] : memref<180x288xbf16, #tpu.memory_space<vmem>>, vector<8x288xbf16>
    tpu.vector_store %arg11[%c64, %c0_71], %72 {strides = array<i32>} : memref<180x288xbf16, #tpu.memory_space<vmem>>, vector<8x288xbf16>,
    %c0_72 = arith.constant 0 : index
    %c0_73 = arith.constant 0 : index
    %74 = vector.load %arg4[%c0_72, %c0_73] : memref<4x72xbf16, #tpu.memory_space<vmem>>, vector<4x72xbf16>
    %c0_74 = arith.constant 0 : index
    %c0_75 = arith.constant 0 : index
    %75 = vector.load %arg11[%c0_74, %c0_75] : memref<180x288xbf16, #tpu.memory_space<vmem>>, vector<72x288xbf16>
    %cst_76 = arith.constant dense<0.000000e+00> : vector<4x288xf32>
    %76 = tpu.matmul %74, %75, %cst_76 {dimension_numbers = #tpu.dot_dimension_numbers<[1], [0], [0], [1], [0, 0, 1, 1], [], []>} : vector<4x72xbf16>, vector<72x288xbf16>, vector<4x288xf32> -> vector<4x288xf32>
    %c4_77 = arith.constant 4 : index
    %c0_78 = arith.constant 0 : index
    %77 = vector.load %arg8[%c4_77, %c0_78] : memref<20x1xf32, #tpu.memory_space<vmem>>, vector<4x1xf32>
    %78 = vector.broadcast %77 : vector<4x1xf32> to vector<4x288xf32>
    %79 = arith.addf %76, %78 : vector<4x288xf32>
    %cst_79 = arith.constant 0.000000e+00 : f32
    %80 = vector.broadcast %cst_79 : f32 to vector<4x288xf32>
    %81 = arith.cmpf oge, %79, %80 : vector<4x288xf32>
    %cst_80 = arith.constant 0.00999999977 : f32
    %82 = vector.broadcast %cst_80 : f32 to vector<4x288xf32>
    %83 = arith.mulf %79, %82 : vector<4x288xf32>
    %84 = arith.select %81, %79, %83 : vector<4x288xi1>, vector<4x288xf32>
    %85 = vector.broadcast %5 : vector<1x288xf32> to vector<4x288xf32>
    %86 = arith.mulf %84, %85 : vector<4x288xf32>
    %c8_81 = arith.constant 8 : index
    %c19_82 = arith.constant 19 : index
    %87 = vector.load %arg10[%c8_81, %c19_82] : memref<20x326xf32, #tpu.memory_space<vmem>>, vector<4x288xf32>
    tpu.vector_store %arg10[%c8_81, %c19_82], %86 {strides = array<i32>} : memref<20x326xf32, #tpu.memory_space<vmem>>, vector<4x288xf32>,
    %c0_83 = arith.constant 0 : index
    %c0_84 = arith.constant 0 : index
    %88 = vector.load %arg10[%c0_83, %c0_84] : memref<20x326xf32, #tpu.memory_space<vmem>>, vector<12x288xf32>
    %89 = arith.truncf %88 : vector<12x288xf32> to vector<12x288xbf16>
    %c0_85 = arith.constant 0 : index
    %c0_86 = arith.constant 0 : index
    %90 = vector.load %arg11[%c0_85, %c0_86] : memref<180x288xbf16, #tpu.memory_space<vmem>>, vector<12x288xbf16>
    tpu.vector_store %arg11[%c0_85, %c0_86], %89 {strides = array<i32>} : memref<180x288xbf16, #tpu.memory_space<vmem>>, vector<12x288xbf16>,
    %c0_87 = arith.constant 0 : index
    %c1_88 = arith.constant 1 : index
    %91 = vector.load %arg10[%c0_87, %c1_88] : memref<20x326xf32, #tpu.memory_space<vmem>>, vector<12x288xf32>
    %92 = arith.truncf %91 : vector<12x288xf32> to vector<12x288xbf16>
    %c12_89 = arith.constant 12 : index
    %c0_90 = arith.constant 0 : index
    %93 = vector.load %arg11[%c12_89, %c0_90] : memref<180x288xbf16, #tpu.memory_space<vmem>>, vector<12x288xbf16>
    tpu.vector_store %arg11[%c12_89, %c0_90], %92 {strides = array<i32>} : memref<180x288xbf16, #tpu.memory_space<vmem>>, vector<12x288xbf16>,
    %c0_91 = arith.constant 0 : index
    %c2_92 = arith.constant 2 : index
    %94 = vector.load %arg10[%c0_91, %c2_92] : memref<20x326xf32, #tpu.memory_space<vmem>>, vector<12x288xf32>
    %95 = arith.truncf %94 : vector<12x288xf32> to vector<12x288xbf16>
    %c24_93 = arith.constant 24 : index
    %c0_94 = arith.constant 0 : index
    %96 = vector.load %arg11[%c24_93, %c0_94] : memref<180x288xbf16, #tpu.memory_space<vmem>>, vector<12x288xbf16>
    tpu.vector_store %arg11[%c24_93, %c0_94], %95 {strides = array<i32>} : memref<180x288xbf16, #tpu.memory_space<vmem>>, vector<12x288xbf16>,
    %c0_95 = arith.constant 0 : index
    %c18_96 = arith.constant 18 : index
    %97 = vector.load %arg10[%c0_95, %c18_96] : memref<20x326xf32, #tpu.memory_space<vmem>>, vector<12x288xf32>
    %98 = arith.truncf %97 : vector<12x288xf32> to vector<12x288xbf16>
    %c36_97 = arith.constant 36 : index
    %c0_98 = arith.constant 0 : index
    %99 = vector.load %arg11[%c36_97, %c0_98] : memref<180x288xbf16, #tpu.memory_space<vmem>>, vector<12x288xbf16>
    tpu.vector_store %arg11[%c36_97, %c0_98], %98 {strides = array<i32>} : memref<180x288xbf16, #tpu.memory_space<vmem>>, vector<12x288xbf16>,
    %c0_99 = arith.constant 0 : index
    %c19_100 = arith.constant 19 : index
    %100 = vector.load %arg10[%c0_99, %c19_100] : memref<20x326xf32, #tpu.memory_space<vmem>>, vector<12x288xf32>
    %101 = arith.truncf %100 : vector<12x288xf32> to vector<12x288xbf16>
    %c48_101 = arith.constant 48 : index
    %c0_102 = arith.constant 0 : index
    %102 = vector.load %arg11[%c48_101, %c0_102] : memref<180x288xbf16, #tpu.memory_space<vmem>>, vector<12x288xbf16>
    tpu.vector_store %arg11[%c48_101, %c0_102], %101 {strides = array<i32>} : memref<180x288xbf16, #tpu.memory_space<vmem>>, vector<12x288xbf16>,
    %c0_103 = arith.constant 0 : index
    %c20_104 = arith.constant 20 : index
    %103 = vector.load %arg10[%c0_103, %c20_104] : memref<20x326xf32, #tpu.memory_space<vmem>>, vector<12x288xf32>
    %104 = arith.truncf %103 : vector<12x288xf32> to vector<12x288xbf16>
    %c60 = arith.constant 60 : index
    %c0_105 = arith.constant 0 : index
    %105 = vector.load %arg11[%c60, %c0_105] : memref<180x288xbf16, #tpu.memory_space<vmem>>, vector<12x288xbf16>
    tpu.vector_store %arg11[%c60, %c0_105], %104 {strides = array<i32>} : memref<180x288xbf16, #tpu.memory_space<vmem>>, vector<12x288xbf16>,
    %c0_106 = arith.constant 0 : index
    %c36_107 = arith.constant 36 : index
    %106 = vector.load %arg10[%c0_106, %c36_107] : memref<20x326xf32, #tpu.memory_space<vmem>>, vector<12x288xf32>
    %107 = arith.truncf %106 : vector<12x288xf32> to vector<12x288xbf16>
    %c72 = arith.constant 72 : index
    %c0_108 = arith.constant 0 : index
    %108 = vector.load %arg11[%c72, %c0_108] : memref<180x288xbf16, #tpu.memory_space<vmem>>, vector<12x288xbf16>
    tpu.vector_store %arg11[%c72, %c0_108], %107 {strides = array<i32>} : memref<180x288xbf16, #tpu.memory_space<vmem>>, vector<12x288xbf16>,
    %c0_109 = arith.constant 0 : index
    %c37_110 = arith.constant 37 : index
    %109 = vector.load %arg10[%c0_109, %c37_110] : memref<20x326xf32, #tpu.memory_space<vmem>>, vector<12x288xf32>
    %110 = arith.truncf %109 : vector<12x288xf32> to vector<12x288xbf16>
    %c84 = arith.constant 84 : index
    %c0_111 = arith.constant 0 : index
    %111 = vector.load %arg11[%c84, %c0_111] : memref<180x288xbf16, #tpu.memory_space<vmem>>, vector<12x288xbf16>
    tpu.vector_store %arg11[%c84, %c0_111], %110 {strides = array<i32>} : memref<180x288xbf16, #tpu.memory_space<vmem>>, vector<12x288xbf16>,
    %c0_112 = arith.constant 0 : index
    %c38_113 = arith.constant 38 : index
    %112 = vector.load %arg10[%c0_112, %c38_113] : memref<20x326xf32, #tpu.memory_space<vmem>>, vector<12x288xf32>
    %113 = arith.truncf %112 : vector<12x288xf32> to vector<12x288xbf16>
    %c96 = arith.constant 96 : index
    %c0_114 = arith.constant 0 : index
    %114 = vector.load %arg11[%c96, %c0_114] : memref<180x288xbf16, #tpu.memory_space<vmem>>, vector<12x288xbf16>
    tpu.vector_store %arg11[%c96, %c0_114], %113 {strides = array<i32>} : memref<180x288xbf16, #tpu.memory_space<vmem>>, vector<12x288xbf16>,
    %c0_115 = arith.constant 0 : index
    %c0_116 = arith.constant 0 : index
    %115 = vector.load %arg5[%c0_115, %c0_116] : memref<4x108xbf16, #tpu.memory_space<vmem>>, vector<4x108xbf16>
    %c0_117 = arith.constant 0 : index
    %c0_118 = arith.constant 0 : index
    %116 = vector.load %arg11[%c0_117, %c0_118] : memref<180x288xbf16, #tpu.memory_space<vmem>>, vector<108x288xbf16>
    %cst_119 = arith.constant dense<0.000000e+00> : vector<4x288xf32>
    %117 = tpu.matmul %115, %116, %cst_119 {dimension_numbers = #tpu.dot_dimension_numbers<[1], [0], [0], [1], [0, 0, 1, 1], [], []>} : vector<4x108xbf16>, vector<108x288xbf16>, vector<4x288xf32> -> vector<4x288xf32>
    %c8_120 = arith.constant 8 : index
    %c0_121 = arith.constant 0 : index
    %118 = vector.load %arg8[%c8_120, %c0_121] : memref<20x1xf32, #tpu.memory_space<vmem>>, vector<4x1xf32>
    %119 = vector.broadcast %118 : vector<4x1xf32> to vector<4x288xf32>
    %120 = arith.addf %117, %119 : vector<4x288xf32>
    %cst_122 = arith.constant 0.000000e+00 : f32
    %121 = vector.broadcast %cst_122 : f32 to vector<4x288xf32>
    %122 = arith.cmpf oge, %120, %121 : vector<4x288xf32>
    %cst_123 = arith.constant 0.00999999977 : f32
    %123 = vector.broadcast %cst_123 : f32 to vector<4x288xf32>
    %124 = arith.mulf %120, %123 : vector<4x288xf32>
    %125 = arith.select %122, %120, %124 : vector<4x288xi1>, vector<4x288xf32>
    %126 = vector.broadcast %5 : vector<1x288xf32> to vector<4x288xf32>
    %127 = arith.mulf %125, %126 : vector<4x288xf32>
    %c12_124 = arith.constant 12 : index
    %c19_125 = arith.constant 19 : index
    %128 = vector.load %arg10[%c12_124, %c19_125] : memref<20x326xf32, #tpu.memory_space<vmem>>, vector<4x288xf32>
    tpu.vector_store %arg10[%c12_124, %c19_125], %127 {strides = array<i32>} : memref<20x326xf32, #tpu.memory_space<vmem>>, vector<4x288xf32>,
    %c0_126 = arith.constant 0 : index
    %c0_127 = arith.constant 0 : index
    %129 = vector.load %arg10[%c0_126, %c0_127] : memref<20x326xf32, #tpu.memory_space<vmem>>, vector<16x288xf32>
    %130 = arith.truncf %129 : vector<16x288xf32> to vector<16x288xbf16>
    %c0_128 = arith.constant 0 : index
    %c0_129 = arith.constant 0 : index
    %131 = vector.load %arg11[%c0_128, %c0_129] : memref<180x288xbf16, #tpu.memory_space<vmem>>, vector<16x288xbf16>
    tpu.vector_store %arg11[%c0_128, %c0_129], %130 {strides = array<i32>} : memref<180x288xbf16, #tpu.memory_space<vmem>>, vector<16x288xbf16>,
    %c0_130 = arith.constant 0 : index
    %c1_131 = arith.constant 1 : index
    %132 = vector.load %arg10[%c0_130, %c1_131] : memref<20x326xf32, #tpu.memory_space<vmem>>, vector<16x288xf32>
    %133 = arith.truncf %132 : vector<16x288xf32> to vector<16x288xbf16>
    %c16_132 = arith.constant 16 : index
    %c0_133 = arith.constant 0 : index
    %134 = vector.load %arg11[%c16_132, %c0_133] : memref<180x288xbf16, #tpu.memory_space<vmem>>, vector<16x288xbf16>
    tpu.vector_store %arg11[%c16_132, %c0_133], %133 {strides = array<i32>} : memref<180x288xbf16, #tpu.memory_space<vmem>>, vector<16x288xbf16>,
    %c0_134 = arith.constant 0 : index
    %c2_135 = arith.constant 2 : index
    %135 = vector.load %arg10[%c0_134, %c2_135] : memref<20x326xf32, #tpu.memory_space<vmem>>, vector<16x288xf32>
    %136 = arith.truncf %135 : vector<16x288xf32> to vector<16x288xbf16>
    %c32_136 = arith.constant 32 : index
    %c0_137 = arith.constant 0 : index
    %137 = vector.load %arg11[%c32_136, %c0_137] : memref<180x288xbf16, #tpu.memory_space<vmem>>, vector<16x288xbf16>
    tpu.vector_store %arg11[%c32_136, %c0_137], %136 {strides = array<i32>} : memref<180x288xbf16, #tpu.memory_space<vmem>>, vector<16x288xbf16>,
    %c0_138 = arith.constant 0 : index
    %c18_139 = arith.constant 18 : index
    %138 = vector.load %arg10[%c0_138, %c18_139] : memref<20x326xf32, #tpu.memory_space<vmem>>, vector<16x288xf32>
    %139 = arith.truncf %138 : vector<16x288xf32> to vector<16x288xbf16>
    %c48_140 = arith.constant 48 : index
    %c0_141 = arith.constant 0 : index
    %140 = vector.load %arg11[%c48_140, %c0_141] : memref<180x288xbf16, #tpu.memory_space<vmem>>, vector<16x288xbf16>
    tpu.vector_store %arg11[%c48_140, %c0_141], %139 {strides = array<i32>} : memref<180x288xbf16, #tpu.memory_space<vmem>>, vector<16x288xbf16>,
    %c0_142 = arith.constant 0 : index
    %c19_143 = arith.constant 19 : index
    %141 = vector.load %arg10[%c0_142, %c19_143] : memref<20x326xf32, #tpu.memory_space<vmem>>, vector<16x288xf32>
    %142 = arith.truncf %141 : vector<16x288xf32> to vector<16x288xbf16>
    %c64_144 = arith.constant 64 : index
    %c0_145 = arith.constant 0 : index
    %143 = vector.load %arg11[%c64_144, %c0_145] : memref<180x288xbf16, #tpu.memory_space<vmem>>, vector<16x288xbf16>
    tpu.vector_store %arg11[%c64_144, %c0_145], %142 {strides = array<i32>} : memref<180x288xbf16, #tpu.memory_space<vmem>>, vector<16x288xbf16>,
    %c0_146 = arith.constant 0 : index
    %c20_147 = arith.constant 20 : index
    %144 = vector.load %arg10[%c0_146, %c20_147] : memref<20x326xf32, #tpu.memory_space<vmem>>, vector<16x288xf32>
    %145 = arith.truncf %144 : vector<16x288xf32> to vector<16x288xbf16>
    %c80 = arith.constant 80 : index
    %c0_148 = arith.constant 0 : index
    %146 = vector.load %arg11[%c80, %c0_148] : memref<180x288xbf16, #tpu.memory_space<vmem>>, vector<16x288xbf16>
    tpu.vector_store %arg11[%c80, %c0_148], %145 {strides = array<i32>} : memref<180x288xbf16, #tpu.memory_space<vmem>>, vector<16x288xbf16>,
    %c0_149 = arith.constant 0 : index
    %c36_150 = arith.constant 36 : index
    %147 = vector.load %arg10[%c0_149, %c36_150] : memref<20x326xf32, #tpu.memory_space<vmem>>, vector<16x288xf32>
    %148 = arith.truncf %147 : vector<16x288xf32> to vector<16x288xbf16>
    %c96_151 = arith.constant 96 : index
    %c0_152 = arith.constant 0 : index
    %149 = vector.load %arg11[%c96_151, %c0_152] : memref<180x288xbf16, #tpu.memory_space<vmem>>, vector<16x288xbf16>
    tpu.vector_store %arg11[%c96_151, %c0_152], %148 {strides = array<i32>} : memref<180x288xbf16, #tpu.memory_space<vmem>>, vector<16x288xbf16>,
    %c0_153 = arith.constant 0 : index
    %c37_154 = arith.constant 37 : index
    %150 = vector.load %arg10[%c0_153, %c37_154] : memref<20x326xf32, #tpu.memory_space<vmem>>, vector<16x288xf32>
    %151 = arith.truncf %150 : vector<16x288xf32> to vector<16x288xbf16>
    %c112 = arith.constant 112 : index
    %c0_155 = arith.constant 0 : index
    %152 = vector.load %arg11[%c112, %c0_155] : memref<180x288xbf16, #tpu.memory_space<vmem>>, vector<16x288xbf16>
    tpu.vector_store %arg11[%c112, %c0_155], %151 {strides = array<i32>} : memref<180x288xbf16, #tpu.memory_space<vmem>>, vector<16x288xbf16>,
    %c0_156 = arith.constant 0 : index
    %c38_157 = arith.constant 38 : index
    %153 = vector.load %arg10[%c0_156, %c38_157] : memref<20x326xf32, #tpu.memory_space<vmem>>, vector<16x288xf32>
    %154 = arith.truncf %153 : vector<16x288xf32> to vector<16x288xbf16>
    %c128 = arith.constant 128 : index
    %c0_158 = arith.constant 0 : index
    %155 = vector.load %arg11[%c128, %c0_158] : memref<180x288xbf16, #tpu.memory_space<vmem>>, vector<16x288xbf16>
    tpu.vector_store %arg11[%c128, %c0_158], %154 {strides = array<i32>} : memref<180x288xbf16, #tpu.memory_space<vmem>>, vector<16x288xbf16>,
    %c0_159 = arith.constant 0 : index
    %c0_160 = arith.constant 0 : index
    %156 = vector.load %arg6[%c0_159, %c0_160] : memref<4x144xbf16, #tpu.memory_space<vmem>>, vector<4x144xbf16>
    %c0_161 = arith.constant 0 : index
    %c0_162 = arith.constant 0 : index
    %157 = vector.load %arg11[%c0_161, %c0_162] : memref<180x288xbf16, #tpu.memory_space<vmem>>, vector<144x288xbf16>
    %cst_163 = arith.constant dense<0.000000e+00> : vector<4x288xf32>
    %158 = tpu.matmul %156, %157, %cst_163 {dimension_numbers = #tpu.dot_dimension_numbers<[1], [0], [0], [1], [0, 0, 1, 1], [], []>} : vector<4x144xbf16>, vector<144x288xbf16>, vector<4x288xf32> -> vector<4x288xf32>
    %c12_164 = arith.constant 12 : index
    %c0_165 = arith.constant 0 : index
    %159 = vector.load %arg8[%c12_164, %c0_165] : memref<20x1xf32, #tpu.memory_space<vmem>>, vector<4x1xf32>
    %160 = vector.broadcast %159 : vector<4x1xf32> to vector<4x288xf32>
    %161 = arith.addf %158, %160 : vector<4x288xf32>
    %cst_166 = arith.constant 0.000000e+00 : f32
    %162 = vector.broadcast %cst_166 : f32 to vector<4x288xf32>
    %163 = arith.cmpf oge, %161, %162 : vector<4x288xf32>
    %cst_167 = arith.constant 0.00999999977 : f32
    %164 = vector.broadcast %cst_167 : f32 to vector<4x288xf32>
    %165 = arith.mulf %161, %164 : vector<4x288xf32>
    %166 = arith.select %163, %161, %165 : vector<4x288xi1>, vector<4x288xf32>
    %167 = vector.broadcast %5 : vector<1x288xf32> to vector<4x288xf32>
    %168 = arith.mulf %166, %167 : vector<4x288xf32>
    %c16_168 = arith.constant 16 : index
    %c19_169 = arith.constant 19 : index
    %169 = vector.load %arg10[%c16_168, %c19_169] : memref<20x326xf32, #tpu.memory_space<vmem>>, vector<4x288xf32>
    tpu.vector_store %arg10[%c16_168, %c19_169], %168 {strides = array<i32>} : memref<20x326xf32, #tpu.memory_space<vmem>>, vector<4x288xf32>,
    %c0_170 = arith.constant 0 : index
    %c0_171 = arith.constant 0 : index
    %170 = vector.load %arg10[%c0_170, %c0_171] : memref<20x326xf32, #tpu.memory_space<vmem>>, vector<20x288xf32>
    %171 = arith.truncf %170 : vector<20x288xf32> to vector<20x288xbf16>
    %c0_172 = arith.constant 0 : index
    %c0_173 = arith.constant 0 : index
    %172 = vector.load %arg11[%c0_172, %c0_173] : memref<180x288xbf16, #tpu.memory_space<vmem>>, vector<20x288xbf16>
    tpu.vector_store %arg11[%c0_172, %c0_173], %171 {strides = array<i32>} : memref<180x288xbf16, #tpu.memory_space<vmem>>, vector<20x288xbf16>,
    %c0_174 = arith.constant 0 : index
    %c1_175 = arith.constant 1 : index
    %173 = vector.load %arg10[%c0_174, %c1_175] : memref<20x326xf32, #tpu.memory_space<vmem>>, vector<20x288xf32>
    %174 = arith.truncf %173 : vector<20x288xf32> to vector<20x288xbf16>
    %c20_176 = arith.constant 20 : index
    %c0_177 = arith.constant 0 : index
    %175 = vector.load %arg11[%c20_176, %c0_177] : memref<180x288xbf16, #tpu.memory_space<vmem>>, vector<20x288xbf16>
    tpu.vector_store %arg11[%c20_176, %c0_177], %174 {strides = array<i32>} : memref<180x288xbf16, #tpu.memory_space<vmem>>, vector<20x288xbf16>,
    %c0_178 = arith.constant 0 : index
    %c2_179 = arith.constant 2 : index
    %176 = vector.load %arg10[%c0_178, %c2_179] : memref<20x326xf32, #tpu.memory_space<vmem>>, vector<20x288xf32>
    %177 = arith.truncf %176 : vector<20x288xf32> to vector<20x288xbf16>
    %c40_180 = arith.constant 40 : index
    %c0_181 = arith.constant 0 : index
    %178 = vector.load %arg11[%c40_180, %c0_181] : memref<180x288xbf16, #tpu.memory_space<vmem>>, vector<20x288xbf16>
    tpu.vector_store %arg11[%c40_180, %c0_181], %177 {strides = array<i32>} : memref<180x288xbf16, #tpu.memory_space<vmem>>, vector<20x288xbf16>,
    %c0_182 = arith.constant 0 : index
    %c18_183 = arith.constant 18 : index
    %179 = vector.load %arg10[%c0_182, %c18_183] : memref<20x326xf32, #tpu.memory_space<vmem>>, vector<20x288xf32>
    %180 = arith.truncf %179 : vector<20x288xf32> to vector<20x288xbf16>
    %c60_184 = arith.constant 60 : index
    %c0_185 = arith.constant 0 : index
    %181 = vector.load %arg11[%c60_184, %c0_185] : memref<180x288xbf16, #tpu.memory_space<vmem>>, vector<20x288xbf16>
    tpu.vector_store %arg11[%c60_184, %c0_185], %180 {strides = array<i32>} : memref<180x288xbf16, #tpu.memory_space<vmem>>, vector<20x288xbf16>,
    %c0_186 = arith.constant 0 : index
    %c19_187 = arith.constant 19 : index
    %182 = vector.load %arg10[%c0_186, %c19_187] : memref<20x326xf32, #tpu.memory_space<vmem>>, vector<20x288xf32>
    %183 = arith.truncf %182 : vector<20x288xf32> to vector<20x288xbf16>
    %c80_188 = arith.constant 80 : index
    %c0_189 = arith.constant 0 : index
    %184 = vector.load %arg11[%c80_188, %c0_189] : memref<180x288xbf16, #tpu.memory_space<vmem>>, vector<20x288xbf16>
    tpu.vector_store %arg11[%c80_188, %c0_189], %183 {strides = array<i32>} : memref<180x288xbf16, #tpu.memory_space<vmem>>, vector<20x288xbf16>,
    %c0_190 = arith.constant 0 : index
    %c20_191 = arith.constant 20 : index
    %185 = vector.load %arg10[%c0_190, %c20_191] : memref<20x326xf32, #tpu.memory_space<vmem>>, vector<20x288xf32>
    %186 = arith.truncf %185 : vector<20x288xf32> to vector<20x288xbf16>
    %c100 = arith.constant 100 : index
    %c0_192 = arith.constant 0 : index
    %187 = vector.load %arg11[%c100, %c0_192] : memref<180x288xbf16, #tpu.memory_space<vmem>>, vector<20x288xbf16>
    tpu.vector_store %arg11[%c100, %c0_192], %186 {strides = array<i32>} : memref<180x288xbf16, #tpu.memory_space<vmem>>, vector<20x288xbf16>,
    %c0_193 = arith.constant 0 : index
    %c36_194 = arith.constant 36 : index
    %188 = vector.load %arg10[%c0_193, %c36_194] : memref<20x326xf32, #tpu.memory_space<vmem>>, vector<20x288xf32>
    %189 = arith.truncf %188 : vector<20x288xf32> to vector<20x288xbf16>
    %c120 = arith.constant 120 : index
    %c0_195 = arith.constant 0 : index
    %190 = vector.load %arg11[%c120, %c0_195] : memref<180x288xbf16, #tpu.memory_space<vmem>>, vector<20x288xbf16>
    tpu.vector_store %arg11[%c120, %c0_195], %189 {strides = array<i32>} : memref<180x288xbf16, #tpu.memory_space<vmem>>, vector<20x288xbf16>,
    %c0_196 = arith.constant 0 : index
    %c37_197 = arith.constant 37 : index
    %191 = vector.load %arg10[%c0_196, %c37_197] : memref<20x326xf32, #tpu.memory_space<vmem>>, vector<20x288xf32>
    %192 = arith.truncf %191 : vector<20x288xf32> to vector<20x288xbf16>
    %c140 = arith.constant 140 : index
    %c0_198 = arith.constant 0 : index
    %193 = vector.load %arg11[%c140, %c0_198] : memref<180x288xbf16, #tpu.memory_space<vmem>>, vector<20x288xbf16>
    tpu.vector_store %arg11[%c140, %c0_198], %192 {strides = array<i32>} : memref<180x288xbf16, #tpu.memory_space<vmem>>, vector<20x288xbf16>,
    %c0_199 = arith.constant 0 : index
    %c38_200 = arith.constant 38 : index
    %194 = vector.load %arg10[%c0_199, %c38_200] : memref<20x326xf32, #tpu.memory_space<vmem>>, vector<20x288xf32>
    %195 = arith.truncf %194 : vector<20x288xf32> to vector<20x288xbf16>
    %c160 = arith.constant 160 : index
    %c0_201 = arith.constant 0 : index
    %196 = vector.load %arg11[%c160, %c0_201] : memref<180x288xbf16, #tpu.memory_space<vmem>>, vector<20x288xbf16>
    tpu.vector_store %arg11[%c160, %c0_201], %195 {strides = array<i32>} : memref<180x288xbf16, #tpu.memory_space<vmem>>, vector<20x288xbf16>,
    %c0_202 = arith.constant 0 : index
    %c0_203 = arith.constant 0 : index
    %197 = vector.load %arg7[%c0_202, %c0_203] : memref<4x180xbf16, #tpu.memory_space<vmem>>, vector<4x180xbf16>
    %c0_204 = arith.constant 0 : index
    %c0_205 = arith.constant 0 : index
    %198 = vector.load %arg11[%c0_204, %c0_205] : memref<180x288xbf16, #tpu.memory_space<vmem>>, vector<180x288xbf16>
    %cst_206 = arith.constant dense<0.000000e+00> : vector<4x288xf32>
    %199 = tpu.matmul %197, %198, %cst_206 {dimension_numbers = #tpu.dot_dimension_numbers<[1], [0], [0], [1], [0, 0, 1, 1], [], []>} : vector<4x180xbf16>, vector<180x288xbf16>, vector<4x288xf32> -> vector<4x288xf32>
    %c16_207 = arith.constant 16 : index
    %c0_208 = arith.constant 0 : index
    %200 = vector.load %arg8[%c16_207, %c0_208] : memref<20x1xf32, #tpu.memory_space<vmem>>, vector<4x1xf32>
    %201 = vector.broadcast %200 : vector<4x1xf32> to vector<4x288xf32>
    %202 = arith.addf %199, %201 : vector<4x288xf32>
    %c0_209 = arith.constant 0 : index
    %c19_210 = arith.constant 19 : index
    %203 = vector.load %arg10[%c0_209, %c19_210] : memref<20x326xf32, #tpu.memory_space<vmem>>, vector<4x288xf32>
    %204 = arith.addf %202, %203 : vector<4x288xf32>
    %c0_211 = arith.constant 0 : index
    %c0_212 = arith.constant 0 : index
    %c0_213 = arith.constant 0 : index
    %205 = vector.load %arg9[%c0_211, %c0_212, %c0_213] : memref<1x4x288xf32, #tpu.memory_space<vmem>>, vector<1x4x288xf32>
    %206 = vector.shape_cast %205 : vector<1x4x288xf32> to vector<4x288xf32>
    %207 = vector.shape_cast %204 : vector<4x288xf32> to vector<1x4x288xf32>
    tpu.vector_store %arg9[%c0_211, %c0_212, %c0_213], %207 {strides = array<i32>} : memref<1x4x288xf32, #tpu.memory_space<vmem>>, vector<1x4x288xf32>,
    return
  }
  func.func @transform_0(%arg0: i32) -> (i32, i32, i32) {
    %c0_i32 = arith.constant 0 : i32
    %c0_i32_0 = arith.constant 0 : i32
    %c0_i32_1 = arith.constant 0 : i32
    return %arg0, %c0_i32, %c0_i32_0 : i32, i32, i32
  }
  func.func @transform_1(%arg0: i32) -> (i32, i32) {
    %c0_i32 = arith.constant 0 : i32
    %c0_i32_0 = arith.constant 0 : i32
    %c0_i32_1 = arith.constant 0 : i32
    return %c0_i32, %c0_i32_0 : i32, i32
  }
  func.func @transform_2(%arg0: i32) -> (i32, i32) {
    %c0_i32 = arith.constant 0 : i32
    %c0_i32_0 = arith.constant 0 : i32
    %c0_i32_1 = arith.constant 0 : i32
    return %c0_i32, %c0_i32_0 : i32, i32
  }
  func.func @transform_3(%arg0: i32) -> (i32, i32) {
    %c0_i32 = arith.constant 0 : i32
    %c0_i32_0 = arith.constant 0 : i32
    %c0_i32_1 = arith.constant 0 : i32
    return %c0_i32, %c0_i32_0 : i32, i32
  }
  func.func @transform_4(%arg0: i32) -> (i32, i32) {
    %c0_i32 = arith.constant 0 : i32
    %c0_i32_0 = arith.constant 0 : i32
    %c0_i32_1 = arith.constant 0 : i32
    return %c0_i32, %c0_i32_0 : i32, i32
  }
  func.func @transform_5(%arg0: i32) -> (i32, i32) {
    %c0_i32 = arith.constant 0 : i32
    %c0_i32_0 = arith.constant 0 : i32
    %c0_i32_1 = arith.constant 0 : i32
    return %c0_i32, %c0_i32_0 : i32, i32
  }
  func.func @transform_6(%arg0: i32) -> (i32, i32) {
    %c0_i32 = arith.constant 0 : i32
    %c0_i32_0 = arith.constant 0 : i32
    %c0_i32_1 = arith.constant 0 : i32
    return %c0_i32, %c0_i32_0 : i32, i32
  }
  func.func @transform_7(%arg0: i32) -> (i32, i32) {
    %c0_i32 = arith.constant 0 : i32
    %c0_i32_0 = arith.constant 0 : i32
    %c0_i32_1 = arith.constant 0 : i32
    return %c0_i32, %c0_i32_0 : i32, i32
  }
  func.func @transform_8(%arg0: i32) -> (i32, i32, i32) {
    %c0_i32 = arith.constant 0 : i32
    %c0_i32_0 = arith.constant 0 : i32
    %c0_i32_1 = arith.constant 0 : i32
    return %arg0, %c0_i32, %c0_i32_0 : i32, i32, i32
  }
}

</mosaic_0001>

<bundles_post_ra>
// kernel: _lambda_.1
= control target key start
LH: loop header
LB: loop body
LE: loop exit
PB: predicated region body
PF: predicated region fallthrough
CT: control target
= control target key end

     0   :  { %s4397_s27 = smov 0   ;;  %s5274_s0 = inlined_call_operand.vmem [shape: f32[2,4,324], index: 0, kind: input, shape index: {}]   ;;  %s5275_s1 = inlined_call_operand.vmem [shape: f32[1,288], index: 1, kind: input, shape index: {}]   ;;  %s5276_s2 = inlined_call_operand.vmem [shape: bf16[4,36], index: 2, kind: input, shape index: {}]   ;;  %s5277_s3 = inlined_call_operand.vmem [shape: bf16[4,72], index: 3, kind: input, shape index: {}]   ;;  %s5278_s4 = inlined_call_operand.vmem [shape: bf16[4,108], index: 4, kind: input, shape index: {}]   ;;  %s5279_s5 = inlined_call_operand.vmem [shape: bf16[4,144], index: 5, kind: input, shape index: {}]   ;;  %s5280_s6 = inlined_call_operand.vmem [shape: bf16[4,180], index: 6, kind: input, shape index: {}]   ;;  %s5281_s7 = inlined_call_operand.vmem [shape: f32[20,1], index: 7, kind: input, shape index: {}]   ;;  %s5282_s8 = inlined_call_operand.vmem [shape: f32[2,4,288], index: 8, kind: output, shape index: {}]  }
   0x1 LB: > { %s3742_s28 = sadd.s32 4294967295, %s4338_s27   ;;  %p3746_p0 = scmp.ge.s32.totalorder %s4338_s27, 1  ;;  %s4338_s27 = sphi %s4397_s27, %s18_s27  }
   0x2   : > { %p262_p1 = scmp.lt.s32.totalorder %s4338_s27, 3 }
   0x4   : > { %p263_p2 = pnand %p3746_p0, %p262_p1 }
   0x5   : > { %p296_p3 = scmp.lt.s32.totalorder (!%p263_p2), %s3742_s28, 1  ;;  %vm309_vm0 = vcmask (!%p263_p2), 572416   ;;  %v4340_v0 = vmov (!%p263_p2), 0.0   ;;  %vm325_vm1 = vcmask (!%p263_p2), 551936   ;;  %s4341_s11 = smov (!%p263_p2), 126   ;;  %vm5284_vm2 = vcmask (!%p263_p2), 254976  }
   0x6   : > { %266 = sbr.rel (%p263_p2) target bundleno = 2463 (0x99f), region = 52  ;;  %310 = vst.msk [vmem:[#allocation2 + $0x10] sm:$0xff] (!%p263_p2), %vm309_vm0, %v4340_v0  ;;  %307 = vst [vmem:[#allocation2] sm:$0xff] (!%p263_p2), %v4340_v0  ;;  %4217 = vmatprep.subr.bf16.mxu1 (!%p263_p2), %v4340_v0  ;;  %s4342_s12 = smov (!%p263_p2), 127   ;;  %vm4349_vm3 = vmmov (!%p263_p2), 0   ;;  %v4350_v57 = vmov (!%p263_p2), 0  }
   0x7   : > { %308 = vst [vmem:[#allocation2 + $0x8] sm:$0xff] (!%p263_p2), %v4340_v0  ;;  %311 = vst [vmem:[#allocation2 + $0x18] sm:$0xff] (!%p263_p2), %v4340_v0  ;;  %s4343_s13 = smov (!%p263_p2), 109   ;;  %s4344_s14 = smov (!%p263_p2), 92   ;;  %4223 = vmatprep.mubr.msk.bf16.mxu1 (!%p263_p2), %vm4349_vm3, %v4340_v0  ;;  %676 = vmatprep.mubr.bf16.mxu0 (!%p263_p2), %v4350_v57  ;;  %v584_v58 = vld [vmem:[%s5281_s7] sm:$0xf] (!%p263_p2) }
   0x8   : > { %312 = vst [vmem:[#allocation2 + $0x20] sm:$0xff] (!%p263_p2), %v4340_v0  ;;  %313 = vst.msk [vmem:[#allocation2 + $0x28] sm:$0xff] (!%p263_p2), %vm309_vm0, %v4340_v0  ;;  %s4345_s15 = smov (!%p263_p2), 110   ;;  %s4346_s16 = smov (!%p263_p2), 108   ;;  %4280 = vset.pattern.permute.xlu0 (!%p263_p2), %v4350_v57  ;;  %4281 = vset.pattern.permute.xlu1 (!%p263_p2), %v4350_v57  ;;  %vm5288_vm4 = vcmask (!%p263_p2), 257026   ;;  %vm369_vm5 = vcmask (!%p263_p2), 1043456  }
   0x9   : > { %314 = vst [vmem:[#allocation2 + $0x30] sm:$0xf] (!%p263_p2), %v4340_v0  ;;  %315 = vst [vmem:[#allocation2 + $0x38] sm:$0xf] (!%p263_p2), %v4340_v0  ;;  %s4347_s17 = smov (!%p263_p2), 91   ;;  %s4348_s18 = smov (!%p263_p2), 90  }
   0xa   : > { %vm455_vm6 = vcmask (!%p263_p2), 891904   ;;  %vm511_vm7 = vcmask (!%p263_p2), 752640   ;;  %vm399_vm8 = vcmask (!%p263_p2), 1031168   ;;  %vm371_vm9 = vcmask (!%p263_p2), 1039360   ;;  %s4351_s25 = smov (!%p263_p2), 19  }
   0xb   : > { %vm428_vm10 = vcmask (!%p263_p2), 900096   ;;  %vm484_vm11 = vcmask (!%p263_p2), 883712   ;;  %vm540_vm12 = vcmask (!%p263_p2), 744448   ;;  %vm5289_vm13 = vcmask (!%p263_p2), 736256  }
   0xc   : > { %vm5283_vm14 = vcmask (!%p263_p2), 1041408   ;;  %vm630_vm15 = vcmask (!%p263_p2), 293888  }
   0xd   : > { %s5316_s28 = smov (!%p296_p3, %s3742_s28), 1 }
   0xe   : > { %s4259_s29 = smul.u32 12, %s5316_s28 }
  0x10   : > { %s300_s10 = scalar_lea.vmem %s5274_s0, %s4259_s29 }
  0x11   : > { %v319_v1 = vld [vmem:[%s300_s10 + $0x8] sm:$0xf]  ;;  %v318_v2 = vld [vmem:[%s300_s10] sm:$0xff] }
  0x12   : > { %326 = vst.msk [vmem:[#allocation2 + $0x10] sm:$0xf] %vm325_vm1, %v319_v1  ;;  %v321_v3 = vcombine.high %v318_v2, %v318_v2  ;;  %323 = vst [vmem:[#allocation2] sm:$0xf] %v318_v2 }
  0x14   : > { %324 = vst [vmem:[#allocation2 + $0x8] sm:$0xf] %v321_v3 }
  0x19   : > { %v380_v4 = vld [vmem:[#allocation2 + $0x10] sm:$0xf]  ;;  %v434_v9 = vld [vmem:[#allocation2] sm:$0xf] }
  0x1a   : > { %v349_v5 = vld [vmem:[#allocation2 + $0x10] sm:$0xf]  ;;  %v4042_v7 = vpack.c.bf16 %v380_v4, %v380_v4  ;;  %v490_v15 = vld [vmem:[#allocation2] sm:$0xf] }
  0x1b   : > { %v436_v6 = vld [vmem:[#allocation2 + $0x10] sm:$0xf]  ;;  %v4040_v8 = vpack.c.bf16 %v349_v5, %v349_v5  ;;  %v435_v10 = vld [vmem:[#allocation2 + $0x8] sm:$0xf]  ;;  %v347_v17 = vld [vmem:[#allocation2] sm:$0xf] }
  0x1c   : > { %394 = vrot.lane.b32.xlu1 %v4042_v7, %s4341_s11  ;;  %v4046_v12 = vpack.c.bf16 %v436_v6, %v436_v6  ;;  %v492_v13 = vld [vmem:[#allocation2 + $0x10] sm:$0xf]  ;;  %v4045_v14 = vpack.c.bf16 %v435_v10, %v434_v9  ;;  %v491_v16 = vld [vmem:[#allocation2 + $0x8] sm:$0xf]  ;;  %v378_v20 = vld [vmem:[#allocation2] sm:$0xf] }
  0x1d   : > { %v362_v11 = vrot.slane %v4040_v8, 6  ;;  %v348_v18 = vld [vmem:[#allocation2 + $0x8] sm:$0xf]  ;;  %v4050_v19 = vpack.c.bf16 %v492_v13, %v492_v13  ;;  %v407_v22 = vld [vmem:[#allocation2 + $0x10] sm:$0xf]  ;;  %v4049_v23 = vpack.c.bf16 %v491_v16, %v490_v15 }
  0x1e   : > { %v379_v21 = vld [vmem:[#allocation2 + $0x8] sm:$0xf]  ;;  %v4039_v24 = vpack.c.bf16 %v348_v18, %v347_v17  ;;  %v330_v25 = vld [vmem:[#allocation2 + $0x10] sm:$0xf]  ;;  %v405_v26 = vld [vmem:[#allocation2] sm:$0xf]  ;;  %v4044_v31 = vpack.c.bf16 %v407_v22, %v407_v22 }
  0x1f   : > { %365 = vrot.lane.b32.xlu0 %v362_v11, %s4342_s12  ;;  %v406_v27 = vld [vmem:[#allocation2 + $0x8] sm:$0xf]  ;;  %v4038_v28 = vpack.c.bf16 %v330_v25, %v330_v25  ;;  %v328_v29 = vld [vmem:[#allocation2] sm:$0xf]  ;;  %v4041_v30 = vpack.c.bf16 %v379_v21, %v378_v20  ;;  %v463_v33 = vld [vmem:[#allocation2 + $0x10] sm:$0xf] }
  0x20   : > { %450 = vrot.lane.b32.xlu1 %v4046_v12, %s4343_s13  ;;  %v329_v32 = vld [vmem:[#allocation2 + $0x8] sm:$0xf]  ;;  %v361_v35 = vrot.slane %v4039_v24, 6  ;;  %v4043_v36 = vpack.c.bf16 %v406_v27, %v405_v26  ;;  %v461_v37 = vld [vmem:[#allocation2] sm:$0xf]  ;;  %v420_v39 = vrot.slane %v4044_v31, 6  ;;  %v4048_v40 = vpack.c.bf16 %v463_v33, %v463_v33 }
  0x21   : > { %346 = vst.msk [vmem:[#allocation3 + $0x8] sm:$0x3] %vm5284_vm2, %v4038_v28  ;;  %v4037_v34 = vpack.c.bf16 %v329_v32, %v328_v29  ;;  %v462_v38 = vld [vmem:[#allocation2 + $0x8] sm:$0xf]  ;;  %v519_v41 = vld [vmem:[#allocation2 + $0x10] sm:$0xf] }
  0x22   : > { %v419_v42 = vrot.slane %v4043_v36, 6  ;;  %v4047_v43 = vpack.c.bf16 %v462_v38, %v461_v37  ;;  %v517_v44 = vld [vmem:[#allocation2] sm:$0xf]  ;;  %v518_v45 = vld [vmem:[#allocation2 + $0x8] sm:$0xf]  ;;  %v476_v46 = vrot.slane %v4048_v40, 6  ;;  %v4052_v47 = vpack.c.bf16 %v519_v41, %v519_v41 }
  0x23   : > { %448 = vrot.lane.b32.xlu0 %v4045_v14, %s4343_s13  ;;  %344 = vst [vmem:[#allocation3] sm:$0x33] %v4037_v34  ;;  %v4051_v49 = vpack.c.bf16 %v518_v45, %v517_v44  ;;  %v548_v51 = vld [vmem:[#allocation2 + $0x10] sm:$0xf]  ;;  %v546_v53 = vld [vmem:[#allocation2] sm:$0xf] }
  0x24   : > { %506 = vrot.lane.b32.xlu1 %v4050_v19, %s4344_s14  ;;  %v475_v48 = vrot.slane %v4047_v43, 6  ;;  %v532_v50 = vrot.slane %v4052_v47, 6  ;;  %v547_v54 = vld [vmem:[#allocation2 + $0x8] sm:$0xf]  ;;  %v4054_v55 = vpack.c.bf16 %v548_v51, %v548_v51 }
  0x25   : > { %v531_v52 = vrot.slane %v4051_v49, 6  ;;  %v4053_v56 = vpack.c.bf16 %v547_v54, %v546_v53 }
  0x27   : > { %504 = vrot.lane.b32.xlu0 %v4049_v23, %s4344_s14 }
  0x28   : > { %392 = vrot.lane.b32.xlu1 %v4041_v30, %s4341_s11 }
  0x2b   : > { %363 = vrot.lane.b32.xlu0 %v361_v35, %s4342_s12 }
  0x2c   : > { %423 = vrot.lane.b32.xlu1 %v420_v39, %s4345_s15 }
  0x2f   : > { %421 = vrot.lane.b32.xlu0 %v419_v42, %s4345_s15 }
  0x30   : > { %479 = vrot.lane.b32.xlu1 %v476_v46, %s4346_s16 }
  0x33   : > { %477 = vrot.lane.b32.xlu0 %v475_v48, %s4346_s16 }
  0x34   : > { %535 = vrot.lane.b32.xlu1 %v532_v50, %s4347_s17 }
  0x37   : > { %533 = vrot.lane.b32.xlu0 %v531_v52, %s4347_s17  ;;  %v573_v52 = vld [vmem:[%s5276_s2] sm:$0x3] }
  0x38   : > { %562 = vrot.lane.b32.xlu1 %v4054_v55, %s4348_s18 }
  0x3b   : > { %560 = vrot.lane.b32.xlu0 %v4053_v56, %s4348_s18 }
  0x3f   : > { %587 = vperm.xlu0 %4280, %v584_v58   ;;  %v735_v58 = vlaneseq }
  0x8e   : > { %v395_v59 = vpop.permute.xlu1 %394 }
  0x8f   : > { %404 = vst.msk [vmem:[#allocation3 + $0x14] sm:$0x3] %vm5284_vm2, %v395_v59  ;;  %v397_v9 = vrot.slane %v395_v59, 4  ;;  %v736_v59 = vshrl.u32 %v735_v58, 7 }
  0x91   : > { %v366_v60 = vpop.permute.xlu0 %365 }
  0x92   : > { %377 = vst.msk [vmem:[#allocation3 + $0x8] sm:$0xc] %vm5288_vm4, %v366_v60  ;;  %v451_v61 = vpop.permute.xlu1 %450  ;;  %v368_v14 = vrot.slane %v366_v60, 4 }
  0x93   : > { %v453_v62 = vrot.slane %v451_v61, 4  ;;  %460 = vst.msk [vmem:[#allocation3 + $0x20] sm:$0x3] %vm5284_vm2, %v451_v61  ;;  %v745_v61 = vsub.s32 2, %v736_v59 }
  0x95   : > { %v449_v63 = vpop.permute.xlu0 %448 }
  0x96   : > { %v452_v1 = vrot.slane %v449_v63, 4  ;;  %v507_v2 = vpop.permute.xlu1 %506 }
  0x97   : > { %v509_v4 = vrot.slane %v507_v2, 4  ;;  %516 = vst.msk [vmem:[#allocation3 + $0x2c] sm:$0x3] %vm5284_vm2, %v507_v2 }
  0x98   : > { %v454_v3 = vsel %vm369_vm5, %v452_v1, %v453_v62  ;;  %v327_v62 = vld [vmem:[%s5275_s1] sm:$0x7] }
  0x99   : > { %v456_v5 = vsel %vm455_vm6, %v449_v63, %v454_v3  ;;  %v505_v6 = vpop.permute.xlu0 %504 }
  0x9a   : > { %459 = vst [vmem:[#allocation3 + $0x18] sm:$0x33] %v456_v5  ;;  %v508_v7 = vrot.slane %v505_v6, 4  ;;  %v393_v8 = vpop.permute.xlu1 %392 }
  0x9b   : > { %v396_v11 = vrot.slane %v393_v8, 4 }
  0x9c   : > { %v510_v10 = vsel %vm369_vm5, %v508_v7, %v509_v4  ;;  %v4486_v4 = vrot.slane %v327_v62, %v745_v61 }
  0x9d   : > { %v512_v12 = vsel %vm511_vm7, %v505_v6, %v510_v10  ;;  %v364_v13 = vpop.permute.xlu0 %363  ;;  %v398_v15 = vsel %vm369_vm5, %v396_v11, %v397_v9  ;;  %v741_v11 = vsub.s32 1, %v736_v59 }
  0x9e   : > { %515 = vst [vmem:[#allocation3 + $0x24] sm:$0x33] %v512_v12  ;;  %v367_v16 = vrot.slane %v364_v13, 4  ;;  %v400_v17 = vsel %vm399_vm8, %v393_v8, %v398_v15  ;;  %v424_v18 = vpop.permute.xlu1 %423  ;;  %v737_v8 = vsub.s32 0, %v736_v59 }
  0x9f   : > { %403 = vst [vmem:[#allocation3 + $0xc] sm:$0x33] %v400_v17  ;;  %v426_v20 = vrot.slane %v424_v18, 4  ;;  %433 = vst.msk [vmem:[#allocation3 + $0x14] sm:$0xc] %vm5288_vm4, %v424_v18 }
  0xa0   : > { %v370_v19 = vsel %vm369_vm5, %v367_v16, %v368_v14  ;;  %v4489_v17 = vrot.slane %v327_v62, %v737_v8 }
  0xa1   : > { %v372_v21 = vsel %vm371_vm9, %v364_v13, %v370_v19  ;;  %v422_v22 = vpop.permute.xlu0 %421 }
  0xa2   : > { %375 = vst [vmem:[#allocation3] sm:$0xcc] %v372_v21  ;;  %v425_v23 = vrot.slane %v422_v22, 4  ;;  %v480_v24 = vpop.permute.xlu1 %479  ;;  %v4492_v21 = vrot.slane %v327_v62, %v741_v11 }
  0xa3   : > { %v482_v26 = vrot.slane %v480_v24, 4  ;;  %489 = vst.msk [vmem:[#allocation3 + $0x20] sm:$0xc] %vm5288_vm4, %v480_v24 }
  0xa4   : > { %v427_v25 = vsel %vm369_vm5, %v425_v23, %v426_v20 }
  0xa5   : > { %v429_v27 = vsel %vm428_vm10, %v422_v22, %v427_v25  ;;  %v478_v28 = vpop.permute.xlu0 %477 }
  0xa6   : > { %432 = vst [vmem:[#allocation3 + $0xc] sm:$0xcc] %v429_v27  ;;  %v481_v29 = vrot.slane %v478_v28, 4  ;;  %v536_v30 = vpop.permute.xlu1 %535  ;;  %v4283_v31 = vld [vmem:[#allocation3 + $0x8] ss:$12 sps:$4 sm:$0xff]  }
  0xa7   : > { %v538_v33 = vrot.slane %v536_v30, 4  ;;  %545 = vst.msk [vmem:[#allocation3 + $0x2c] sm:$0xc] %vm5288_vm4, %v536_v30  ;;  %4218 = vmatpush3.bf16.msra.mxu1 %v4283_v31 }
  0xa8   : > { %v483_v32 = vsel %vm369_vm5, %v481_v29, %v482_v26  ;;  %4219 = vmatprep.subr.bf16.mxu1 %v4340_v0 }
  0xa9   : > { %v485_v34 = vsel %vm484_vm11, %v478_v28, %v483_v32  ;;  %v534_v35 = vpop.permute.xlu0 %533 }
  0xaa   : > { %488 = vst [vmem:[#allocation3 + $0x18] sm:$0xcc] %v485_v34  ;;  %v537_v36 = vrot.slane %v534_v35, 4  ;;  %v563_v37 = vpop.permute.xlu1 %562 }
  0xab   : > { %v565_v39 = vrot.slane %v563_v37, 4  ;;  %572 = vst.msk [vmem:[#allocation3 + $0x38] sm:$0x3] %vm5284_vm2, %v563_v37  ;;  %vm5285_vm2 = vcmask 416772  }
  0xac   : > { %v539_v38 = vsel %vm369_vm5, %v537_v36, %v538_v33 }
  0xad   : > { %v541_v40 = vsel %vm540_vm12, %v534_v35, %v539_v38  ;;  %v561_v41 = vpop.permute.xlu0 %560  ;;  %v4284_v42 = vld [vmem:[#allocation3 + $0x4] ss:$12 sps:$4 sm:$0xff]   ;;  %v4286_v43 = vld [vmem:[#allocation3] ss:$12 sps:$4 sm:$0xff]  }
  0xae   : > { %544 = vst [vmem:[#allocation3 + $0x24] sm:$0xcc] %v541_v40  ;;  %v564_v44 = vrot.slane %v561_v41, 4  ;;  %644 = vmatprep.subr.bf16.mxu0 %v4284_v42  ;;  %v4287_v45 = vld [vmem:[#allocation3 + $0x20] ss:$12 sps:$4 sm:$0xff]  }
  0xaf   : > { %645 = vmatpush1.bf16.msra.mxu0 %v4286_v43  ;;  %4220 = vmatpush3.bf16.msra.mxu1 %v4287_v45 }
  0xb0   : > { %v566_v46 = vsel %vm369_vm5, %v564_v44, %v565_v39  ;;  %4221 = vmatprep.subr.bf16.mxu1 %v4340_v0 }
  0xb1   : > { %v568_v47 = vsel %vm5289_vm13, %v561_v41, %v566_v46  ;;  %v1022_v41 = vld [vmem:[%s5281_s7 + $0x4] sm:$0xf] }
  0xb2   : > { %571 = vst [vmem:[#allocation3 + $0x30] sm:$0x33] %v568_v47  ;;  %v4291_v48 = vld [vmem:[#allocation3 + $0x38] ss:$0 sps:$4 sm:$0x33]  }
  0xb3   : > { %v642_v51 = vsel %vm5283_vm14, %v4291_v48, 0 }
  0xb4   : > { %4222 = vmatpush3.bf16.msra.mxu1 %v642_v51 }
  0xb5   : > { %v4288_v49 = vld [vmem:[#allocation3 + $0x1c] ss:$12 sps:$4 sm:$0xff]   ;;  %v4290_v50 = vld [vmem:[#allocation3 + $0x18] ss:$12 sps:$4 sm:$0xff]   ;;  %4227 = vmatprep.subr.bf16.mxu1 %v4340_v0 }
  0xb6   : > { %646 = vmatprep.subr.bf16.mxu0 %v4288_v49 }
  0xb7   : > { %647 = vmatpush1.bf16.msra.mxu0 %v4290_v50  ;;  %4224 = vmatmul.mubr.msk.bf16.vlgmr.msra.gmra.mrb[0].mxu1 %vm630_vm15, %v573_v52 }
  0xb8   : > { %4237 = vmatprep.mubr.msk.bf16.mxu1 %vm4349_vm3, %v4340_v0 }
  0xb9   : > { %v582_v53 = vld [vmem:[#allocation3 + $0x30] sm:$0x33] }
  0xba   : > { %v3774_v54 = vcombine.high %v582_v53, %v582_v53  ;;  %v3773_v55 = vcombine.low %v582_v53, %v582_v53 }
  0xbc   : > { %3776 = vmatprep.subr.msk.bf16.mxu0 %vm5283_vm14, %v3774_v54  ;;  %v636_v56 = vsel %vm5283_vm14, %v3773_v55, 0  ;;  %vm765_vm14 = vcmask 154624  }
  0xbd   : > { %649 = vmatpush1.bf16.msra.mxu0 %v636_v56 }
  0xbe   : > { %v588_v60 = vpop.permute.xlu0 %587 }
  0xc0   : > { %3777 = vmatmul.mubr.msk.bf16.vlgmr.msra.gmra.mrb[0].mxu0 %vm630_vm15, %v573_v52 }
  0xc1   : > { %1146 = vmatprep.mubr.bf16.mxu0 %v4350_v57 }
 0x18a   : > { %v719_v63 = vpop.f32.mrb[0].mxu1 }
 0x18b   : > { %v720_v1 = vadd.f32 %v719_v63, %v588_v60  ;;  %v4225_v2 = vpop.f32.mrb[1].mxu1 }
 0x18c   : > { %v722_v3 = vpop.f32.mrb[2].mxu1 }
 0x18d   : > { %v4226_v5 = vpop.f32.mrb[3].mxu1  ;;  %vm727_vm0 = vcmp.ge.f32.partialorder %v720_v1, 0.0  ;;  %v730_v6 = vmul.f32 0.01, %v720_v1 }
 0x18f   : > { %v733_v7 = vsel %vm727_vm0, %v720_v1, %v730_v6  ;;  %vm5286_vm0 = vcmask 1047708  }
 0x190   : > { %v752_v9 = vmul.f32 %v4486_v4, %v733_v7 }
 0x192   : > { %v758_v14 = vrot.slane %v752_v9, 4 }
 0x193   : > { %v678_v10 = vpop.f32.mrb[0].mxu0 }
 0x194   : > { %v679_v12 = vadd.f32 %v678_v10, %v588_v60  ;;  %v680_v13 = vpop.f32.mrb[1].mxu0  ;;  %763 = vrot.lane.b32.xlu0 %v758_v14, %s4351_s25 }
 0x195   : > { %v681_v15 = vadd.f32 %v680_v13, %v588_v60  ;;  %v682_v16 = vpop.f32.mrb[2].mxu0 }
 0x196   : > { %vm725_vm1 = vcmp.ge.f32.partialorder %v679_v12, 0.0  ;;  %v728_v18 = vmul.f32 0.01, %v679_v12  ;;  %v683_v19 = vpop.f32.mrb[3].mxu0 }
 0x197   : > { %vm726_vm15 = vcmp.ge.f32.partialorder %v681_v15, 0.0  ;;  %v729_v20 = vmul.f32 0.01, %v681_v15 }
 0x198   : > { %v731_v22 = vsel %vm725_vm1, %v679_v12, %v728_v18  ;;  %vm793_vm1 = vcmask 257024  }
 0x199   : > { %v732_v23 = vsel %vm726_vm15, %v681_v15, %v729_v20  ;;  %v750_v24 = vmul.f32 %v4489_v17, %v731_v22  ;;  %vm1100_vm15 = vcmask 588800  }
 0x19a   : > { %v751_v26 = vmul.f32 %v4492_v21, %v732_v23 }
 0x19b   : > { %v756_v25 = vrot.slane %v750_v24, 4 }
 0x19c   : > { %v757_v27 = vrot.slane %v751_v26, 4 }
 0x19d   : > { %759 = vrot.lane.b32.xlu1 %v756_v25, %s4351_s25 }
 0x1a1   : > { %761 = vrot.lane.b32.xlu1 %v757_v27, %s4351_s25 }
 0x206   : > { %v764_v29 = vpop.permute.xlu0 %763 }
 0x20f   : > { %v760_v28 = vpop.permute.xlu1 %759 }
 0x210   : > { %772 = vst.msk [vmem:[#allocation2] sm:$0xf0] %vm5286_vm0, %v760_v28 }
 0x213   : > { %v762_v30 = vpop.permute.xlu1 %761 }
 0x214   : > { %v766_v31 = vsel %vm765_vm14, %v760_v28, %v762_v30  ;;  %v767_v32 = vsel %vm765_vm14, %v762_v30, %v764_v29 }
 0x215   : > { %773 = vst [vmem:[#allocation2 + $0x8] sm:$0xf0] %v766_v31  ;;  %775 = vst.msk [vmem:[#allocation2 + $0x10] sm:$0xf0] %vm5285_vm2, %v767_v32 }
 0x217   : > { %v4502_v33 = vld [vmem:[#allocation2] sm:$0xff] }
 0x218   : > { %v1960_v34 = vld [vmem:[#allocation2] sm:$0xff] }
 0x21c   : > { %v4504_v35 = vld [vmem:[#allocation2 + $0x8] sm:$0xff]  ;;  %v778_v36 = vld [vmem:[#allocation2 + $0x10] sm:$0xff] }
 0x21d   : > { %v1961_v37 = vld [vmem:[#allocation2 + $0x8] sm:$0xff]  ;;  %v4506_v38 = vpack.c.bf16 %v778_v36, %v778_v36  ;;  %v4510_v39 = vpack.c.bf16 %v4504_v35, %v4502_v33 }
 0x21e   : > { %v4512_v40 = vpack.c.bf16 %v1961_v37, %v1960_v34 }
 0x21f   : > { %811 = vrot.lane.b32.xlu0 %v4506_v38, %s4342_s12  ;;  %809 = vrot.lane.b32.xlu1 %v4510_v39, %s4342_s12  ;;  %794 = vst.msk [vmem:[#allocation3 + $0x8] sm:$0xf] %vm793_vm1, %v4506_v38 }
 0x220   : > { %2681 = vst [vmem:[#allocation3] sm:$0xff] %v4512_v40 }
 0x223   : > { %837 = vrot.lane.b32.xlu0 %v4506_v38, %s4341_s11  ;;  %835 = vrot.lane.b32.xlu1 %v4510_v39, %s4341_s11 }
 0x227   : > { %863 = vrot.lane.b32.xlu0 %v4506_v38, %s4345_s15  ;;  %861 = vrot.lane.b32.xlu1 %v4510_v39, %s4345_s15 }
 0x22b   : > { %889 = vrot.lane.b32.xlu0 %v4506_v38, %s4343_s13  ;;  %887 = vrot.lane.b32.xlu1 %v4510_v39, %s4343_s13 }
 0x22f   : > { %915 = vrot.lane.b32.xlu0 %v4506_v38, %s4346_s16  ;;  %913 = vrot.lane.b32.xlu1 %v4510_v39, %s4346_s16 }
 0x233   : > { %941 = vrot.lane.b32.xlu0 %v4506_v38, %s4344_s14  ;;  %939 = vrot.lane.b32.xlu1 %v4510_v39, %s4344_s14 }
 0x237   : > { %967 = vrot.lane.b32.xlu0 %v4506_v38, %s4347_s17  ;;  %965 = vrot.lane.b32.xlu1 %v4510_v39, %s4347_s17 }
 0x23b   : > { %993 = vrot.lane.b32.xlu0 %v4506_v38, %s4348_s18  ;;  %991 = vrot.lane.b32.xlu1 %v4510_v39, %s4348_s18 }
 0x23f   : > { %1025 = vperm.xlu1 %4281, %v1022_v41  }
 0x291   : > { %v812_v42 = vpop.permute.xlu0 %811  ;;  %v810_v43 = vpop.permute.xlu1 %809 }
 0x292   : > { %v814_v44 = vrot.slane %v812_v42, 4  ;;  %820 = vst.msk [vmem:[#allocation3 + $0x14] sm:$0xf] %vm793_vm1, %v812_v42  ;;  %v813_v45 = vrot.slane %v810_v43, 4 }
 0x294   : > { %v815_v46 = vsel %vm369_vm5, %v813_v45, %v814_v44 }
 0x295   : > { %v816_v47 = vsel %vm371_vm9, %v810_v43, %v815_v46  ;;  %v838_v48 = vpop.permute.xlu0 %837  ;;  %v836_v49 = vpop.permute.xlu1 %835 }
 0x296   : > { %819 = vst [vmem:[#allocation3 + $0xc] sm:$0xff] %v816_v47  ;;  %v840_v50 = vrot.slane %v838_v48, 4  ;;  %846 = vst.msk [vmem:[#allocation3 + $0x20] sm:$0xf] %vm793_vm1, %v838_v48  ;;  %v839_v51 = vrot.slane %v836_v49, 4  ;;  %v3798_v52 = vcombine.high %v4510_v39, %v816_v47  ;;  %v3797_v53 = vcombine.low %v4510_v39, %v816_v47 }
 0x298   : > { %1114 = vmatprep.subr.bf16.mxu0 %v3798_v52  ;;  %v841_v58 = vsel %vm369_vm5, %v839_v51, %v840_v50  ;;  %v1003_v51 = vld [vmem:[%s5277_s3] sm:$0x3] }
 0x299   : > { %v864_v54 = vpop.permute.xlu0 %863  ;;  %v862_v55 = vpop.permute.xlu1 %861  ;;  %v4294_v56 = vld [vmem:[#allocation3 + $0x8] ss:$12 sps:$4 sm:$0xff]   ;;  %1115 = vmatpush1.bf16.msra.mxu0 %v3797_v53  ;;  %v842_v62 = vsel %vm399_vm8, %v836_v49, %v841_v58 }
 0x29a   : > { %v866_v59 = vrot.slane %v864_v54, 4  ;;  %872 = vst.msk [vmem:[#allocation3 + $0x2c] sm:$0xf] %vm793_vm1, %v864_v54  ;;  %v865_v60 = vrot.slane %v862_v55, 4  ;;  %1253 = vst.msk [vmem:[#allocation3 + $0x8] sm:$0xf] %vm793_vm1, %v4506_v38  ;;  %4228 = vmatpush3.bf16.msra.mxu1 %v4294_v56 }
 0x29b   : > { %4229 = vmatprep.subr.bf16.mxu1 %v4340_v0 }
 0x29c   : > { %v867_v61 = vsel %vm369_vm5, %v865_v60, %v866_v59 }
 0x29d   : > { %v868_v63 = vsel %vm428_vm10, %v862_v55, %v867_v61  ;;  %v890_v1 = vpop.permute.xlu0 %889  ;;  %v888_v2 = vpop.permute.xlu1 %887 }
 0x29e   : > { %v892_v3 = vrot.slane %v890_v1, 4  ;;  %898 = vst.msk [vmem:[#allocation3 + $0x38] sm:$0xf] %vm793_vm1, %v890_v1  ;;  %v891_v5 = vrot.slane %v888_v2, 4  ;;  %v3801_v6 = vcombine.high %v842_v62, %v868_v63  ;;  %v3800_v7 = vcombine.low %v842_v62, %v868_v63 }
 0x2a0   : > { %v893_v8 = vsel %vm369_vm5, %v891_v5, %v892_v3  ;;  %1116 = vmatprep.subr.bf16.mxu0 %v3801_v6 }
 0x2a1   : > { %v894_v9 = vsel %vm455_vm6, %v888_v2, %v893_v8  ;;  %v916_v10 = vpop.permute.xlu0 %915  ;;  %v914_v11 = vpop.permute.xlu1 %913  ;;  %v4295_v12 = vld [vmem:[#allocation3 + $0x20] ss:$12 sps:$4 sm:$0xff]   ;;  %1117 = vmatpush1.bf16.msra.mxu0 %v3800_v7 }
 0x2a2   : > { %897 = vst [vmem:[#allocation3 + $0x30] sm:$0xff] %v894_v9  ;;  %v918_v13 = vrot.slane %v916_v10, 4  ;;  %924 = vst.msk [vmem:[#allocation3 + $0x44] sm:$0xf] %vm793_vm1, %v916_v10  ;;  %v917_v14 = vrot.slane %v914_v11, 4  ;;  %4230 = vmatpush3.bf16.msra.mxu1 %v4295_v12 }
 0x2a3   : > { %4231 = vmatprep.subr.bf16.mxu1 %v4340_v0 }
 0x2a4   : > { %v919_v15 = vsel %vm369_vm5, %v917_v14, %v918_v13  ;;  %v4600_v14 = vrot.slane %v4510_v39, 6 }
 0x2a5   : > { %v920_v16 = vsel %vm484_vm11, %v914_v11, %v919_v15  ;;  %v942_v18 = vpop.permute.xlu0 %941  ;;  %v940_v19 = vpop.permute.xlu1 %939  ;;  %v4606_v15 = vrot.slane %v4506_v38, 6 }
 0x2a6   : > { %v944_v20 = vrot.slane %v942_v18, 4  ;;  %950 = vst.msk [vmem:[#allocation3 + $0x50] sm:$0xf] %vm793_vm1, %v942_v18  ;;  %v943_v22 = vrot.slane %v940_v19, 4  ;;  %v3804_v23 = vcombine.high %v894_v9, %v920_v16  ;;  %v3803_v24 = vcombine.low %v894_v9, %v920_v16 }
 0x2a8   : > { %1118 = vmatprep.subr.bf16.mxu0 %v3804_v23  ;;  %v945_v28 = vsel %vm369_vm5, %v943_v22, %v944_v20 }
 0x2a9   : > { %v968_v25 = vpop.permute.xlu0 %967  ;;  %v966_v26 = vpop.permute.xlu1 %965  ;;  %v4296_v27 = vld [vmem:[#allocation3 + $0x38] ss:$12 sps:$4 sm:$0xff]   ;;  %1119 = vmatpush1.bf16.msra.mxu0 %v3803_v24  ;;  %v946_v32 = vsel %vm511_vm7, %v940_v19, %v945_v28 }
 0x2aa   : > { %v970_v29 = vrot.slane %v968_v25, 4  ;;  %976 = vst.msk [vmem:[#allocation3 + $0x5c] sm:$0xf] %vm793_vm1, %v968_v25  ;;  %v969_v30 = vrot.slane %v966_v26, 4  ;;  %4232 = vmatpush3.bf16.msra.mxu1 %v4296_v27 }
 0x2ab   : > { %4233 = vmatprep.subr.bf16.mxu1 %v4340_v0 }
 0x2ac   : > { %v971_v31 = vsel %vm369_vm5, %v969_v30, %v970_v29 }
 0x2ad   : > { %v972_v34 = vsel %vm540_vm12, %v966_v26, %v971_v31  ;;  %v994_v36 = vpop.permute.xlu0 %993  ;;  %v992_v37 = vpop.permute.xlu1 %991 }
 0x2ae   : > { %975 = vst [vmem:[#allocation3 + $0x54] sm:$0xff] %v972_v34  ;;  %v996_v41 = vrot.slane %v994_v36, 4  ;;  %1002 = vst.msk [vmem:[#allocation3 + $0x68] sm:$0xf] %vm793_vm1, %v994_v36  ;;  %v995_v42 = vrot.slane %v992_v37, 4  ;;  %v3807_v43 = vcombine.high %v946_v32, %v972_v34  ;;  %v3806_v44 = vcombine.low %v946_v32, %v972_v34 }
 0x2b0   : > { %v997_v45 = vsel %vm369_vm5, %v995_v42, %v996_v41  ;;  %1120 = vmatprep.subr.bf16.mxu0 %v3807_v43 }
 0x2b1   : > { %v998_v46 = vsel %vm5289_vm13, %v992_v37, %v997_v45  ;;  %v4297_v47 = vld [vmem:[#allocation3 + $0x50] ss:$12 sps:$4 sm:$0xff]   ;;  %1121 = vmatpush1.bf16.msra.mxu0 %v3806_v44 }
 0x2b2   : > { %v3810_v48 = vcombine.high %v998_v46, %v998_v46  ;;  %v3809_v49 = vcombine.low %v998_v46, %v998_v46  ;;  %4234 = vmatpush3.bf16.msra.mxu1 %v4297_v47 }
 0x2b3   : > { %4235 = vmatprep.subr.bf16.mxu1 %v4340_v0 }
 0x2b4   : > { %3812 = vmatprep.subr.msk.bf16.mxu0 %vm369_vm5, %v3810_v48  ;;  %v1106_v50 = vsel %vm369_vm5, %v3809_v49, 0 }
 0x2b5   : > { %v4298_v52 = vld [vmem:[#allocation3 + $0x68] ss:$0 sps:$4 sm:$0xff]   ;;  %1123 = vmatpush1.bf16.msra.mxu0 %v1106_v50 }
 0x2b6   : > { %v1112_v53 = vsel %vm369_vm5, %v4298_v52, 0 }
 0x2b7   : > { %4236 = vmatpush3.bf16.msra.mxu1 %v1112_v53 }
 0x2b8   : > { %3813 = vmatmul.mubr.msk.bf16.vlgmr.msra.gmra.mrb[4].mxu0 %vm1100_vm15, %v1003_v51  ;;  %4241 = vmatprep.subr.bf16.mxu1 %v4340_v0 }
 0x2b9   : > { %1849 = vmatprep.mubr.bf16.mxu0 %v4350_v57 }
 0x2ba   : > { %4238 = vmatmul.mubr.msk.bf16.vlgmr.msra.gmra.mrb[4].mxu1 %vm1100_vm15, %v1003_v51  ;;  %vm5290_vm15 = vcmask 254976  }
 0x2bb   : > { %4255 = vmatprep.mubr.msk.bf16.mxu1 %vm4349_vm3, %v4340_v0 }
 0x2be   : > { %v1026_v54 = vpop.permute.xlu1 %1025 }
 0x38b   : > { %v1148_v55 = vpop.f32.mrb[4].mxu0 }
 0x38c   : > { %v1149_v56 = vadd.f32 %v1148_v55, %v1026_v54  ;;  %v1150_v58 = vpop.f32.mrb[5].mxu0 }
 0x38d   : > { %v1151_v59 = vadd.f32 %v1150_v58, %v1026_v54  ;;  %v1152_v60 = vpop.f32.mrb[6].mxu0  ;;  %v1189_v61 = vpop.f32.mrb[4].mxu1 }
 0x38e   : > { %vm1195_vm2 = vcmp.ge.f32.partialorder %v1149_v56, 0.0  ;;  %v1198_v62 = vmul.f32 0.01, %v1149_v56  ;;  %v1153_v63 = vpop.f32.mrb[7].mxu0  ;;  %v1190_v1 = vadd.f32 %v1189_v61, %v1026_v54  ;;  %v4239_v3 = vpop.f32.mrb[5].mxu1 }
 0x38f   : > { %vm1196_vm0 = vcmp.ge.f32.partialorder %v1151_v59, 0.0  ;;  %v1199_v2 = vmul.f32 0.01, %v1151_v59  ;;  %v1192_v5 = vpop.f32.mrb[6].mxu1 }
 0x390   : > { %v1201_v6 = vsel %vm1195_vm2, %v1149_v56, %v1198_v62  ;;  %v4240_v7 = vpop.f32.mrb[7].mxu1  ;;  %vm1197_vm3 = vcmp.ge.f32.partialorder %v1190_v1, 0.0  ;;  %v1200_v10 = vmul.f32 0.01, %v1190_v1  ;;  %vm1221_vm2 = vcmask 1043608  }
 0x391   : > { %v1204_v8 = vmul.f32 %v1201_v6, %v4489_v17  ;;  %v1202_v9 = vsel %vm1196_vm0, %v1151_v59, %v1199_v2  ;;  %vm5287_vm0 = vcmask 412672  }
 0x392   : > { %v1205_v11 = vmul.f32 %v1202_v9, %v4492_v21  ;;  %v1203_v12 = vsel %vm1197_vm3, %v1190_v1, %v1200_v10  ;;  %vm1279_vm3 = vcmask 1045508  }
 0x393   : > { %1210 = vrot.lane.b32.xlu0 %v1204_v8, %s4351_s25  ;;  %v1206_v13 = vmul.f32 %v1203_v12, %v4486_v4 }
 0x394   : > { %1212 = vrot.lane.b32.xlu1 %v1205_v11, %s4351_s25 }
 0x397   : > { %1214 = vrot.lane.b32.xlu0 %v1206_v13, %s4351_s25 }
 0x398   : > { %1289 = vrot.lane.b32.xlu1 %v4600_v14, %s4342_s12 }
 0x39b   : > { %1291 = vrot.lane.b32.xlu0 %v4606_v15, %s4342_s12 }
 0x39c   : > { %1335 = vrot.lane.b32.xlu1 %v4510_v39, %s4341_s11 }
 0x39f   : > { %1337 = vrot.lane.b32.xlu0 %v4506_v38, %s4341_s11 }
 0x3a0   : > { %1389 = vrot.lane.b32.xlu1 %v4600_v14, %s4345_s15 }
 0x3a3   : > { %1391 = vrot.lane.b32.xlu0 %v4606_v15, %s4345_s15 }
 0x3a4   : > { %1435 = vrot.lane.b32.xlu1 %v4510_v39, %s4343_s13 }
 0x3a7   : > { %1437 = vrot.lane.b32.xlu0 %v4506_v38, %s4343_s13 }
 0x3a8   : > { %1489 = vrot.lane.b32.xlu1 %v4600_v14, %s4346_s16 }
 0x3ab   : > { %1491 = vrot.lane.b32.xlu0 %v4606_v15, %s4346_s16 }
 0x3ac   : > { %1535 = vrot.lane.b32.xlu1 %v4510_v39, %s4344_s14 }
 0x3af   : > { %1537 = vrot.lane.b32.xlu0 %v4506_v38, %s4344_s14 }
 0x3b0   : > { %1589 = vrot.lane.b32.xlu1 %v4600_v14, %s4347_s17 }
 0x3b3   : > { %1591 = vrot.lane.b32.xlu0 %v4606_v15, %s4347_s17 }
 0x405   : > { %v1211_v16 = vpop.permute.xlu0 %1210 }
 0x406   : > { %1222 = vst.msk [vmem:[#allocation2 + $0x18] sm:$0xf] %vm1221_vm2, %v1211_v16  ;;  %v1213_v18 = vpop.permute.xlu1 %1212 }
 0x407   : > { %v1216_v19 = vsel %vm765_vm14, %v1211_v16, %v1213_v18 }
 0x408   : > { %1223 = vst [vmem:[#allocation2 + $0x20] sm:$0xf] %v1216_v19 }
 0x409   : > { %v1215_v20 = vpop.permute.xlu0 %1214 }
 0x40a   : > { %v1217_v22 = vsel %vm765_vm14, %v1213_v18, %v1215_v20  ;;  %v1290_v23 = vpop.permute.xlu1 %1289  ;;  %v1283_v20 = vrot.slane %v4600_v14, 4 }
 0x40b   : > { %1225 = vst.msk [vmem:[#allocation2 + $0x28] sm:$0xf] %vm5287_vm0, %v1217_v22  ;;  %v1297_v26 = vrot.slane %v1290_v23, 4 }
 0x40d   : > { %v1292_v24 = vpop.permute.xlu0 %1291  ;;  %v1229_v25 = vld [vmem:[#allocation2 + $0x18] sm:$0xf] }
 0x40e   : > { %v1298_v27 = vrot.slane %v1292_v24, 4  ;;  %1310 = vst.msk [vmem:[#allocation3 + $0x14] sm:$0xc] %vm5288_vm4, %v1292_v24  ;;  %v4639_v28 = vpop.permute.xlu1 %1335  ;;  %v1316_v30 = vld [vmem:[#allocation2 + $0x18] sm:$0xf] }
 0x40f   : > { %v1230_v29 = vld [vmem:[#allocation2 + $0x20] sm:$0xf]  ;;  %v1416_v49 = vld [vmem:[#allocation2 + $0x18] sm:$0xf] }
 0x410   : > { %v1317_v31 = vld [vmem:[#allocation2 + $0x20] sm:$0xf]  ;;  %v4075_v32 = vpack.c.bf16 %v1230_v29, %v1229_v25  ;;  %v1301_v34 = vsel %vm369_vm5, %v1297_v26, %v1298_v27  ;;  %v1259_v52 = vld [vmem:[#allocation2 + $0x18] sm:$0xf] }
 0x411   : > { %v4083_v36 = vpack.c.bf16 %v1317_v31, %v1316_v30  ;;  %v1302_v37 = vsel %vm371_vm9, %v1290_v23, %v1301_v34  ;;  %v4643_v41 = vpop.permute.xlu0 %1337  ;;  %v1417_v42 = vld [vmem:[#allocation2 + $0x20] sm:$0xf]  ;;  %v1516_v63 = vld [vmem:[#allocation2 + $0x18] sm:$0xf]  ;;  %v1286_v30 = vrot.slane %v4606_v15, 4 }
 0x412   : > { %1254 = vst [vmem:[#allocation3 + $0xc] sm:$0x33] %v4075_v32  ;;  %v1231_v43 = vld [vmem:[#allocation2 + $0x28] sm:$0xf]  ;;  %1309 = vst [vmem:[#allocation3 + $0xc] sm:$0xcc] %v1302_v37  ;;  %v1390_v44 = vpop.permute.xlu1 %1389  ;;  %v4091_v50 = vpack.c.bf16 %v1417_v42, %v1416_v49 }
 0x413   : > { %1356 = vst.msk [vmem:[#allocation3 + $0x2c] sm:$0xf] %vm793_vm1, %v4643_v41  ;;  %1339 = vrot.lane.b32.xlu1 %v4083_v36, %s4341_s11  ;;  %v1318_v45 = vld [vmem:[#allocation2 + $0x28] sm:$0xf]  ;;  %v1260_v46 = vld [vmem:[#allocation2 + $0x20] sm:$0xf]  ;;  %v4076_v47 = vpack.c.bf16 %v1231_v43, %v1231_v43 }
 0x414   : > { %v4084_v48 = vpack.c.bf16 %v1318_v45, %v1318_v45  ;;  %v1418_v51 = vld [vmem:[#allocation2 + $0x28] sm:$0xf]  ;;  %v1517_v54 = vld [vmem:[#allocation2 + $0x20] sm:$0xf]  ;;  %v4079_v55 = vpack.c.bf16 %v1260_v46, %v1259_v52  ;;  %v1397_v58 = vrot.slane %v1390_v44, 4 }
 0x415   : > { %1255 = vst.msk [vmem:[#allocation3 + $0x14] sm:$0x3] %vm5290_vm15, %v4076_v47  ;;  %v1392_v53 = vpop.permute.xlu0 %1391  ;;  %v1261_v56 = vld [vmem:[#allocation2 + $0x28] sm:$0xf]  ;;  %v1363_v61 = vld [vmem:[#allocation2 + $0x20] sm:$0xf]  ;;  %v4092_v62 = vpack.c.bf16 %v1418_v51, %v1418_v51  ;;  %v4099_v2 = vpack.c.bf16 %v1517_v54, %v1516_v63 }
 0x416   : > { %1341 = vrot.lane.b32.xlu0 %v4084_v48, %s4341_s11  ;;  %v1398_v59 = vrot.slane %v1392_v53, 4  ;;  %1410 = vst.msk [vmem:[#allocation3 + $0x38] sm:$0xc] %vm5288_vm4, %v1392_v53  ;;  %v4651_v60 = vpop.permute.xlu1 %1435  ;;  %v1518_v3 = vld [vmem:[#allocation2 + $0x28] sm:$0xf]  ;;  %v4080_v5 = vpack.c.bf16 %v1261_v56, %v1261_v56  ;;  %v1284_v10 = vrot.slane %v4079_v55, 6 }
 0x417   : > { %1439 = vrot.lane.b32.xlu1 %v4091_v50, %s4343_s13  ;;  %v1362_v6 = vld [vmem:[#allocation2 + $0x18] sm:$0xf]  ;;  %v1364_v12 = vld [vmem:[#allocation2 + $0x28] sm:$0xf]  ;;  %vm5291_vm15 = vcmask 1041408   ;;  %v4100_v22 = vpack.c.bf16 %v1518_v3, %v1518_v3 }
 0x418   : > { %v1401_v1 = vsel %vm369_vm5, %v1397_v58, %v1398_v59  ;;  %v4087_v11 = vpack.c.bf16 %v1363_v61, %v1362_v6  ;;  %vm4661_vm0 = vmor %vm5291_vm15, %vm1279_vm3  ;;  %v1287_v24 = vrot.slane %v4080_v5, 6  ;;  %v4088_v25 = vpack.c.bf16 %v1364_v12, %v1364_v12  ;;  %v1463_v34 = vld [vmem:[#allocation2 + $0x20] sm:$0xf]  ;;  %v1462_v43 = vld [vmem:[#allocation2 + $0x18] sm:$0xf] }
 0x419   : > { %v1402_v7 = vsel %vm428_vm10, %v1390_v44, %v1401_v1  ;;  %v4657_v8 = vpop.permute.xlu0 %1437  ;;  %v1662_v9 = vld [vmem:[#allocation3 + $0xc] sm:$0xff]  ;;  %v1285_v27 = vsel %vm4661_vm0, %v1283_v20, %v1284_v10  ;;  %v4095_v46 = vpack.c.bf16 %v1463_v34, %v1462_v43  ;;  %v1464_v47 = vld [vmem:[#allocation2 + $0x28] sm:$0xf]  ;;  %v1563_v48 = vld [vmem:[#allocation2 + $0x20] sm:$0xf]  ;;  %vm5294_vm3 = vcmask 254976  }
 0x41a   : > { %1441 = vrot.lane.b32.xlu0 %v4092_v62, %s4343_s13  ;;  %1409 = vst [vmem:[#allocation3 + $0x30] sm:$0xcc] %v1402_v7  ;;  %1456 = vst.msk [vmem:[#allocation3 + $0x50] sm:$0xf] %vm793_vm1, %v4657_v8  ;;  %v1490_v16 = vpop.permute.xlu1 %1489  ;;  %v3852_v18 = vcombine.high %v4510_v39, %v1662_v9  ;;  %v3851_v19 = vcombine.low %v4510_v39, %v1662_v9  ;;  %v1384_v29 = vrot.slane %v4087_v11, 6  ;;  %v1387_v42 = vrot.slane %v4088_v25, 6 }
 0x41b   : > { %1539 = vrot.lane.b32.xlu1 %v4099_v2, %s4344_s14  ;;  %v1497_v31 = vrot.slane %v1490_v16, 4  ;;  %v1288_v37 = vsel %vm4661_vm0, %v1286_v30, %v1287_v24  ;;  %v4096_v51 = vpack.c.bf16 %v1464_v47, %v1464_v47  ;;  %v1562_v52 = vld [vmem:[#allocation2 + $0x18] sm:$0xf]  ;;  %v1484_v54 = vrot.slane %v4095_v46, 6  ;;  %v1564_v56 = vld [vmem:[#allocation2 + $0x28] sm:$0xf]  ;;  %vm5295_vm15 = vmmov %vm5294_vm3 }
 0x41c   : > { %1817 = vmatprep.subr.bf16.mxu0 %v3852_v18  ;;  %v4299_v23 = vld [vmem:[#allocation3 + $0x8] ss:$12 sps:$4 sm:$0xff]   ;;  %v1385_v45 = vsel %vm4661_vm0, %v1283_v20, %v1384_v29  ;;  %v1388_v50 = vsel %vm4661_vm0, %v1286_v30, %v1387_v42  ;;  %v4103_v55 = vpack.c.bf16 %v1563_v48, %v1562_v52  ;;  %v4104_v63 = vpack.c.bf16 %v1564_v56, %v1564_v56  ;;  %v1617_v7 = vld [vmem:[#allocation2 + $0x20] sm:$0xf]  ;;  %v1618_v11 = vld [vmem:[#allocation2 + $0x28] sm:$0xf] }
 0x41d   : > { %1818 = vmatpush1.bf16.msra.mxu0 %v3851_v19  ;;  %v1492_v26 = vpop.permute.xlu0 %1491  ;;  %1957 = vst.msk [vmem:[#allocation3 + $0x8] sm:$0xf] %vm793_vm1, %v4506_v38  ;;  %4242 = vmatpush3.bf16.msra.mxu1 %v4299_v23  ;;  %v1487_v62 = vrot.slane %v4096_v51, 6  ;;  %v1485_v2 = vsel %vm4661_vm0, %v1283_v20, %v1484_v54  ;;  %v4108_v12 = vpack.c.bf16 %v1618_v11, %v1618_v11  ;;  %v1444_v51 = vrot.slane %v4657_v8, 4 }
 0x41e   : > { %1541 = vrot.lane.b32.xlu0 %v4100_v22, %s4344_s14  ;;  %v1498_v14 = vrot.slane %v1492_v26, 4  ;;  %1510 = vst.msk [vmem:[#allocation3 + $0x5c] sm:$0xc] %vm5288_vm4, %v1492_v26  ;;  %v4678_v32 = vpop.permute.xlu1 %1535  ;;  %4243 = vmatprep.subr.bf16.mxu1 %v4340_v0  ;;  %v1584_v3 = vrot.slane %v4103_v55, 6  ;;  %v1443_v54 = vrot.slane %v4651_v60, 4 }
 0x41f   : > { %1293 = vrot.lane.b32.xlu1 %v1285_v27, %s4342_s12  ;;  %v1488_v5 = vsel %vm4661_vm0, %v1286_v30, %v1487_v62  ;;  %v1543_v11 = vrot.slane %v4678_v32, 4 }
 0x420   : > { %v1501_v36 = vsel %vm369_vm5, %v1497_v31, %v1498_v14  ;;  %v1585_v6 = vsel %vm4661_vm0, %v1283_v20, %v1584_v3  ;;  %v1447_v8 = vsel %vm369_vm5, %v1443_v54, %v1444_v51 }
 0x421   : > { %v1502_v15 = vsel %vm484_vm11, %v1490_v16, %v1501_v36  ;;  %v4687_v44 = vpop.permute.xlu0 %1537  ;;  %v1688_v16 = vld [vmem:[%s5281_s7 + $0x8] sm:$0xf]  ;;  %v1344_v36 = vrot.slane %v4643_v41, 4 }
 0x422   : > { %1295 = vrot.lane.b32.xlu0 %v1288_v37, %s4342_s12  ;;  %1509 = vst [vmem:[#allocation3 + $0x54] sm:$0xcc] %v1502_v15  ;;  %1556 = vst.msk [vmem:[#allocation3 + $0x74] sm:$0xf] %vm793_vm1, %v4687_v44  ;;  %v1590_v49 = vpop.permute.xlu1 %1589  ;;  %v1343_v15 = vrot.slane %v4639_v28, 4 }
 0x423   : > { %1393 = vrot.lane.b32.xlu1 %v1385_v45, %s4345_s15  ;;  %v1597_v58 = vrot.slane %v1590_v49, 4 }
 0x424   : > { %v1347_v48 = vsel %vm369_vm5, %v1343_v15, %v1344_v36 }
 0x425   : > { %v1592_v53 = vpop.permute.xlu0 %1591 }
 0x426   : > { %1395 = vrot.lane.b32.xlu0 %v1388_v50, %s4345_s15  ;;  %v1598_v59 = vrot.slane %v1592_v53, 4  ;;  %1610 = vst.msk [vmem:[#allocation3 + $0x80] sm:$0xc] %vm5288_vm4, %v1592_v53  ;;  %v1348_v53 = vsel %vm399_vm8, %v4639_v28, %v1347_v48 }
 0x427   : > { %1635 = vrot.lane.b32.xlu1 %v4510_v39, %s4348_s18  ;;  %v1587_v39 = vrot.slane %v4104_v63, 6 }
 0x428   : > { %v1601_v61 = vsel %vm369_vm5, %v1597_v58, %v1598_v59 }
 0x429   : > { %v1602_v1 = vsel %vm540_vm12, %v1590_v49, %v1601_v61  ;;  %v1588_v9 = vsel %vm4661_vm0, %v1286_v30, %v1587_v39 }
 0x42a   : > { %1637 = vrot.lane.b32.xlu0 %v4506_v38, %s4348_s18  ;;  %1609 = vst [vmem:[#allocation3 + $0x78] sm:$0xcc] %v1602_v1  ;;  %v1616_v38 = vld [vmem:[#allocation2 + $0x18] sm:$0xf] }
 0x42b   : > { %1493 = vrot.lane.b32.xlu1 %v1485_v2, %s4346_s16  ;;  %v4107_v10 = vpack.c.bf16 %v1617_v7, %v1616_v38 }
 0x42e   : > { %1495 = vrot.lane.b32.xlu0 %v1488_v5, %s4346_s16 }
 0x42f   : > { %1593 = vrot.lane.b32.xlu1 %v1585_v6, %s4347_s17  ;;  %v1544_v6 = vrot.slane %v4687_v44, 4 }
 0x431   : > { %v1547_v44 = vsel %vm369_vm5, %v1543_v11, %v1544_v6 }
 0x432   : > { %1595 = vrot.lane.b32.xlu0 %v1588_v9, %s4347_s17 }
 0x433   : > { %1639 = vrot.lane.b32.xlu1 %v4107_v10, %s4348_s18  ;;  %v1448_v10 = vsel %vm455_vm6, %v4651_v60, %v1447_v8 }
 0x436   : > { %1641 = vrot.lane.b32.xlu0 %v4108_v12, %s4348_s18 }
 0x437   : > { %1691 = vperm.xlu1 %4281, %v1688_v16  }
 0x485   : > { %v1340_v18 = vpop.permute.xlu1 %1339 }
 0x486   : > { %v1345_v20 = vrot.slane %v1340_v18, 4 }
 0x488   : > { %v1342_v19 = vpop.permute.xlu0 %1341 }
 0x489   : > { %v1346_v22 = vrot.slane %v1342_v19, 4  ;;  %1358 = vst.msk [vmem:[#allocation3 + $0x38] sm:$0x3] %vm5294_vm3, %v1342_v19  ;;  %v1440_v23 = vpop.permute.xlu1 %1439 }
 0x48a   : > { %v1445_v27 = vrot.slane %v1440_v23, 4 }
 0x48b   : > { %v1349_v24 = vsel %vm369_vm5, %v1345_v20, %v1346_v22 }
 0x48c   : > { %v1350_v25 = vsel %vm399_vm8, %v1340_v18, %v1349_v24  ;;  %v1442_v26 = vpop.permute.xlu0 %1441  ;;  %v1548_v24 = vsel %vm511_vm7, %v4678_v32, %v1547_v44 }
 0x48d   : > { %1357 = vst [vmem:[#allocation3 + $0x30] sm:$0x33] %v1350_v25  ;;  %v1446_v29 = vrot.slane %v1442_v26, 4  ;;  %1458 = vst.msk [vmem:[#allocation3 + $0x5c] sm:$0x3] %vm5295_vm15, %v1442_v26  ;;  %v1540_v30 = vpop.permute.xlu1 %1539 }
 0x48e   : > { %v1545_v37 = vrot.slane %v1540_v30, 4  ;;  %vm5296_vm15 = vmmov %vm5294_vm3 }
 0x48f   : > { %v1449_v31 = vsel %vm369_vm5, %v1445_v27, %v1446_v29 }
 0x490   : > { %v1450_v14 = vsel %vm455_vm6, %v1440_v23, %v1449_v31  ;;  %v1542_v34 = vpop.permute.xlu0 %1541 }
 0x491   : > { %1457 = vst [vmem:[#allocation3 + $0x54] sm:$0x33] %v1450_v14  ;;  %v1546_v42 = vrot.slane %v1542_v34, 4  ;;  %1558 = vst.msk [vmem:[#allocation3 + $0x80] sm:$0x3] %vm5294_vm3, %v1542_v34  ;;  %v1294_v43 = vpop.permute.xlu1 %1293  ;;  %vm1807_vm3 = vcmask 1045504  }
 0x492   : > { %v1299_v49 = vrot.slane %v1294_v43, 4 }
 0x493   : > { %v1549_v45 = vsel %vm369_vm5, %v1545_v37, %v1546_v42 }
 0x494   : > { %v1550_v46 = vsel %vm511_vm7, %v1540_v30, %v1549_v45  ;;  %v1296_v47 = vpop.permute.xlu0 %1295  ;;  %v1668_v2 = vld [vmem:[#allocation3 + $0x30] sm:$0xff] }
 0x495   : > { %1557 = vst [vmem:[#allocation3 + $0x78] sm:$0x33] %v1550_v46  ;;  %v1300_v50 = vrot.slane %v1296_v47, 4  ;;  %1312 = vst.msk [vmem:[#allocation3 + $0x20] sm:$0xf] %vm793_vm1, %v1296_v47  ;;  %v1394_v41 = vpop.permute.xlu1 %1393 }
 0x496   : > { %v1399_v58 = vrot.slane %v1394_v41, 4  ;;  %v4302_v27 = vld [vmem:[#allocation3 + $0x50] ss:$12 sps:$4 sm:$0xff]  }
 0x497   : > { %v1303_v52 = vsel %vm369_vm5, %v1299_v49, %v1300_v50 }
 0x498   : > { %v1304_v55 = vsel %vm371_vm9, %v1294_v43, %v1303_v52  ;;  %v1396_v56 = vpop.permute.xlu0 %1395  ;;  %v1674_v39 = vld [vmem:[#allocation3 + $0x54] sm:$0xff] }
 0x499   : > { %v1400_v59 = vrot.slane %v1396_v56, 4  ;;  %1412 = vst.msk [vmem:[#allocation3 + $0x44] sm:$0xf] %vm793_vm1, %v1396_v56  ;;  %v4741_v61 = vpop.permute.xlu1 %1635  ;;  %v3855_v62 = vcombine.high %v1304_v55, %v1348_v53  ;;  %v3854_v63 = vcombine.low %v1304_v55, %v1348_v53  ;;  %v3861_v12 = vcombine.high %v1448_v10, %v1674_v39  ;;  %v1659_v55 = vld [vmem:[%s5278_s4] sm:$0x3] }
 0x49a   : > { %v3860_v60 = vcombine.low %v1448_v10, %v1674_v39  ;;  %v1643_v51 = vrot.slane %v4741_v61, 4 }
 0x49b   : > { %v1403_v1 = vsel %vm369_vm5, %v1399_v58, %v1400_v59  ;;  %1819 = vmatprep.subr.bf16.mxu0 %v3855_v62 }
 0x49c   : > { %v1404_v28 = vsel %vm428_vm10, %v1394_v41, %v1403_v1  ;;  %v4746_v3 = vpop.permute.xlu0 %1637  ;;  %v4300_v5 = vld [vmem:[#allocation3 + $0x20] ss:$12 sps:$4 sm:$0xff]   ;;  %1820 = vmatpush1.bf16.msra.mxu0 %v3854_v63  ;;  %v1680_v43 = vld [vmem:[#allocation3 + $0x78] sm:$0xff] }
 0x49d   : > { %1656 = vst.msk [vmem:[#allocation3 + $0x98] sm:$0xf] %vm793_vm1, %v4746_v3  ;;  %v1494_v7 = vpop.permute.xlu1 %1493  ;;  %v3858_v38 = vcombine.high %v1668_v2, %v1404_v28  ;;  %v3857_v9 = vcombine.low %v1668_v2, %v1404_v28  ;;  %4244 = vmatpush3.bf16.msra.mxu1 %v4300_v5  ;;  %v1644_v41 = vrot.slane %v4746_v3, 4 }
 0x49e   : > { %4245 = vmatprep.subr.bf16.mxu1 %v4340_v0  ;;  %v1499_v19 = vrot.slane %v1494_v7, 4 }
 0x49f   : > { %1821 = vmatprep.subr.bf16.mxu0 %v3858_v38  ;;  %v1647_v53 = vsel %vm369_vm5, %v1643_v51, %v1644_v41 }
 0x4a0   : > { %v1496_v16 = vpop.permute.xlu0 %1495  ;;  %v4301_v18 = vld [vmem:[#allocation3 + $0x38] ss:$12 sps:$4 sm:$0xff]   ;;  %1822 = vmatpush1.bf16.msra.mxu0 %v3857_v9  ;;  %v1648_v56 = vsel %vm5289_vm13, %v4741_v61, %v1647_v53 }
 0x4a1   : > { %v1500_v20 = vrot.slane %v1496_v16, 4  ;;  %1512 = vst.msk [vmem:[#allocation3 + $0x68] sm:$0xf] %vm793_vm1, %v1496_v16  ;;  %v1594_v22 = vpop.permute.xlu1 %1593  ;;  %1823 = vmatprep.subr.bf16.mxu0 %v3861_v12  ;;  %4246 = vmatpush3.bf16.msra.mxu1 %v4301_v18 }
 0x4a2   : > { %4247 = vmatprep.subr.bf16.mxu1 %v4340_v0  ;;  %v1599_v29 = vrot.slane %v1594_v22, 4 }
 0x4a3   : > { %v1503_v23 = vsel %vm369_vm5, %v1499_v19, %v1500_v20 }
 0x4a4   : > { %v1504_v25 = vsel %vm484_vm11, %v1494_v7, %v1503_v23  ;;  %v1596_v26 = vpop.permute.xlu0 %1595  ;;  %1824 = vmatpush1.bf16.msra.mxu0 %v3860_v60 }
 0x4a5   : > { %v1600_v30 = vrot.slane %v1596_v26, 4  ;;  %1612 = vst.msk [vmem:[#allocation3 + $0x8c] sm:$0xf] %vm793_vm1, %v1596_v26  ;;  %v3864_v31 = vcombine.high %v1504_v25, %v1548_v24  ;;  %v3863_v14 = vcombine.low %v1504_v25, %v1548_v24  ;;  %v1640_v34 = vpop.permute.xlu1 %1639  ;;  %4248 = vmatpush3.bf16.msra.mxu1 %v4302_v27  ;;  %v1962_v25 = vld [vmem:[#allocation2 + $0x10] sm:$0xff]  ;;  %v4798_v27 = vld [vmem:[#allocation3] sm:$0xff] }
 0x4a6   : > { %4249 = vmatprep.subr.bf16.mxu1 %v4340_v0  ;;  %v1645_v15 = vrot.slane %v1640_v34, 4  ;;  %v4790_v26 = vpack.c.bf16 %v1962_v25, %v1962_v25 }
 0x4a7   : > { %v1603_v36 = vsel %vm369_vm5, %v1599_v29, %v1600_v30  ;;  %1825 = vmatprep.subr.bf16.mxu0 %v3864_v31 }
 0x4a8   : > { %v1604_v32 = vsel %vm540_vm12, %v1594_v22, %v1603_v36  ;;  %v1642_v37 = vpop.permute.xlu0 %1641  ;;  %v4303_v42 = vld [vmem:[#allocation3 + $0x68] ss:$12 sps:$4 sm:$0xff]   ;;  %1826 = vmatpush1.bf16.msra.mxu0 %v3863_v14 }
 0x4a9   : > { %v1646_v45 = vrot.slane %v1642_v37, 4  ;;  %1658 = vst.msk [vmem:[#allocation3 + $0xa4] sm:$0x3] %vm5296_vm15, %v1642_v37  ;;  %v3867_v46 = vcombine.high %v1680_v43, %v1604_v32  ;;  %v3866_v47 = vcombine.low %v1680_v43, %v1604_v32  ;;  %4250 = vmatpush3.bf16.msra.mxu1 %v4303_v42 }
 0x4aa   : > { %4251 = vmatprep.subr.bf16.mxu1 %v4340_v0 }
 0x4ab   : > { %v1649_v48 = vsel %vm369_vm5, %v1645_v15, %v1646_v45  ;;  %1827 = vmatprep.subr.bf16.mxu0 %v3867_v46 }
 0x4ac   : > { %v1650_v49 = vsel %vm5289_vm13, %v1640_v34, %v1649_v48  ;;  %v4304_v50 = vld [vmem:[#allocation3 + $0x80] ss:$12 sps:$4 sm:$0xff]   ;;  %1828 = vmatpush1.bf16.msra.mxu0 %v3866_v47 }
 0x4ad   : > { %1657 = vst [vmem:[#allocation3 + $0x9c] sm:$0x33] %v1650_v49  ;;  %4252 = vmatpush3.bf16.msra.mxu1 %v4304_v50 }
 0x4ae   : > { %4253 = vmatprep.subr.bf16.mxu1 %v4340_v0 }
 0x4b0   : > { %v4305_v52 = vld [vmem:[#allocation3 + $0x98] ss:$12 sps:$4 sm:$0x3f]  }
 0x4b1   : > { %v1815_v54 = vsel %vm1807_vm3, %v4305_v52, 0 }
 0x4b2   : > { %4254 = vmatpush3.bf16.msra.mxu1 %v1815_v54 }
 0x4b3   : > { %2570 = vmatprep.subr.bf16.mxu1 %v4350_v57 }
 0x4b4   : > { %v1686_v58 = vld [vmem:[#allocation3 + $0x9c] sm:$0x33] }
 0x4b5   : > { %v3870_v59 = vcombine.high %v1648_v56, %v1686_v58  ;;  %v3869_v62 = vcombine.low %v1648_v56, %v1686_v58  ;;  %4256 = vmatmul.mubr.msk.bf16.vlgmr.msra.gmra.mrb[8].mxu1 %vm484_vm11, %v1659_v55 }
 0x4b6   : > { %v1692_v1 = vpop.permute.xlu1 %1691 }
 0x4b7   : > { %3872 = vmatprep.subr.msk.bf16.mxu0 %vm1807_vm3, %v3870_v59  ;;  %v1809_v63 = vsel %vm1807_vm3, %v3869_v62, 0 }
 0x4b8   : > { %1830 = vmatpush1.bf16.msra.mxu0 %v1809_v63 }
 0x4bb   : > { %3873 = vmatmul.mubr.msk.bf16.vlgmr.msra.gmra.mrb[8].mxu0 %vm484_vm11, %v1659_v55 }
 0x588   : > { %v1892_v8 = vpop.f32.mrb[8].mxu1 }
 0x589   : > { %v4257_v2 = vpop.f32.mrb[9].mxu1  ;;  %v1893_v28 = vadd.f32 %v1892_v8, %v1692_v1 }
 0x58a   : > { %v1895_v3 = vpop.f32.mrb[10].mxu1 }
 0x58b   : > { %v4258_v5 = vpop.f32.mrb[11].mxu1  ;;  %v1903_v61 = vmul.f32 0.01, %v1893_v28  ;;  %vm1900_vm15 = vcmp.ge.f32.partialorder %v1893_v28, 0.0 }
 0x58d   : > { %v1906_v16 = vsel %vm1900_vm15, %v1893_v28, %v1903_v61  ;;  %vm5298_vm15 = vcmask 416772  }
 0x58e   : > { %v1851_v39 = vpop.f32.mrb[8].mxu0  ;;  %v1909_v60 = vmul.f32 %v1906_v16, %v4486_v4 }
 0x58f   : > { %v1852_v6 = vadd.f32 %v1851_v39, %v1692_v1  ;;  %v1853_v7 = vpop.f32.mrb[9].mxu0 }
 0x590   : > { %v1854_v38 = vadd.f32 %v1853_v7, %v1692_v1  ;;  %v1855_v9 = vpop.f32.mrb[10].mxu0  ;;  %v1915_v24 = vrot.slane %v1909_v60, 4 }
 0x591   : > { %vm1898_vm4 = vcmp.ge.f32.partialorder %v1852_v6, 0.0  ;;  %v1901_v10 = vmul.f32 0.01, %v1852_v6  ;;  %v1856_v11 = vpop.f32.mrb[11].mxu0 }
 0x592   : > { %vm1899_vm3 = vcmp.ge.f32.partialorder %v1854_v38, 0.0  ;;  %v1902_v12 = vmul.f32 0.01, %v1854_v38 }
 0x593   : > { %v1904_v18 = vsel %vm1898_vm4, %v1852_v6, %v1901_v10  ;;  %vm5297_vm4 = vcmask 1047708  }
 0x594   : > { %v1905_v44 = vsel %vm1899_vm3, %v1854_v38, %v1902_v12  ;;  %v1907_v19 = vmul.f32 %v1904_v18, %v4489_v17  ;;  %vm2525_vm3 = vcmask 130048  }
 0x595   : > { %v1908_v20 = vmul.f32 %v1905_v44, %v4492_v21 }
 0x596   : > { %v1913_v22 = vrot.slane %v1907_v19, 4 }
 0x597   : > { %v1914_v23 = vrot.slane %v1908_v20, 4 }
 0x598   : > { %1916 = vrot.lane.b32.xlu0 %v1913_v22, %s4351_s25  ;;  %v4913_v22 = vld.sshfl [vmem:[%s5279_s5] sm:$0x33 pattern:$0x76325410] }
 0x599   : > { %1918 = vrot.lane.b32.xlu1 %v1914_v23, %s4351_s25  ;;  %v2379_v60 = vcombine.high %v4913_v22, %v4913_v22  ;;  %v2365_v23 = vld [vmem:[%s5281_s7 + $0xc] sm:$0xf] }
 0x59b   : > { %3940 = vmatprep.mubr.msk.bf16.mxu1 %vm2525_vm3, %v2379_v60  ;;  %3939 = vmatprep.mubr.msk.bf16.mxu0 %vm2525_vm3, %v2379_v60 }
 0x59c   : > { %1920 = vrot.lane.b32.xlu0 %v1915_v24, %s4351_s25 }
 0x59d   : > { %1982 = vrot.lane.b32.xlu1 %v4512_v40, %s4342_s12 }
 0x5a0   : > { %1984 = vrot.lane.b32.xlu0 %v4790_v26, %s4342_s12 }
 0x5a1   : > { %2028 = vrot.lane.b32.xlu1 %v4512_v40, %s4341_s11 }
 0x5a4   : > { %2030 = vrot.lane.b32.xlu0 %v4790_v26, %s4341_s11 }
 0x5a5   : > { %2074 = vrot.lane.b32.xlu1 %v4798_v27, %s4345_s15 }
 0x5a8   : > { %2076 = vrot.lane.b32.xlu0 %v4790_v26, %s4345_s15 }
 0x5a9   : > { %2120 = vrot.lane.b32.xlu1 %v4798_v27, %s4343_s13 }
 0x5ac   : > { %2122 = vrot.lane.b32.xlu0 %v4790_v26, %s4343_s13 }
 0x5ad   : > { %2166 = vrot.lane.b32.xlu1 %v4798_v27, %s4346_s16 }
 0x5b0   : > { %2168 = vrot.lane.b32.xlu0 %v4790_v26, %s4346_s16 }
 0x5b1   : > { %2212 = vrot.lane.b32.xlu1 %v4798_v27, %s4344_s14 }
 0x5b4   : > { %2214 = vrot.lane.b32.xlu0 %v4790_v26, %s4344_s14 }
 0x5b5   : > { %2258 = vrot.lane.b32.xlu1 %v4798_v27, %s4347_s17 }
 0x5b8   : > { %2260 = vrot.lane.b32.xlu0 %v4790_v26, %s4347_s17 }
 0x5b9   : > { %2304 = vrot.lane.b32.xlu1 %v4798_v27, %s4348_s18 }
 0x5bc   : > { %2306 = vrot.lane.b32.xlu0 %v4790_v26, %s4348_s18 }
 0x60a   : > { %v1917_v40 = vpop.permute.xlu0 %1916 }
 0x60b   : > { %1927 = vst.msk [vmem:[#allocation2 + $0x18] sm:$0xf0] %vm5297_vm4, %v1917_v40  ;;  %v1919_v29 = vpop.permute.xlu1 %1918 }
 0x60c   : > { %v1922_v30 = vsel %vm765_vm14, %v1917_v40, %v1919_v29 }
 0x60d   : > { %1928 = vst [vmem:[#allocation2 + $0x20] sm:$0xf0] %v1922_v30 }
 0x60e   : > { %v1921_v31 = vpop.permute.xlu0 %1920 }
 0x60f   : > { %v1923_v14 = vsel %vm765_vm14, %v1919_v29, %v1921_v31  ;;  %v1983_v34 = vpop.permute.xlu1 %1982 }
 0x610   : > { %1929 = vst.msk [vmem:[#allocation2 + $0x28] sm:$0xf0] %vm5298_vm15, %v1923_v14  ;;  %v1990_v32 = vrot.slane %v1983_v34, 4 }
 0x612   : > { %v1985_v36 = vpop.permute.xlu0 %1984  ;;  %v1963_v43 = vld [vmem:[#allocation2 + $0x18] sm:$0xff] }
 0x613   : > { %v1991_v37 = vrot.slane %v1985_v36, 4  ;;  %2003 = vst.msk [vmem:[#allocation3 + $0x20] sm:$0xf] %vm793_vm1, %v1985_v36  ;;  %v2029_v42 = vpop.permute.xlu1 %2028  ;;  %v4331_v53 = vpack.c.bf16 %v1963_v43, %v4502_v33 }
 0x614   : > { %v1964_v15 = vld [vmem:[#allocation2 + $0x20] sm:$0xff]  ;;  %v2036_v50 = vrot.slane %v2029_v42, 4 }
 0x615   : > { %v1994_v45 = vsel %vm369_vm5, %v1990_v32, %v1991_v37  ;;  %v4830_v46 = vpack.c.bf16 %v1964_v15, %v1963_v43  ;;  %v4330_v52 = vpack.c.bf16 %v1964_v15, %v4504_v35 }
 0x616   : > { %v4833_v47 = vsel %vm371_vm9, %v1983_v34, %v1994_v45  ;;  %v2031_v48 = vpop.permute.xlu0 %2030 }
 0x617   : > { %v1935_v49 = vld [vmem:[#allocation2 + $0x28] sm:$0xff]  ;;  %2002 = vst [vmem:[#allocation3 + $0x18] sm:$0xff] %v4833_v47  ;;  %v2037_v41 = vrot.slane %v2031_v48, 4  ;;  %2049 = vst.msk [vmem:[#allocation3 + $0x38] sm:$0xf] %vm793_vm1, %v2031_v48  ;;  %v2075_v51 = vpop.permute.xlu1 %2074  ;;  %1986 = vrot.lane.b32.xlu1 %v4830_v46, %s4342_s12  ;;  %2529 = vmatprep.subr.bf16.mxu0 %v4330_v52 }
 0x618   : > { %2683 = vst [vmem:[#allocation3 + $0xc] sm:$0xff] %v4830_v46  ;;  %v4842_v54 = vpack.c.bf16 %v1935_v49, %v1935_v49  ;;  %2530 = vmatpush1.bf16.msra.mxu0 %v4331_v53  ;;  %v2082_v35 = vrot.slane %v2075_v51, 4 }
 0x619   : > { %v2040_v55 = vsel %vm369_vm5, %v2036_v50, %v2037_v41 }
 0x61a   : > { %1959 = vst.msk [vmem:[#allocation3 + $0x14] sm:$0xf] %vm793_vm1, %v4842_v54  ;;  %v4848_v56 = vsel %vm399_vm8, %v2029_v42, %v2040_v55  ;;  %1988 = vrot.lane.b32.xlu0 %v4842_v54, %s4342_s12  ;;  %v2077_v58 = vpop.permute.xlu0 %2076 }
 0x61b   : > { %v2083_v59 = vrot.slane %v2077_v58, 4  ;;  %2095 = vst.msk [vmem:[#allocation3 + $0x50] sm:$0xf] %vm793_vm1, %v2077_v58  ;;  %v2121_v33 = vpop.permute.xlu1 %2120  ;;  %2032 = vrot.lane.b32.xlu1 %v4830_v46, %s4341_s11 }
 0x61c   : > { %v2128_v1 = vrot.slane %v2121_v33, 4 }
 0x61d   : > { %v2086_v62 = vsel %vm369_vm5, %v2082_v35, %v2083_v59 }
 0x61e   : > { %v4857_v63 = vsel %vm428_vm10, %v2075_v51, %v2086_v62  ;;  %2034 = vrot.lane.b32.xlu0 %v4842_v54, %s4341_s11  ;;  %v2123_v8 = vpop.permute.xlu0 %2122 }
 0x61f   : > { %v2129_v2 = vrot.slane %v2123_v8, 4  ;;  %2141 = vst.msk [vmem:[#allocation3 + $0x68] sm:$0xf] %vm793_vm1, %v2123_v8  ;;  %v2167_v28 = vpop.permute.xlu1 %2166  ;;  %2078 = vrot.lane.b32.xlu1 %v4830_v46, %s4345_s15 }
 0x620   : > { %v2174_v6 = vrot.slane %v2167_v28, 4 }
 0x621   : > { %v2132_v3 = vsel %vm369_vm5, %v2128_v1, %v2129_v2  ;;  %v4306_v5 = vld [vmem:[#allocation3 + $0x8] ss:$12 sps:$4 sm:$0xff]  }
 0x622   : > { %v4866_v39 = vsel %vm455_vm6, %v2121_v33, %v2132_v3  ;;  %2080 = vrot.lane.b32.xlu0 %v4842_v54, %s4345_s15  ;;  %v2169_v61 = vpop.permute.xlu0 %2168  ;;  %2682 = vst.msk [vmem:[#allocation3 + $0x8] sm:$0xf] %vm793_vm1, %v4790_v26  ;;  %2684 = vst.msk [vmem:[#allocation3 + $0x14] sm:$0xf] %vm793_vm1, %v4842_v54  ;;  %2571 = vmatpush1.bf16.msra.mxu1 %v4306_v5 }
 0x623   : > { %v2175_v7 = vrot.slane %v2169_v61, 4  ;;  %2187 = vst.msk [vmem:[#allocation3 + $0x80] sm:$0xf] %vm793_vm1, %v2169_v61  ;;  %2124 = vrot.lane.b32.xlu1 %v4830_v46, %s4343_s13  ;;  %v2213_v38 = vpop.permute.xlu1 %2212  ;;  %2572 = vmatprep.subr.bf16.mxu1 %v4350_v57 }
 0x624   : > { %v2220_v12 = vrot.slane %v2213_v38, 4 }
 0x625   : > { %v2178_v9 = vsel %vm369_vm5, %v2174_v6, %v2175_v7 }
 0x626   : > { %v4880_v10 = vsel %vm484_vm11, %v2167_v28, %v2178_v9  ;;  %2126 = vrot.lane.b32.xlu0 %v4842_v54, %s4343_s13  ;;  %v2215_v11 = vpop.permute.xlu0 %2214 }
 0x627   : > { %v2221_v16 = vrot.slane %v2215_v11, 4  ;;  %2233 = vst.msk [vmem:[#allocation3 + $0x98] sm:$0xf] %vm793_vm1, %v2215_v11  ;;  %2170 = vrot.lane.b32.xlu1 %v4830_v46, %s4346_s16  ;;  %v4924_v24 = vpop.permute.xlu1 %2258 }
 0x629   : > { %v2224_v18 = vsel %vm369_vm5, %v2220_v12, %v2221_v16 }
 0x62a   : > { %v4889_v44 = vsel %vm511_vm7, %v2213_v38, %v2224_v18  ;;  %2172 = vrot.lane.b32.xlu0 %v4842_v54, %s4346_s16  ;;  %v4893_v19 = vpop.permute.xlu0 %2260 }
 0x62b   : > { %2232 = vst [vmem:[#allocation3 + $0x90] sm:$0xff] %v4889_v44  ;;  %2279 = vst.msk [vmem:[#allocation3 + $0xb0] sm:$0xf] %vm793_vm1, %v4893_v19  ;;  %2216 = vrot.lane.b32.xlu1 %v4830_v46, %s4344_s14  ;;  %v4926_v25 = vpop.permute.xlu1 %2304  ;;  %v2267_v12 = vrot.slane %v4893_v19, 4 }
 0x62e   : > { %2218 = vrot.lane.b32.xlu0 %v4842_v54, %s4344_s14  ;;  %v4902_v20 = vpop.permute.xlu0 %2306 }
 0x62f   : > { %2325 = vst.msk [vmem:[#allocation3 + $0xc8] sm:$0xf] %vm793_vm1, %v4902_v20  ;;  %2262 = vrot.lane.b32.xlu1 %v4830_v46, %s4347_s17 }
 0x632   : > { %2264 = vrot.lane.b32.xlu0 %v4842_v54, %s4347_s17 }
 0x633   : > { %2308 = vrot.lane.b32.xlu1 %v4830_v46, %s4348_s18 }
 0x636   : > { %2310 = vrot.lane.b32.xlu0 %v4842_v54, %s4348_s18 }
 0x637   : > { %2368 = vperm.xlu1 %4281, %v2365_v23  }
 0x689   : > { %v1987_v40 = vpop.permute.xlu1 %1986 }
 0x68a   : > { %v1992_v30 = vrot.slane %v1987_v40, 4 }
 0x68c   : > { %v1989_v29 = vpop.permute.xlu0 %1988 }
 0x68d   : > { %v1993_v31 = vrot.slane %v1989_v29, 4  ;;  %2005 = vst.msk [vmem:[#allocation3 + $0x2c] sm:$0xf] %vm793_vm1, %v1989_v29  ;;  %v2033_v14 = vpop.permute.xlu1 %2032 }
 0x68e   : > { %v2038_v37 = vrot.slane %v2033_v14, 4 }
 0x68f   : > { %v1996_v34 = vsel %vm369_vm5, %v1992_v30, %v1993_v31  ;;  %v2266_v31 = vrot.slane %v4924_v24, 4 }
 0x690   : > { %v1997_v36 = vsel %vm371_vm9, %v1987_v40, %v1996_v34  ;;  %v2035_v32 = vpop.permute.xlu0 %2034  ;;  %v2313_v34 = vrot.slane %v4902_v20, 4 }
 0x691   : > { %v2039_v42 = vrot.slane %v2035_v32, 4  ;;  %2051 = vst.msk [vmem:[#allocation3 + $0x44] sm:$0xf] %vm793_vm1, %v2035_v32  ;;  %v2079_v43 = vpop.permute.xlu1 %2078  ;;  %v3916_v15 = vcombine.high %v4833_v47, %v1997_v36  ;;  %v3915_v45 = vcombine.low %v4833_v47, %v1997_v36  ;;  %v2270_v19 = vsel %vm369_vm5, %v2266_v31, %v2267_v12 }
 0x692   : > { %v2084_v51 = vrot.slane %v2079_v43, 4  ;;  %v2271_v20 = vsel %vm540_vm12, %v4924_v24, %v2270_v19  ;;  %v2723_v31 = vrot.slane %v4798_v27, 6  ;;  %v2729_v19 = vrot.slane %v4842_v54, 6 }
 0x693   : > { %v2042_v48 = vsel %vm369_vm5, %v2038_v37, %v2039_v42  ;;  %2531 = vmatprep.subr.bf16.mxu0 %v3916_v15 }
 0x694   : > { %v2043_v49 = vsel %vm399_vm8, %v2033_v14, %v2042_v48  ;;  %v2081_v50 = vpop.permute.xlu0 %2080  ;;  %v4307_v41 = vld [vmem:[#allocation3 + $0x20] ss:$12 sps:$4 sm:$0xff]   ;;  %2532 = vmatpush1.bf16.msra.mxu0 %v3915_v45  ;;  %v2312_v45 = vrot.slane %v4926_v25, 4 }
 0x695   : > { %v2085_v52 = vrot.slane %v2081_v50, 4  ;;  %2097 = vst.msk [vmem:[#allocation3 + $0x5c] sm:$0xf] %vm793_vm1, %v2081_v50  ;;  %v2125_v53 = vpop.permute.xlu1 %2124  ;;  %v3919_v55 = vcombine.high %v4848_v56, %v2043_v49  ;;  %v3918_v58 = vcombine.low %v4848_v56, %v2043_v49  ;;  %2573 = vmatpush1.bf16.msra.mxu1 %v4307_v41 }
 0x696   : > { %2574 = vmatprep.subr.bf16.mxu1 %v4350_v57  ;;  %v2130_v62 = vrot.slane %v2125_v53, 4  ;;  %v2316_v50 = vsel %vm369_vm5, %v2312_v45, %v2313_v34 }
 0x697   : > { %v2088_v47 = vsel %vm369_vm5, %v2084_v51, %v2085_v52  ;;  %2533 = vmatprep.subr.bf16.mxu0 %v3919_v55  ;;  %v2317_v24 = vsel %vm5289_vm13, %v4926_v25, %v2316_v50  ;;  %v3996_v25 = vcombine.low %v4798_v27, %v4830_v46 }
 0x698   : > { %v2089_v35 = vsel %vm428_vm10, %v2079_v43, %v2088_v47  ;;  %v2127_v59 = vpop.permute.xlu0 %2126  ;;  %v4308_v33 = vld [vmem:[#allocation3 + $0x38] ss:$12 sps:$4 sm:$0xff]   ;;  %2534 = vmatpush1.bf16.msra.mxu0 %v3918_v58 }
 0x699   : > { %2096 = vst [vmem:[#allocation3 + $0x54] sm:$0xff] %v2089_v35  ;;  %v2131_v8 = vrot.slane %v2127_v59, 4  ;;  %2143 = vst.msk [vmem:[#allocation3 + $0x74] sm:$0xf] %vm793_vm1, %v2127_v59  ;;  %v2171_v1 = vpop.permute.xlu1 %2170  ;;  %v3922_v2 = vcombine.high %v4857_v63, %v2089_v35  ;;  %v3921_v56 = vcombine.low %v4857_v63, %v2089_v35  ;;  %2575 = vmatpush1.bf16.msra.mxu1 %v4308_v33 }
 0x69a   : > { %2576 = vmatprep.subr.bf16.mxu1 %v4350_v57  ;;  %v2176_v6 = vrot.slane %v2171_v1, 4 }
 0x69b   : > { %v2134_v28 = vsel %vm369_vm5, %v2130_v62, %v2131_v8  ;;  %2535 = vmatprep.subr.bf16.mxu0 %v3922_v2  ;;  %v3997_v8 = vcombine.high %v4798_v27, %v4830_v46  ;;  %v4315_v2 = vld [vmem:[#allocation3 + $0x8] ss:$12 sps:$4 sm:$0xff]  }
 0x69c   : > { %v2135_v3 = vsel %vm455_vm6, %v2125_v53, %v2134_v28  ;;  %v2173_v5 = vpop.permute.xlu0 %2172  ;;  %v4309_v61 = vld [vmem:[#allocation3 + $0x50] ss:$12 sps:$4 sm:$0xff]   ;;  %2536 = vmatpush1.bf16.msra.mxu0 %v3921_v56 }
 0x69d   : > { %v2177_v7 = vrot.slane %v2173_v5, 4  ;;  %2189 = vst.msk [vmem:[#allocation3 + $0x8c] sm:$0xf] %vm793_vm1, %v2173_v5  ;;  %v2217_v38 = vpop.permute.xlu1 %2216  ;;  %v3925_v9 = vcombine.high %v4866_v39, %v2135_v3  ;;  %v3924_v63 = vcombine.low %v4866_v39, %v2135_v3  ;;  %2577 = vmatpush1.bf16.msra.mxu1 %v4309_v61 }
 0x69e   : > { %2578 = vmatprep.subr.bf16.mxu1 %v4350_v57  ;;  %v2222_v23 = vrot.slane %v2217_v38, 4 }
 0x69f   : > { %v2180_v11 = vsel %vm369_vm5, %v2176_v6, %v2177_v7  ;;  %2537 = vmatprep.subr.bf16.mxu0 %v3925_v9 }
 0x6a0   : > { %v2181_v16 = vsel %vm484_vm11, %v2171_v1, %v2180_v11  ;;  %v2219_v18 = vpop.permute.xlu0 %2218  ;;  %v4310_v60 = vld [vmem:[#allocation3 + $0x68] ss:$12 sps:$4 sm:$0xff]   ;;  %2538 = vmatpush1.bf16.msra.mxu0 %v3924_v63 }
 0x6a1   : > { %v2223_v40 = vrot.slane %v2219_v18, 4  ;;  %2235 = vst.msk [vmem:[#allocation3 + $0xa4] sm:$0xf] %vm793_vm1, %v2219_v18  ;;  %v2263_v29 = vpop.permute.xlu1 %2262  ;;  %v3928_v39 = vcombine.high %v4880_v10, %v2181_v16  ;;  %v3927_v30 = vcombine.low %v4880_v10, %v2181_v16  ;;  %2579 = vmatpush1.bf16.msra.mxu1 %v4310_v60 }
 0x6a2   : > { %2580 = vmatprep.subr.bf16.mxu1 %v4350_v57  ;;  %v2268_v42 = vrot.slane %v2263_v29, 4 }
 0x6a3   : > { %v2226_v14 = vsel %vm369_vm5, %v2222_v23, %v2223_v40  ;;  %2539 = vmatprep.subr.bf16.mxu0 %v3928_v39 }
 0x6a4   : > { %v2227_v36 = vsel %vm511_vm7, %v2217_v38, %v2226_v14  ;;  %v2265_v32 = vpop.permute.xlu0 %2264  ;;  %v4311_v37 = vld [vmem:[#allocation3 + $0x80] ss:$12 sps:$4 sm:$0xff]   ;;  %2540 = vmatpush1.bf16.msra.mxu0 %v3927_v30  ;;  %v2726_v14 = vrot.slane %v4830_v46, 6 }
 0x6a5   : > { %v2269_v43 = vrot.slane %v2265_v32, 4  ;;  %2281 = vst.msk [vmem:[#allocation3 + $0xbc] sm:$0xf] %vm793_vm1, %v2265_v32  ;;  %v3931_v10 = vcombine.high %v4889_v44, %v2227_v36  ;;  %v3930_v15 = vcombine.low %v4889_v44, %v2227_v36  ;;  %v2309_v48 = vpop.permute.xlu1 %2308  ;;  %2581 = vmatpush1.bf16.msra.mxu1 %v4311_v37 }
 0x6a6   : > { %2582 = vmatprep.subr.bf16.mxu1 %v4350_v57  ;;  %v2314_v44 = vrot.slane %v2309_v48, 4 }
 0x6a7   : > { %v2272_v49 = vsel %vm369_vm5, %v2268_v42, %v2269_v43  ;;  %2541 = vmatprep.subr.bf16.mxu0 %v3931_v10 }
 0x6a8   : > { %v2273_v41 = vsel %vm540_vm12, %v2263_v29, %v2272_v49  ;;  %v2311_v51 = vpop.permute.xlu0 %2310  ;;  %v4312_v52 = vld [vmem:[#allocation3 + $0x98] ss:$12 sps:$4 sm:$0xff]   ;;  %2542 = vmatpush1.bf16.msra.mxu0 %v3930_v15 }
 0x6a9   : > { %v2315_v53 = vrot.slane %v2311_v51, 4  ;;  %2327 = vst.msk [vmem:[#allocation3 + $0xd4] sm:$0xf] %vm793_vm1, %v2311_v51  ;;  %v3934_v55 = vcombine.high %v2271_v20, %v2273_v41  ;;  %v3933_v58 = vcombine.low %v2271_v20, %v2273_v41  ;;  %2583 = vmatpush1.bf16.msra.mxu1 %v4312_v52 }
 0x6aa   : > { %2584 = vmatprep.subr.bf16.mxu1 %v4350_v57 }
 0x6ab   : > { %v2318_v47 = vsel %vm369_vm5, %v2314_v44, %v2315_v53  ;;  %2543 = vmatprep.subr.bf16.mxu0 %v3934_v55 }
 0x6ac   : > { %v2319_v35 = vsel %vm5289_vm13, %v2309_v48, %v2318_v47  ;;  %v4313_v59 = vld [vmem:[#allocation3 + $0xb0] ss:$12 sps:$4 sm:$0xff]   ;;  %2544 = vmatpush1.bf16.msra.mxu0 %v3933_v58  ;;  %vm316_vm13 = vcmask 568320  }
 0x6ad   : > { %2326 = vst [vmem:[#allocation3 + $0xcc] sm:$0xff] %v2319_v35  ;;  %v3937_v33 = vcombine.high %v2317_v24, %v2319_v35  ;;  %v3936_v62 = vcombine.low %v2317_v24, %v2319_v35  ;;  %2585 = vmatpush1.bf16.msra.mxu1 %v4313_v59  ;;  %317 = vst.msk [vmem:[#allocation2 + $0x40] sm:$0xf] %vm316_vm13, %v4340_v0  ;;  %vm5299_vm13 = vcmask 412672  }
 0x6ae   : > { %2586 = vmatprep.subr.bf16.mxu1 %v4350_v57 }
 0x6af   : > { %2545 = vmatprep.subr.bf16.mxu0 %v3937_v33 }
 0x6b0   : > { %v4314_v1 = vld [vmem:[#allocation3 + $0xc8] ss:$12 sps:$4 sm:$0xff]   ;;  %2546 = vmatpush1.bf16.msra.mxu0 %v3936_v62 }
 0x6b1   : > { %3579 = vmatprep.subr.bf16.mxu0 %v3997_v8  ;;  %2587 = vmatpush1.bf16.msra.mxu1 %v4314_v1 }
 0x6b2   : > { %3620 = vmatprep.subr.bf16.mxu1 %v4350_v57 }
 0x6b3   : > { %2562 = vmatmul.mubr.bf16.vlgmr.msra.gmra.mrb[12].mxu0 %v4913_v22 }
 0x6b4   : > { %3580 = vmatpush1.bf16.msra.mxu0 %v3996_v25  ;;  %2603 = vmatmul.mubr.bf16.vlgmr.msra.gmra.mrb[12].mxu1 %v4913_v22 }
 0x6b5   : > { %3621 = vmatpush1.bf16.msra.mxu1 %v4315_v2 }
 0x6b6   : > { %3622 = vmatprep.subr.bf16.mxu1 %v4350_v57  ;;  %v2369_v56 = vpop.permute.xlu1 %2368 }
 0x786   : > { %v2563_v28 = vpop.f32.mrb[12].mxu0 }
 0x787   : > { %v2564_v3 = vadd.f32 %v2563_v28, %v2369_v56  ;;  %v2565_v5 = vpop.f32.mrb[13].mxu0  ;;  %v2604_v61 = vpop.f32.mrb[12].mxu1 }
 0x788   : > { %v2566_v6 = vadd.f32 %v2565_v5, %v2369_v56  ;;  %v2567_v7 = vpop.f32.mrb[14].mxu0  ;;  %v2605_v38 = vadd.f32 %v2604_v61, %v2369_v56  ;;  %v2606_v63 = vpop.f32.mrb[13].mxu1 }
 0x789   : > { %vm2610_vm4 = vcmp.ge.f32.partialorder %v2564_v3, 0.0  ;;  %v2613_v9 = vmul.f32 0.01, %v2564_v3  ;;  %v2568_v11 = vpop.f32.mrb[15].mxu0  ;;  %v2607_v16 = vpop.f32.mrb[14].mxu1 }
 0x78a   : > { %vm2611_vm15 = vcmp.ge.f32.partialorder %v2566_v6, 0.0  ;;  %v2614_v12 = vmul.f32 0.01, %v2566_v6  ;;  %vm2612_vm3 = vcmp.ge.f32.partialorder %v2605_v38, 0.0  ;;  %v2615_v22 = vmul.f32 0.01, %v2605_v38 }
 0x78b   : > { %v2616_v18 = vsel %vm2610_vm4, %v2564_v3, %v2613_v9  ;;  %v2608_v60 = vpop.f32.mrb[15].mxu1  ;;  %vm5300_vm4 = vcmask 257026  }
 0x78c   : > { %v2619_v23 = vmul.f32 %v2616_v18, %v4489_v17  ;;  %v2617_v40 = vsel %vm2611_vm15, %v2566_v6, %v2614_v12  ;;  %v2618_v29 = vsel %vm2612_vm3, %v2605_v38, %v2615_v22  ;;  %v2724_v17 = vrot.slane %v4790_v26, 6 }
 0x78d   : > { %v2620_v39 = vmul.f32 %v2617_v40, %v4492_v21  ;;  %v2621_v30 = vmul.f32 %v2618_v29, %v4486_v4  ;;  %v2725_v21 = vrot.slane %v2723_v31, 4  ;;  %v5061_v22 = vrot.slane %v2726_v14, 4 }
 0x78e   : > { %2625 = vrot.lane.b32.xlu0 %v2619_v23, %s4351_s25  ;;  %v2728_v4 = vrot.slane %v2724_v17, 4 }
 0x78f   : > { %2627 = vrot.lane.b32.xlu1 %v2620_v39, %s4351_s25  ;;  %v2727_v0 = vsel %vm4661_vm0, %v2725_v21, %v2726_v14 }
 0x790   : > { %v2730_v34 = vsel %vm4661_vm0, %v2728_v4, %v2729_v19 }
 0x792   : > { %2629 = vrot.lane.b32.xlu0 %v2621_v30, %s4351_s25 }
 0x793   : > { %2737 = vrot.lane.b32.xlu1 %v2723_v31, %s4342_s12 }
 0x796   : > { %2739 = vrot.lane.b32.xlu0 %v2724_v17, %s4342_s12 }
 0x797   : > { %2741 = vrot.lane.b32.xlu1 %v2727_v0, %s4342_s12 }
 0x79a   : > { %2743 = vrot.lane.b32.xlu0 %v2730_v34, %s4342_s12 }
 0x79b   : > { %2809 = vrot.lane.b32.xlu1 %v4798_v27, %s4341_s11 }
 0x79e   : > { %2811 = vrot.lane.b32.xlu0 %v4790_v26, %s4341_s11 }
 0x79f   : > { %2813 = vrot.lane.b32.xlu1 %v4830_v46, %s4341_s11 }
 0x7a2   : > { %2815 = vrot.lane.b32.xlu0 %v4842_v54, %s4341_s11 }
 0x7a3   : > { %2895 = vrot.lane.b32.xlu1 %v2723_v31, %s4345_s15 }
 0x7a6   : > { %2897 = vrot.lane.b32.xlu0 %v2724_v17, %s4345_s15 }
 0x7a7   : > { %2899 = vrot.lane.b32.xlu1 %v2727_v0, %s4345_s15 }
 0x7aa   : > { %2901 = vrot.lane.b32.xlu0 %v2730_v34, %s4345_s15 }
 0x7ab   : > { %2967 = vrot.lane.b32.xlu1 %v4798_v27, %s4343_s13 }
 0x7ae   : > { %2969 = vrot.lane.b32.xlu0 %v4790_v26, %s4343_s13 }
 0x7af   : > { %2971 = vrot.lane.b32.xlu1 %v4830_v46, %s4343_s13 }
 0x7b2   : > { %2973 = vrot.lane.b32.xlu0 %v4842_v54, %s4343_s13 }
 0x7b3   : > { %3053 = vrot.lane.b32.xlu1 %v2723_v31, %s4346_s16 }
 0x7b6   : > { %3055 = vrot.lane.b32.xlu0 %v2724_v17, %s4346_s16 }
 0x7b7   : > { %3057 = vrot.lane.b32.xlu1 %v2727_v0, %s4346_s16 }
 0x7ba   : > { %3059 = vrot.lane.b32.xlu0 %v2730_v34, %s4346_s16 }
 0x7bb   : > { %3125 = vrot.lane.b32.xlu1 %v4798_v27, %s4344_s14 }
 0x7be   : > { %3127 = vrot.lane.b32.xlu0 %v4790_v26, %s4344_s14 }
 0x7bf   : > { %3129 = vrot.lane.b32.xlu1 %v4830_v46, %s4344_s14  ;;  %v5073_v46 = vrot.slane %v2729_v19, 4 }
 0x7c2   : > { %3131 = vrot.lane.b32.xlu0 %v4842_v54, %s4344_s14 }
 0x800   : > { %v2626_v36 = vpop.permute.xlu0 %2625 }
 0x801   : > { %2636 = vst.msk [vmem:[#allocation2 + $0x30] sm:$0xf] %vm1221_vm2, %v2626_v36  ;;  %v2628_v32 = vpop.permute.xlu1 %2627  ;;  %vm5302_vm2 = vmmov %vm5300_vm4 }
 0x802   : > { %v2631_v37 = vsel %vm765_vm14, %v2626_v36, %v2628_v32  ;;  %vm5303_vm15 = vmmov %vm5302_vm2 }
 0x803   : > { %2637 = vst [vmem:[#allocation2 + $0x38] sm:$0xf] %v2631_v37  ;;  %v3162_v37 = vld [vmem:[#allocation2 + $0x8] sm:$0xff] }
 0x804   : > { %v2630_v42 = vpop.permute.xlu0 %2629 }
 0x805   : > { %v2632_v43 = vsel %vm765_vm14, %v2628_v32, %v2630_v42  ;;  %v2738_v27 = vpop.permute.xlu1 %2737  ;;  %vm5301_vm14 = vcmask 254976  }
 0x806   : > { %2638 = vst.msk [vmem:[#allocation2 + $0x40] sm:$0xf] %vm5299_vm13, %v2632_v43  ;;  %v2749_v15 = vrot.slane %v2738_v27, 4  ;;  %vm5304_vm3 = vmmov %vm5301_vm14 }
 0x807   : > { %vm5305_vm13 = vmmov %vm5304_vm3 }
 0x808   : > { %v2740_v26 = vpop.permute.xlu0 %2739  ;;  %v2645_v10 = vld [vmem:[#allocation2 + $0x30] sm:$0xf] }
 0x809   : > { %v2750_v45 = vrot.slane %v2740_v26, 4  ;;  %2768 = vst.msk [vmem:[#allocation3 + $0x20] sm:$0xc] %vm5300_vm4, %v2740_v26  ;;  %v2742_v48 = vpop.permute.xlu1 %2741  ;;  %v2779_v20 = vld [vmem:[#allocation2 + $0x30] sm:$0xf]  ;;  %vm5312_vm4 = vcmask 1041408  }
 0x80a   : > { %v2646_v49 = vld [vmem:[#allocation2 + $0x38] sm:$0xf]  ;;  %v2693_v44 = vld [vmem:[#allocation2 + $0x30] sm:$0xf]  ;;  %v2751_v59 = vrot.slane %v2742_v48, 4 }
 0x80b   : > { %v2780_v50 = vld [vmem:[#allocation2 + $0x38] sm:$0xf]  ;;  %v4149_v41 = vpack.c.bf16 %v2646_v49, %v2645_v10  ;;  %v2755_v51 = vsel %vm369_vm5, %v2749_v15, %v2750_v45  ;;  %v2937_v2 = vld [vmem:[#allocation2 + $0x30] sm:$0xf] }
 0x80c   : > { %v4161_v52 = vpack.c.bf16 %v2780_v50, %v2779_v20  ;;  %v2694_v53 = vld [vmem:[#allocation2 + $0x38] sm:$0xf]  ;;  %v2756_v55 = vsel %vm371_vm9, %v2738_v27, %v2755_v51  ;;  %v2744_v58 = vpop.permute.xlu0 %2743  ;;  %v2851_v40 = vld [vmem:[#allocation2 + $0x30] sm:$0xf]  ;;  %v3161_v50 = vld [vmem:[#allocation2] sm:$0xff] }
 0x80d   : > { %v2938_v47 = vld [vmem:[#allocation2 + $0x38] sm:$0xf]  ;;  %v4155_v24 = vpack.c.bf16 %v2694_v53, %v2693_v44  ;;  %2685 = vst [vmem:[#allocation3 + $0x18] sm:$0x33] %v4149_v41  ;;  %v2647_v35 = vld [vmem:[#allocation2 + $0x40] sm:$0xf]  ;;  %v2810_v62 = vpop.permute.xlu1 %2809 }
 0x80e   : > { %2767 = vst [vmem:[#allocation3 + $0x18] sm:$0xcc] %v2756_v55  ;;  %v2752_v33 = vrot.slane %v2744_v58, 4  ;;  %2770 = vst.msk [vmem:[#allocation3 + $0x2c] sm:$0xf] %vm793_vm1, %v2744_v58  ;;  %2817 = vrot.lane.b32.xlu1 %v4161_v52, %s4341_s11  ;;  %v4150_v1 = vpack.c.bf16 %v2647_v35, %v2647_v35  ;;  %v4173_v3 = vpack.c.bf16 %v2938_v47, %v2937_v2  ;;  %v2821_v9 = vrot.slane %v2810_v62, 4 }
 0x80f   : > { %v2781_v8 = vld [vmem:[#allocation2 + $0x40] sm:$0xf]  ;;  %v2732_v38 = vrot.slane %v4155_v24, 6  ;;  %v2852_v12 = vld [vmem:[#allocation2 + $0x38] sm:$0xf]  ;;  %v5087_v52 = vpack.c.bf16 %v3162_v37, %v3161_v50  ;;  %v3163_v44 = vld [vmem:[#allocation2 + $0x10] sm:$0xff] }
 0x810   : > { %v4162_v25 = vpack.c.bf16 %v2781_v8, %v2781_v8  ;;  %v2695_v56 = vld [vmem:[#allocation2 + $0x40] sm:$0xf]  ;;  %v2757_v28 = vsel %vm369_vm5, %v2751_v59, %v2752_v33  ;;  %2686 = vst.msk [vmem:[#allocation3 + $0x20] sm:$0x3] %vm5301_vm14, %v4150_v1  ;;  %v2812_v7 = vpop.permute.xlu0 %2811  ;;  %v3096_v23 = vld [vmem:[#allocation2 + $0x38] sm:$0xf]  ;;  %v4167_v14 = vpack.c.bf16 %v2852_v12, %v2851_v40  ;;  %vm5314_vm14 = vmmov %vm5312_vm4 }
 0x811   : > { %v2939_v5 = vld [vmem:[#allocation2 + $0x40] sm:$0xf]  ;;  %v4156_v61 = vpack.c.bf16 %v2695_v56, %v2695_v56  ;;  %v2758_v6 = vsel %vm371_vm9, %v2742_v48, %v2757_v28  ;;  %v2822_v63 = vrot.slane %v2812_v7, 4  ;;  %2840 = vst.msk [vmem:[#allocation3 + $0x44] sm:$0xf] %vm793_vm1, %v2812_v7  ;;  %v2814_v11 = vpop.permute.xlu1 %2813  ;;  %v2733_v30 = vsel %vm4661_vm0, %v5061_v22, %v2732_v38  ;;  %v3164_v58 = vld [vmem:[#allocation2 + $0x18] sm:$0xff] }
 0x812   : > { %2819 = vrot.lane.b32.xlu0 %v4162_v25, %s4341_s11  ;;  %2769 = vst [vmem:[#allocation3 + $0x24] sm:$0xff] %v2758_v6  ;;  %2975 = vrot.lane.b32.xlu1 %v4173_v3, %s4343_s13  ;;  %v4174_v16 = vpack.c.bf16 %v2939_v5, %v2939_v5  ;;  %v2853_v17 = vld [vmem:[#allocation2 + $0x40] sm:$0xf]  ;;  %v2823_v21 = vrot.slane %v2814_v11, 4  ;;  %v3095_v32 = vld [vmem:[#allocation2 + $0x30] sm:$0xf]  ;;  %v5100_v25 = vpack.c.bf16 %v3163_v44, %v3163_v44 }
 0x813   : > { %v2827_v18 = vsel %vm369_vm5, %v2821_v9, %v2822_v63  ;;  %v2735_v60 = vrot.slane %v4156_v61, 6  ;;  %v4185_v19 = vpack.c.bf16 %v3096_v23, %v3095_v32  ;;  %v3097_v27 = vld [vmem:[#allocation2 + $0x40] sm:$0xf]  ;;  %v4168_v26 = vpack.c.bf16 %v2853_v17, %v2853_v17  ;;  %v3166_v33 = vld [vmem:[#allocation2 + $0x28] sm:$0xff]  ;;  %v3010_v2 = vld [vmem:[#allocation2 + $0x38] sm:$0xf] }
 0x814   : > { %v5065_v29 = vsel %vm399_vm8, %v2810_v62, %v2827_v18  ;;  %v2816_v39 = vpop.permute.xlu0 %2815  ;;  %v2890_v45 = vrot.slane %v4167_v14, 6  ;;  %v3165_v41 = vld [vmem:[#allocation2 + $0x20] sm:$0xff]  ;;  %v4186_v51 = vpack.c.bf16 %v3097_v27, %v3097_v27  ;;  %v3197_v56 = vrot.slane %v5087_v52, 6  ;;  %v3009_v61 = vld [vmem:[#allocation2 + $0x30] sm:$0xf] }
 0x815   : > { %v3324_v31 = vld [vmem:[#allocation3 + $0x18] sm:$0xff]  ;;  %v2824_v0 = vrot.slane %v2816_v39, 4  ;;  %2842 = vst.msk [vmem:[#allocation3 + $0x50] sm:$0xf] %vm793_vm1, %v2816_v39  ;;  %v2896_v4 = vpop.permute.xlu1 %2895  ;;  %v2736_v54 = vsel %vm4661_vm0, %v5073_v46, %v2735_v60  ;;  %v2893_v55 = vrot.slane %v4168_v26, 6  ;;  %v5096_v59 = vpack.c.bf16 %v3165_v41, %v3164_v58 }
 0x816   : > { %2977 = vrot.lane.b32.xlu0 %v4174_v16, %s4343_s13  ;;  %2745 = vrot.lane.b32.xlu1 %v2733_v30, %s4342_s12  ;;  %v3999_v34 = vcombine.low %v3324_v31, %v2758_v6  ;;  %v4000_v36 = vcombine.high %v3324_v31, %v2758_v6  ;;  %v2907_v48 = vrot.slane %v2896_v4, 4  ;;  %v2891_v35 = vsel %vm4661_vm0, %v5061_v22, %v2890_v45  ;;  %v3011_v63 = vld [vmem:[#allocation2 + $0x40] sm:$0xf] }
 0x817   : > { %v2829_v42 = vsel %vm369_vm5, %v2823_v21, %v2824_v0  ;;  %v4316_v43 = vld [vmem:[#allocation3 + $0x20] ss:$12 sps:$4 sm:$0xff]   ;;  %v2894_v3 = vsel %vm4661_vm0, %v5073_v46, %v2893_v55  ;;  %v5107_v5 = vpack.c.bf16 %v3166_v33, %v3166_v33  ;;  %v3200_v38 = vrot.slane %v5096_v59, 6  ;;  %v3255_v13 = vld [vmem:[#allocation2 + $0x40] sm:$0xf] }
 0x818   : > { %3581 = vmatprep.subr.bf16.mxu0 %v4000_v36  ;;  %v5082_v10 = vsel %vm399_vm8, %v2814_v11, %v2829_v42  ;;  %v2898_v15 = vpop.permute.xlu0 %2897  ;;  %3623 = vmatpush1.bf16.msra.mxu1 %v4316_v43  ;;  %v4179_v9 = vpack.c.bf16 %v3010_v2, %v3009_v61  ;;  %v3198_v18 = vrot.slane %v5100_v25, 6  ;;  %v3199_v60 = vrot.slane %v3197_v56, 4  ;;  %v3168_v36 = vld [vmem:[#allocation2 + $0x38] sm:$0xf] }
 0x819   : > { %3582 = vmatpush1.bf16.msra.mxu0 %v3999_v34  ;;  %v2908_v49 = vrot.slane %v2898_v15, 4  ;;  %2926 = vst.msk [vmem:[#allocation3 + $0x5c] sm:$0xc] %vm5302_vm2, %v2898_v15  ;;  %v2900_v20 = vpop.permute.xlu1 %2899  ;;  %3624 = vmatprep.subr.bf16.mxu1 %v4350_v57  ;;  %v3203_v40 = vrot.slane %v5107_v5, 6  ;;  %v4180_v39 = vpack.c.bf16 %v3011_v63, %v3011_v63  ;;  %v3169_v15 = vld [vmem:[#allocation2 + $0x40] sm:$0xf] }
 0x81a   : > { %2747 = vrot.lane.b32.xlu0 %v2736_v54, %s4342_s12  ;;  %3133 = vrot.lane.b32.xlu1 %v4185_v19, %s4344_s14  ;;  %v2909_v62 = vrot.slane %v2900_v20, 4  ;;  %v3201_v14 = vsel %vm4661_vm0, %v3199_v60, %v3200_v38  ;;  %v3048_v17 = vrot.slane %v4179_v9, 6  ;;  %v3202_v34 = vrot.slane %v3198_v18, 4  ;;  %v3167_v54 = vld [vmem:[#allocation2 + $0x30] sm:$0xf] }
 0x81b   : > { %v2913_v53 = vsel %vm369_vm5, %v2907_v48, %v2908_v49  ;;  %v3051_v42 = vrot.slane %v4180_v39, 6  ;;  %v4191_v26 = vpack.c.bf16 %v3168_v36, %v3167_v54  ;;  %v5184_v60 = vld.sshfl [vmem:[%s5280_s6] sm:$0x33 pattern:$0x76325410] }
 0x81c   : > { %v2914_v47 = vsel %vm428_vm10, %v2896_v4, %v2913_v53  ;;  %v2902_v24 = vpop.permute.xlu0 %2901  ;;  %v3204_v37 = vsel %vm4661_vm0, %v3202_v34, %v3203_v40  ;;  %v3049_v27 = vsel %vm4661_vm0, %v5061_v22, %v3048_v17  ;;  %v3661_v39 = vld [vmem:[#allocation2 + $0x8] sm:$0xf] }
 0x81d   : > { %2925 = vst [vmem:[#allocation3 + $0x54] sm:$0xcc] %v2914_v47  ;;  %v2910_v8 = vrot.slane %v2902_v24, 4  ;;  %2928 = vst.msk [vmem:[#allocation3 + $0x68] sm:$0xf] %vm793_vm1, %v2902_v24  ;;  %v2968_v1 = vpop.permute.xlu1 %2967  ;;  %v3052_v22 = vsel %vm4661_vm0, %v5073_v46, %v3051_v42  ;;  %v3206_v55 = vrot.slane %v4191_v26, 6 }
 0x81e   : > { %3135 = vrot.lane.b32.xlu0 %v4186_v51, %s4344_s14  ;;  %2903 = vrot.lane.b32.xlu1 %v2891_v35, %s4345_s15  ;;  %v2979_v11 = vrot.slane %v2968_v1, 4  ;;  %v4192_v51 = vpack.c.bf16 %v3169_v15, %v3169_v15  ;;  %v3205_v35 = vrot.slane %v3200_v38, 4  ;;  %v3254_v38 = vld [vmem:[#allocation2 + $0x38] sm:$0xf] }
 0x81f   : > { %v2915_v28 = vsel %vm369_vm5, %v2909_v62, %v2910_v8 }
 0x820   : > { %v5110_v6 = vsel %vm428_vm10, %v2900_v20, %v2915_v28  ;;  %v2970_v7 = vpop.permute.xlu0 %2969  ;;  %v3209_v46 = vrot.slane %v4192_v51, 6 }
 0x821   : > { %v2980_v12 = vrot.slane %v2970_v7, 4  ;;  %2998 = vst.msk [vmem:[#allocation3 + $0x80] sm:$0xf] %vm793_vm1, %v2970_v7  ;;  %v2972_v16 = vpop.permute.xlu1 %2971 }
 0x822   : > { %2905 = vrot.lane.b32.xlu0 %v2894_v3, %s4345_s15  ;;  %3211 = vrot.lane.b32.xlu1 %v3197_v56, %s4347_s17  ;;  %v2981_v21 = vrot.slane %v2972_v16, 4 }
 0x823   : > { %v2985_v23 = vsel %vm369_vm5, %v2979_v11, %v2980_v12  ;;  %v3253_v11 = vld [vmem:[#allocation2 + $0x30] sm:$0xf] }
 0x824   : > { %v5120_v30 = vsel %vm455_vm6, %v2968_v1, %v2985_v23  ;;  %v2974_v31 = vpop.permute.xlu0 %2973  ;;  %v3207_v1 = vsel %vm4661_vm0, %v3205_v35, %v3206_v55  ;;  %v3366_v23 = vld [vmem:[%s5281_s7 + $0x10] sm:$0xf] }
 0x825   : > { %2997 = vst [vmem:[#allocation3 + $0x78] sm:$0xff] %v5120_v30  ;;  %v2982_v0 = vrot.slane %v2974_v31, 4  ;;  %3000 = vst.msk [vmem:[#allocation3 + $0x8c] sm:$0xf] %vm793_vm1, %v2974_v31  ;;  %v3054_v4 = vpop.permute.xlu1 %3053  ;;  %v3662_v31 = vld [vmem:[#allocation2 + $0x10] sm:$0xf] }
 0x826   : > { %3213 = vrot.lane.b32.xlu0 %v3198_v18, %s4347_s17  ;;  %3215 = vrot.lane.b32.xlu1 %v3201_v14, %s4347_s17  ;;  %v3065_v45 = vrot.slane %v3054_v4, 4 }
 0x827   : > { %v2987_v32 = vsel %vm369_vm5, %v2981_v21, %v2982_v0 }
 0x828   : > { %v5132_v19 = vsel %vm455_vm6, %v2972_v16, %v2987_v32  ;;  %v3056_v43 = vpop.permute.xlu0 %3055  ;;  %v4197_v16 = vpack.c.bf16 %v3254_v38, %v3253_v11 }
 0x829   : > { %v3066_v48 = vrot.slane %v3056_v43, 4  ;;  %3084 = vst.msk [vmem:[#allocation3 + $0x98] sm:$0xc] %vm5303_vm15, %v3056_v43  ;;  %v3058_v49 = vpop.permute.xlu1 %3057  ;;  %v4011_v20 = vcombine.low %v5120_v30, %v5132_v19  ;;  %v4012_v50 = vcombine.high %v5120_v30, %v5132_v19 }
 0x82a   : > { %3217 = vrot.lane.b32.xlu0 %v3204_v37, %s4347_s17  ;;  %3061 = vrot.lane.b32.xlu1 %v3049_v27, %s4346_s16  ;;  %v3067_v58 = vrot.slane %v3058_v49, 4 }
 0x82b   : > { %v3071_v41 = vsel %vm369_vm5, %v3065_v45, %v3066_v48 }
 0x82c   : > { %v3072_v44 = vsel %vm484_vm11, %v3054_v4, %v3071_v41  ;;  %v3060_v53 = vpop.permute.xlu0 %3059 }
 0x82d   : > { %3083 = vst [vmem:[#allocation3 + $0x90] sm:$0xcc] %v3072_v44  ;;  %v3068_v47 = vrot.slane %v3060_v53, 4  ;;  %3086 = vst.msk [vmem:[#allocation3 + $0xa4] sm:$0xf] %vm793_vm1, %v3060_v53  ;;  %v3126_v24 = vpop.permute.xlu1 %3125 }
 0x82e   : > { %3063 = vrot.lane.b32.xlu0 %v3052_v22, %s4346_s16  ;;  %3283 = vrot.lane.b32.xlu1 %v5087_v52, %s4348_s18  ;;  %v3137_v2 = vrot.slane %v3126_v24, 4  ;;  %v3208_v52 = vrot.slane %v3203_v40, 4  ;;  %v3380_v40 = vcombine.high %v5184_v60, %v5184_v60 }
 0x82f   : > { %v3073_v33 = vsel %vm369_vm5, %v3067_v58, %v3068_v47 }
 0x830   : > { %v5155_v62 = vsel %vm484_vm11, %v3058_v49, %v3073_v33  ;;  %v3128_v8 = vpop.permute.xlu0 %3127  ;;  %v3210_v61 = vsel %vm4661_vm0, %v3208_v52, %v3209_v46  ;;  %vm3566_vm0 = vcmask 424960  }
 0x831   : > { %3085 = vst [vmem:[#allocation3 + $0x9c] sm:$0xff] %v5155_v62  ;;  %v3138_v56 = vrot.slane %v3128_v8, 4  ;;  %3156 = vst.msk [vmem:[#allocation3 + $0xbc] sm:$0xf] %vm793_vm1, %v3128_v8  ;;  %v3130_v28 = vpop.permute.xlu1 %3129  ;;  %4034 = vmatprep.mubr.msk.bf16.mxu1 %vm3566_vm0, %v3380_v40  ;;  %4033 = vmatprep.mubr.msk.bf16.mxu0 %vm3566_vm0, %v3380_v40 }
 0x832   : > { %3285 = vrot.lane.b32.xlu0 %v5100_v25, %s4348_s18  ;;  %3219 = vrot.lane.b32.xlu1 %v3207_v1, %s4347_s17  ;;  %v3139_v9 = vrot.slane %v3130_v28, 4 }
 0x833   : > { %v3143_v3 = vsel %vm369_vm5, %v3137_v2, %v3138_v56 }
 0x834   : > { %v5168_v25 = vsel %vm511_vm7, %v3126_v24, %v3143_v3  ;;  %v3132_v7 = vpop.permute.xlu0 %3131 }
 0x835   : > { %v3140_v63 = vrot.slane %v3132_v7, 4  ;;  %3158 = vst.msk [vmem:[#allocation3 + $0xc8] sm:$0xf] %vm793_vm1, %v3132_v7 }
 0x836   : > { %3221 = vrot.lane.b32.xlu0 %v3210_v61, %s4347_s17  ;;  %3287 = vrot.lane.b32.xlu1 %v5096_v59, %s4348_s18  ;;  %v4198_v59 = vpack.c.bf16 %v3255_v13, %v3255_v13  ;;  %s305_s17 = scalar_lea.vmem %s5282_s8, %s4259_s29 }
 0x837   : > { %v3145_v12 = vsel %vm369_vm5, %v3139_v9, %v3140_v63 }
 0x838   : > { %v5176_v18 = vsel %vm511_vm7, %v3130_v28, %v3145_v12 }
 0x83a   : > { %3289 = vrot.lane.b32.xlu0 %v5107_v5, %s4348_s18  ;;  %3291 = vrot.lane.b32.xlu1 %v4197_v16, %s4348_s18  ;;  %v3660_v5 = vld [vmem:[#allocation2] sm:$0xf] }
 0x83e   : > { %3293 = vrot.lane.b32.xlu0 %v4198_v59, %s4348_s18  ;;  %3369 = vperm.xlu1 %4281, %v3366_v23  }
 0x842   : > { %3666 = vrot.lane.b32.xlu0 %v3660_v5, %s4343_s13  ;;  %3668 = vrot.lane.b32.xlu1 %v3661_v39, %s4343_s13 }
 0x846   : > { %3670 = vrot.lane.b32.xlu0 %v3662_v31, %s4343_s13 }
 0x880   : > { %v2818_v14 = vpop.permute.xlu1 %2817 }
 0x881   : > { %v2825_v21 = vrot.slane %v2818_v14, 4 }
 0x884   : > { %v2820_v17 = vpop.permute.xlu0 %2819  ;;  %v2976_v4 = vpop.permute.xlu1 %2975 }
 0x885   : > { %v2826_v0 = vrot.slane %v2820_v17, 4  ;;  %2844 = vst.msk [vmem:[#allocation3 + $0x5c] sm:$0x3] %vm5304_vm3, %v2820_v17  ;;  %v2983_v37 = vrot.slane %v2976_v4, 4  ;;  %v4320_v17 = vld [vmem:[#allocation3 + $0x80] ss:$12 sps:$4 sm:$0xff]  }
 0x887   : > { %v2831_v34 = vsel %vm369_vm5, %v2825_v21, %v2826_v0 }
 0x888   : > { %v2832_v36 = vsel %vm399_vm8, %v2818_v14, %v2831_v34  ;;  %v2978_v32 = vpop.permute.xlu0 %2977  ;;  %v2746_v54 = vpop.permute.xlu1 %2745  ;;  %vm5306_vm8 = vmmov %vm5304_vm3 }
 0x889   : > { %2843 = vst [vmem:[#allocation3 + $0x54] sm:$0x33] %v2832_v36  ;;  %v2984_v42 = vrot.slane %v2978_v32, 4  ;;  %3002 = vst.msk [vmem:[#allocation3 + $0x98] sm:$0x3] %vm5305_vm13, %v2978_v32  ;;  %v2753_v15 = vrot.slane %v2746_v54, 4 }
 0x88b   : > { %v2989_v43 = vsel %vm369_vm5, %v2983_v37, %v2984_v42 }
 0x88c   : > { %v2990_v27 = vsel %vm455_vm6, %v2976_v4, %v2989_v43  ;;  %v2748_v26 = vpop.permute.xlu0 %2747  ;;  %v3134_v48 = vpop.permute.xlu1 %3133  ;;  %v4318_v61 = vld [vmem:[#allocation3 + $0x50] ss:$12 sps:$4 sm:$0xff]  }
 0x88d   : > { %3001 = vst [vmem:[#allocation3 + $0x90] sm:$0x33] %v2990_v27  ;;  %v2754_v45 = vrot.slane %v2748_v26, 4  ;;  %2772 = vst.msk [vmem:[#allocation3 + $0x38] sm:$0xf] %vm793_vm1, %v2748_v26  ;;  %v3141_v44 = vrot.slane %v3134_v48, 4 }
 0x88f   : > { %v2759_v49 = vsel %vm369_vm5, %v2753_v15, %v2754_v45 }
 0x890   : > { %v2760_v41 = vsel %vm371_vm9, %v2746_v54, %v2759_v49  ;;  %v3136_v22 = vpop.permute.xlu0 %3135  ;;  %v3334_v51 = vld [vmem:[#allocation3 + $0x54] sm:$0xff]  ;;  %v2904_v55 = vpop.permute.xlu1 %2903  ;;  %vm5308_vm9 = vcmask 736256  }
 0x891   : > { %2771 = vst [vmem:[#allocation3 + $0x30] sm:$0xff] %v2760_v41  ;;  %v3142_v53 = vrot.slane %v3136_v22, 4  ;;  %3160 = vst.msk [vmem:[#allocation3 + $0xd4] sm:$0x3] %vm5306_vm8, %v3136_v22  ;;  %v4002_v58 = vcombine.low %v2760_v41, %v5065_v29  ;;  %v4003_v47 = vcombine.high %v2760_v41, %v5065_v29  ;;  %v4006_v35 = vcombine.high %v5082_v10, %v3334_v51  ;;  %v4321_v37 = vld [vmem:[#allocation3 + $0x98] ss:$12 sps:$4 sm:$0xff]  }
 0x892   : > { %v2911_v1 = vrot.slane %v2904_v55, 4  ;;  %v4005_v29 = vcombine.low %v5082_v10, %v3334_v51 }
 0x893   : > { %v3147_v24 = vsel %vm369_vm5, %v3141_v44, %v3142_v53  ;;  %3583 = vmatprep.subr.bf16.mxu0 %v4003_v47 }
 0x894   : > { %v3148_v33 = vsel %vm511_vm7, %v3134_v48, %v3147_v24  ;;  %v2906_v46 = vpop.permute.xlu0 %2905  ;;  %v4317_v8 = vld [vmem:[#allocation3 + $0x38] ss:$12 sps:$4 sm:$0xff]   ;;  %3584 = vmatpush1.bf16.msra.mxu0 %v4002_v58  ;;  %v3212_v56 = vpop.permute.xlu1 %3211  ;;  %vm5307_vm7 = vmmov %vm5302_vm2  ;;  %v3344_v59 = vld [vmem:[#allocation3 + $0x90] sm:$0xff] }
 0x895   : > { %3159 = vst [vmem:[#allocation3 + $0xcc] sm:$0x33] %v3148_v33  ;;  %v2912_v2 = vrot.slane %v2906_v46, 4  ;;  %2930 = vst.msk [vmem:[#allocation3 + $0x74] sm:$0xf] %vm793_vm1, %v2906_v46  ;;  %3585 = vmatprep.subr.bf16.mxu0 %v4006_v35  ;;  %3625 = vmatpush1.bf16.msra.mxu1 %v4317_v8  ;;  %v3223_v7 = vrot.slane %v3212_v56, 4  ;;  %v4015_v39 = vcombine.high %v3344_v59, %v5155_v62 }
 0x896   : > { %3626 = vmatprep.subr.bf16.mxu1 %v4350_v57  ;;  %v4014_v4 = vcombine.low %v3344_v59, %v5155_v62 }
 0x897   : > { %v2917_v52 = vsel %vm369_vm5, %v2911_v1, %v2912_v2 }
 0x898   : > { %v2918_v28 = vsel %vm428_vm10, %v2904_v55, %v2917_v52  ;;  %v3214_v3 = vpop.permute.xlu0 %3213  ;;  %3586 = vmatpush1.bf16.msra.mxu0 %v4005_v29  ;;  %v3216_v9 = vpop.permute.xlu1 %3215  ;;  %vm5309_vm10 = vmmov %vm5308_vm9 }
 0x899   : > { %v3224_v38 = vrot.slane %v3214_v3, 4  ;;  %3242 = vst.msk [vmem:[#allocation3 + $0xd4] sm:$0xc] %vm5307_vm7, %v3214_v3  ;;  %v4008_v63 = vcombine.low %v5110_v6, %v2918_v28  ;;  %v4009_v11 = vcombine.high %v5110_v6, %v2918_v28  ;;  %3627 = vmatpush1.bf16.msra.mxu1 %v4318_v61  ;;  %v3225_v23 = vrot.slane %v3216_v9, 4 }
 0x89a   : > { %3628 = vmatprep.subr.bf16.mxu1 %v4350_v57 }
 0x89b   : > { %v3229_v10 = vsel %vm369_vm5, %v3223_v7, %v3224_v38  ;;  %3587 = vmatprep.subr.bf16.mxu0 %v4009_v11 }
 0x89c   : > { %v3230_v12 = vsel %vm540_vm12, %v3212_v56, %v3229_v10  ;;  %v3218_v16 = vpop.permute.xlu0 %3217  ;;  %v4319_v13 = vld [vmem:[#allocation3 + $0x68] ss:$12 sps:$4 sm:$0xff]   ;;  %3588 = vmatpush1.bf16.msra.mxu0 %v4008_v63  ;;  %v3062_v5 = vpop.permute.xlu1 %3061 }
 0x89d   : > { %3241 = vst [vmem:[#allocation3 + $0xcc] sm:$0xcc] %v3230_v12  ;;  %v3226_v40 = vrot.slane %v3218_v16, 4  ;;  %3244 = vst.msk [vmem:[#allocation3 + $0xe0] sm:$0xf] %vm793_vm1, %v3218_v16  ;;  %3589 = vmatprep.subr.bf16.mxu0 %v4012_v50  ;;  %3629 = vmatpush1.bf16.msra.mxu1 %v4319_v13  ;;  %v3069_v21 = vrot.slane %v3062_v5, 4 }
 0x89e   : > { %3630 = vmatprep.subr.bf16.mxu1 %v4350_v57 }
 0x89f   : > { %v3231_v6 = vsel %vm369_vm5, %v3225_v23, %v3226_v40 }
 0x8a0   : > { %v3232_v31 = vsel %vm540_vm12, %v3216_v9, %v3231_v6  ;;  %v3064_v14 = vpop.permute.xlu0 %3063  ;;  %3590 = vmatpush1.bf16.msra.mxu0 %v4011_v20  ;;  %v3284_v50 = vpop.permute.xlu1 %3283  ;;  %v4323_v53 = vld [vmem:[#allocation3 + $0xc8] ss:$12 sps:$4 sm:$0xff]  }
 0x8a1   : > { %v3070_v0 = vrot.slane %v3064_v14, 4  ;;  %3088 = vst.msk [vmem:[#allocation3 + $0xb0] sm:$0xf] %vm793_vm1, %v3064_v14  ;;  %3591 = vmatprep.subr.bf16.mxu0 %v4015_v39  ;;  %3631 = vmatpush1.bf16.msra.mxu1 %v4320_v17  ;;  %v3295_v19 = vrot.slane %v3284_v50, 4 }
 0x8a2   : > { %3632 = vmatprep.subr.bf16.mxu1 %v4350_v57 }
 0x8a3   : > { %v3075_v34 = vsel %vm369_vm5, %v3069_v21, %v3070_v0 }
 0x8a4   : > { %v3076_v36 = vsel %vm484_vm11, %v3062_v5, %v3075_v34  ;;  %v3286_v32 = vpop.permute.xlu0 %3285  ;;  %3592 = vmatpush1.bf16.msra.mxu0 %v4014_v4  ;;  %v3354_v30 = vld [vmem:[#allocation3 + $0xcc] sm:$0xff]  ;;  %v3220_v42 = vpop.permute.xlu1 %3219  ;;  %vm5310_vm11 = vmmov %vm5304_vm3 }
 0x8a5   : > { %v3296_v20 = vrot.slane %v3286_v32, 4  ;;  %3314 = vst.msk [vmem:[#allocation3 + $0xf8] sm:$0xf] %vm793_vm1, %v3286_v32  ;;  %v4017_v54 = vcombine.low %v3076_v36, %v5168_v25  ;;  %v4018_v43 = vcombine.high %v3076_v36, %v5168_v25  ;;  %3633 = vmatpush1.bf16.msra.mxu1 %v4321_v37  ;;  %v4021_v27 = vcombine.high %v5176_v18, %v3354_v30 }
 0x8a6   : > { %3634 = vmatprep.subr.bf16.mxu1 %v4350_v57  ;;  %v3227_v48 = vrot.slane %v3220_v42, 4  ;;  %v4020_v25 = vcombine.low %v5176_v18, %v3354_v30 }
 0x8a7   : > { %v3301_v62 = vsel %vm369_vm5, %v3295_v19, %v3296_v20  ;;  %3593 = vmatprep.subr.bf16.mxu0 %v4018_v43 }
 0x8a8   : > { %v3302_v26 = vsel %vm5308_vm9, %v3284_v50, %v3301_v62  ;;  %v3222_v15 = vpop.permute.xlu0 %3221  ;;  %v4322_v45 = vld [vmem:[#allocation3 + $0xb0] ss:$12 sps:$4 sm:$0xff]   ;;  %3594 = vmatpush1.bf16.msra.mxu0 %v4017_v54  ;;  %v3288_v41 = vpop.permute.xlu1 %3287 }
 0x8a9   : > { %v3228_v49 = vrot.slane %v3222_v15, 4  ;;  %3246 = vst.msk [vmem:[#allocation3 + $0xec] sm:$0xf] %vm793_vm1, %v3222_v15  ;;  %3595 = vmatprep.subr.bf16.mxu0 %v4021_v27  ;;  %3635 = vmatpush1.bf16.msra.mxu1 %v4322_v45  ;;  %v3297_v55 = vrot.slane %v3288_v41, 4 }
 0x8aa   : > { %3636 = vmatprep.subr.bf16.mxu1 %v4350_v57 }
 0x8ab   : > { %v3233_v22 = vsel %vm369_vm5, %v3227_v48, %v3228_v49 }
 0x8ac   : > { %v3234_v51 = vsel %vm540_vm12, %v3220_v42, %v3233_v22  ;;  %v3290_v44 = vpop.permute.xlu0 %3289  ;;  %3596 = vmatpush1.bf16.msra.mxu0 %v4020_v25  ;;  %v3292_v35 = vpop.permute.xlu1 %3291  ;;  %vm5311_vm12 = vmmov %vm5308_vm9 }
 0x8ad   : > { %v3298_v58 = vrot.slane %v3290_v44, 4  ;;  %3316 = vst.msk [vmem:[#allocation3 + $0x104] sm:$0xf] %vm793_vm1, %v3290_v44  ;;  %v4023_v47 = vcombine.low %v3232_v31, %v3234_v51  ;;  %v4024_v24 = vcombine.high %v3232_v31, %v3234_v51  ;;  %3637 = vmatpush1.bf16.msra.mxu1 %v4323_v53  ;;  %v3299_v1 = vrot.slane %v3292_v35, 4 }
 0x8ae   : > { %3638 = vmatprep.subr.bf16.mxu1 %v4350_v57 }
 0x8af   : > { %v3303_v33 = vsel %vm369_vm5, %v3297_v55, %v3298_v58  ;;  %3597 = vmatprep.subr.bf16.mxu0 %v4024_v24 }
 0x8b0   : > { %v3304_v18 = vsel %vm5309_vm10, %v3288_v41, %v3303_v33  ;;  %v3294_v46 = vpop.permute.xlu0 %3293  ;;  %v4324_v8 = vld [vmem:[#allocation3 + $0xe0] ss:$12 sps:$4 sm:$0xff]   ;;  %3598 = vmatpush1.bf16.msra.mxu0 %v4023_v47 }
 0x8b1   : > { %v3300_v2 = vrot.slane %v3294_v46, 4  ;;  %3318 = vst.msk [vmem:[#allocation3 + $0x110] sm:$0x3] %vm5310_vm11, %v3294_v46  ;;  %v4026_v56 = vcombine.low %v3302_v26, %v3304_v18  ;;  %v4027_v29 = vcombine.high %v3302_v26, %v3304_v18  ;;  %3639 = vmatpush1.bf16.msra.mxu1 %v4324_v8 }
 0x8b2   : > { %3640 = vmatprep.subr.bf16.mxu1 %v4350_v57 }
 0x8b3   : > { %v3305_v52 = vsel %vm369_vm5, %v3299_v1, %v3300_v2  ;;  %3599 = vmatprep.subr.bf16.mxu0 %v4027_v29  ;;  %vm5313_vm5 = vmmov %vm5312_vm4 }
 0x8b4   : > { %v3306_v28 = vsel %vm5311_vm12, %v3292_v35, %v3305_v52  ;;  %v4325_v3 = vld [vmem:[#allocation3 + $0xf8] ss:$12 sps:$4 sm:$0xff]   ;;  %3600 = vmatpush1.bf16.msra.mxu0 %v4026_v56  ;;  %v3667_v10 = vpop.permute.xlu0 %3666 }
 0x8b5   : > { %3317 = vst [vmem:[#allocation3 + $0x108] sm:$0x33] %v3306_v28  ;;  %3641 = vmatpush1.bf16.msra.mxu1 %v4325_v3 }
 0x8b6   : > { %3642 = vmatprep.subr.bf16.mxu1 %v4350_v57 }
 0x8b8   : > { %v4326_v61 = vld [vmem:[#allocation3 + $0x110] ss:$0 sps:$4 sm:$0x33]   ;;  %v3671_v16 = vpop.permute.xlu0 %3670 }
 0x8b9   : > { %v3577_v7 = vsel %vm5312_vm4, %v4326_v61, 0 }
 0x8ba   : > { %3643 = vmatpush1.bf16.msra.mxu1 %v3577_v7 }
 0x8bc   : > { %v3364_v38 = vld [vmem:[#allocation3 + $0x108] sm:$0x33] }
 0x8bd   : > { %v4030_v9 = vcombine.high %v3364_v38, %v3364_v38  ;;  %v4029_v63 = vcombine.low %v3364_v38, %v3364_v38  ;;  %3653 = vmatmul.mubr.bf16.vlgmr.msra.gmra.mrb[16].mxu1 %v5184_v60  ;;  %v3370_v12 = vpop.permute.xlu1 %3369 }
 0x8bf   : > { %4032 = vmatprep.subr.msk.bf16.mxu0 %vm5313_vm5, %v4030_v9  ;;  %v3571_v11 = vsel %vm5314_vm14, %v4029_v63, 0 }
 0x8c0   : > { %3602 = vmatpush1.bf16.msra.mxu0 %v3571_v11 }
 0x8c1   : > { %v3669_v6 = vpop.permute.xlu1 %3668 }
 0x8c2   : > { %v3673_v17 = vsel %vm455_vm6, %v3667_v10, %v3669_v6 }
 0x8c3   : > { %3612 = vmatmul.mubr.bf16.vlgmr.msra.gmra.mrb[16].mxu0 %v5184_v60  ;;  %v3674_v60 = vsel %vm455_vm6, %v3669_v6, %v3671_v16 }
 0x990   : > { %v3654_v57 = vpop.f32.mrb[16].mxu1 }
 0x991   : > { %v3655_v13 = vadd.f32 %v3654_v57, %v3370_v12  ;;  %v3656_v59 = vpop.f32.mrb[17].mxu1 }
 0x992   : > { %v3657_v23 = vpop.f32.mrb[18].mxu1 }
 0x993   : > { %v3680_v40 = vadd.f32 %v3671_v16, %v3655_v13  ;;  %v3658_v5 = vpop.f32.mrb[19].mxu1 }
 0x995   : > { %3686 = vst.msk [vmem:[%s305_s17 + $0x8] sm:$0xf] %vm793_vm1, %v3680_v40 }
 0x996   : > { %v3613_v39 = vpop.f32.mrb[16].mxu0 }
 0x997   : > { %v3614_v31 = vadd.f32 %v3613_v39, %v3370_v12  ;;  %v3615_v14 = vpop.f32.mrb[17].mxu0 }
 0x998   : > { %v3616_v21 = vadd.f32 %v3615_v14, %v3370_v12  ;;  %v3617_v0 = vpop.f32.mrb[18].mxu0 }
 0x999   : > { %v3678_v50 = vadd.f32 %v3673_v17, %v3614_v31  ;;  %v3618_v4 = vpop.f32.mrb[19].mxu0 }
 0x99a   : > { %v3679_v34 = vadd.f32 %v3674_v60, %v3616_v21 }
 0x99c   : > { %v3683_v36 = vcombine.low %v3678_v50, %v3679_v34 }
 0x99e   : > { %3685 = vst [vmem:[%s305_s17] sm:$0xff] %v3683_v36 }
 0x99f PF: > { %s18_s27 = sadd.s32 1, %s4338_s27  }
 0x9a0   : > { %p15_p4 = scmp.ge.s32.totalorder %s18_s27, 4  }
 0x9a2   :  { %17 = sbr.rel (!%p15_p4) target bundleno = 1 (0x1), region = 82 }

</bundles_post_ra>
